<compile_context>
chip_gen: v5e
topology: v5e:2x2
jax: 0.10.0
libtpu: 0.0.40
codegen_flags: <defaults>
</compile_context>

<pallas_src>
import functools

import jax
import jax.numpy as jnp
import numpy as np
from jax import lax
from jax.experimental import pallas as pl
from jax.experimental.pallas import tpu as pltpu

EPS = 1e-6          # OpenNMT LayerNorm eps
NEG = -1e18         # additive mask value


def _vmem_limit_bytes():
    """Generation-aware VMEM scoped limit (~75% of physical)."""
    try:
        cap = int(pltpu.get_tpu_info().vmem_capacity_bytes)
    except Exception:
        cap = 64 * 1024 * 1024
    return max(32 * 1024 * 1024, min(cap * 3 // 4, 112 * 1024 * 1024))


# --------------------------- in-kernel helpers -------------------------------

def _layer_norm(y, g, b):
    mu = jnp.mean(y, axis=-1, keepdims=True)
    var = jnp.mean((y - mu) ** 2, axis=-1, keepdims=True)
    return (y - mu) * lax.rsqrt(var + EPS) * g + b


def _project(x_bh, w_ref, b_ref):
    """(H, L, d_model) bf16 @ (H, d_model, dout) bf16 -> (H, L, dout) f32 + bias."""
    return jnp.einsum('hlm,hmd->hld', x_bh, w_ref[...],
                      preferred_element_type=jnp.float32) + b_ref[...]


def _mh_attention(q3, k3, v3, madd, wo_ref, bo_ref):
    """Head-batched attention.  q3:(H,Lq,dk) k3:(H,Lk,dk) v3:(H,Lk,dv) f32,
    madd:(Lq,Lk) additive mask.  Returns (out (Lq,d_model) f32, head-0 probs)."""
    s = jnp.einsum('hqd,hkd->hqk', q3.astype(jnp.bfloat16), k3.astype(jnp.bfloat16),
                   preferred_element_type=jnp.float32)              # (H,Lq,Lk) f32
    s = s + madd[None]                                              # keep scores f32
    m = jnp.max(s, axis=-1, keepdims=True)
    e = jnp.exp(s - m)
    p = e * pl.reciprocal(jnp.sum(e, axis=-1, keepdims=True), approx=False)
    ctx = jnp.einsum('hqk,hkd->hqd', p.astype(jnp.bfloat16), v3.astype(jnp.bfloat16),
                     preferred_element_type=jnp.float32)            # (H,Lq,dv)
    oh = jnp.einsum('hqv,hvm->hqm', ctx.astype(jnp.bfloat16), wo_ref[...],
                    preferred_element_type=jnp.float32)             # (H,Lq,dm)
    return jnp.sum(oh, axis=0) + bo_ref[...], p[0]


# --------------------------- fused layer kernel ------------------------------

def _decoder_layer_kernel(
        x_ref, mem_ref, gnn_ref, tgt_add_ref, src_add_ref, node_add_ref,
        wqkv_s_ref, bqkv_s_ref, wo_s_ref, bo_s_ref, ln1_g_ref, ln1_b_ref,
        wq_g_ref, bq_g_ref, wkv_g_ref, bkv_g_ref, wo_g_ref, bo_g_ref,
        ln3_g_ref, ln3_b_ref,
        wq_c_ref, bq_c_ref, wkv_c_ref, bkv_c_ref, wo_c_ref, bo_c_ref,
        ln2_g_ref, ln2_b_ref,
        lnf_g_ref, lnf_b_ref, w1_ref, b1_ref, w2_ref, b2_ref,
        out_ref, attn_ref, attn_gnn_ref,
        *, heads, d_k, d_v):
    Lq = x_ref.shape[1]
    Ls = mem_ref.shape[1]
    Ln = gnn_ref.shape[1]
    dm = x_ref.shape[2]

    x = x_ref[0]                                                    # (Lq, dm) f32

    # ---------------- self attention (fused Q|K|V, causal + pad mask) --------
    xh = jnp.broadcast_to(x.astype(jnp.bfloat16)[None], (heads, Lq, dm))
    qkv = _project(xh, wqkv_s_ref, bqkv_s_ref)                      # (H,Lq,2dk+dv)
    row = lax.broadcasted_iota(jnp.int32, (Lq, Lq), 0)
    col = lax.broadcasted_iota(jnp.int32, (Lq, Lq), 1)
    madd_self = jnp.where(col > row, NEG,
                          jnp.broadcast_to(tgt_add_ref[0], (Lq, Lq)))
    o_self, _ = _mh_attention(qkv[..., :d_k], qkv[..., d_k:2 * d_k],
                              qkv[..., 2 * d_k:], madd_self, wo_s_ref, bo_s_ref)
    qn = _layer_norm(o_self + x, ln1_g_ref[...], ln1_b_ref[...])    # query_norm

    # ---------------- gnn attention ------------------------------------------
    gh = jnp.broadcast_to(gnn_ref[0].astype(jnp.bfloat16)[None], (heads, Ln, dm))
    kv_g = _project(gh, wkv_g_ref, bkv_g_ref)                       # (H,Ln,dk+dv)
    qh = jnp.broadcast_to(qn.astype(jnp.bfloat16)[None], (heads, Lq, dm))
    q_g = _project(qh, wq_g_ref, bq_g_ref)                          # (H,Lq,dk)
    o_g, p_g = _mh_attention(q_g, kv_g[..., :d_k], kv_g[..., d_k:],
                             jnp.broadcast_to(node_add_ref[0], (Lq, Ln)),
                             wo_g_ref, bo_g_ref)
    attn_gnn_ref[0] = p_g
    qn = _layer_norm(o_g + qn, ln3_g_ref[...], ln3_b_ref[...])

    # ---------------- context attention --------------------------------------
    mh = jnp.broadcast_to(mem_ref[0].astype(jnp.bfloat16)[None], (heads, Ls, dm))
    kv_c = _project(mh, wkv_c_ref, bkv_c_ref)                       # (H,Ls,dk+dv)
    qh = jnp.broadcast_to(qn.astype(jnp.bfloat16)[None], (heads, Lq, dm))
    q_c = _project(qh, wq_c_ref, bq_c_ref)                          # (H,Lq,dk)
    o_c, p_c = _mh_attention(q_c, kv_c[..., :d_k], kv_c[..., d_k:],
                             jnp.broadcast_to(src_add_ref[0], (Lq, Ls)),
                             wo_c_ref, bo_c_ref)
    attn_ref[0] = p_c
    qn = _layer_norm(o_c + qn, ln2_g_ref[...], ln2_b_ref[...])

    # ---------------- positionwise feed-forward ------------------------------
    xn = _layer_norm(qn, lnf_g_ref[...], lnf_b_ref[...])
    h = jnp.dot(xn.astype(jnp.bfloat16), w1_ref[...],
                preferred_element_type=jnp.float32) + b1_ref[...]
    h = jnp.maximum(h, 0.0)
    out_ref[0] = jnp.dot(h.astype(jnp.bfloat16), w2_ref[...],
                         preferred_element_type=jnp.float32) + b2_ref[...] + qn


# --------------------------- wrapper (one pallas_call) -----------------------

def _const_spec(a):
    # full-array weight block, constant index_map (fetched once across the grid)
    return pl.BlockSpec(a.shape, lambda *_: (0,) * a.ndim)


def transformer_decoder_layer(prep, inputs, memory_bank, src_pad_mask,
                              tgt_pad_mask, gnn, node_pad_mask, *,
                              heads, d_k, d_v):
    # TODO(synk): gnn=None / memory_bank=None decoding paths are not fused here.
    assert gnn is not None and memory_bank is not None
    B, Lq, d_model = inputs.shape
    Ls = memory_bank.shape[1]
    Ln = gnn.shape[1]

    # tiny additive pad rows; the causal triangle is built in-kernel
    tgt_add = jnp.where(tgt_pad_mask != 0, NEG, 0.0).astype(jnp.float32)    # (B,1,Lq)
    src_add = jnp.where(src_pad_mask != 0, NEG, 0.0).astype(jnp.float32)    # (B,1,Ls)
    node_add = jnp.where(node_pad_mask != 0, NEG, 0.0).astype(jnp.float32)  # (B,1,Ln)

    s, g, c, f = prep['self'], prep['gnn'], prep['ctx'], prep['ffn']
    weights = [s['wqkv'], s['bqkv'], s['wo'], s['bo'], prep['ln1_g'], prep['ln1_b'],
               g['wq'], g['bq'], g['wkv'], g['bkv'], g['wo'], g['bo'],
               prep['ln3_g'], prep['ln3_b'],
               c['wq'], c['bq'], c['wkv'], c['bkv'], c['wo'], c['bo'],
               prep['ln2_g'], prep['ln2_b'],
               f['ln_g'], f['ln_b'], f['w1'], f['b1'], f['w2'], f['b2']]

    kernel = functools.partial(_decoder_layer_kernel,
                               heads=heads, d_k=d_k, d_v=d_v)

    out, attn, attn_gnn = pl.pallas_call(
        kernel,
        out_shape=(jax.ShapeDtypeStruct((B, Lq, d_model), jnp.float32),
                   jax.ShapeDtypeStruct((B, Lq, Ls), jnp.float32),
                   jax.ShapeDtypeStruct((B, Lq, Ln), jnp.float32)),
        grid=(B,),
        in_specs=[pl.BlockSpec((1, Lq, d_model), lambda b: (b, 0, 0)),
                  pl.BlockSpec((1, Ls, d_model), lambda b: (b, 0, 0)),
                  pl.BlockSpec((1, Ln, d_model), lambda b: (b, 0, 0)),
                  pl.BlockSpec((1, 1, Lq), lambda b: (b, 0, 0)),
                  pl.BlockSpec((1, 1, Ls), lambda b: (b, 0, 0)),
                  pl.BlockSpec((1, 1, Ln), lambda b: (b, 0, 0))]
                 + [_const_spec(w) for w in weights],
        out_specs=(pl.BlockSpec((1, Lq, d_model), lambda b: (b, 0, 0)),
                   pl.BlockSpec((1, Lq, Ls), lambda b: (b, 0, 0)),
                   pl.BlockSpec((1, Lq, Ln), lambda b: (b, 0, 0))),
        compiler_params=pltpu.CompilerParams(
            dimension_semantics=("parallel",),
            vmem_limit_bytes=_vmem_limit_bytes()),
    )(inputs, memory_bank, gnn, tgt_add, src_add, node_add, *weights)

    coverage = None
    return out, attn, coverage, attn_gnn


# --------------------------- params -------------------------------------------

def init_params(key, d_model, heads, d_k, d_v, d_ff):
    def lin(k, din, dout):
        kw, kb = jax.random.split(k)
        return (0.02 * jax.random.normal(kw, (din, dout), jnp.float32),
                0.02 * jax.random.normal(kb, (1, dout), jnp.float32))

    def attn_p(k):
        ks = jax.random.split(k, 4)
        Wq, bq = lin(ks[0], d_model, heads * d_k)
        Wk, bk = lin(ks[1], d_model, heads * d_k)
        Wv, bv = lin(ks[2], d_model, heads * d_v)
        Wo, bo = lin(ks[3], heads * d_v, d_model)
        return dict(Wq=Wq, bq=bq, Wk=Wk, bk=bk, Wv=Wv, bv=bv, Wo=Wo, bo=bo)

    ks = jax.random.split(key, 12)

    def ln_pair(kg, kb):
        return (1.0 + 0.1 * jax.random.normal(kg, (1, d_model), jnp.float32),
                0.1 * jax.random.normal(kb, (1, d_model), jnp.float32))

    ln1_g, ln1_b = ln_pair(ks[3], ks[4])
    ln2_g, ln2_b = ln_pair(ks[5], ks[6])
    ln3_g, ln3_b = ln_pair(ks[7], ks[8])
    lnf_g, lnf_b = ln_pair(ks[9], ks[10])
    fk = jax.random.split(ks[11], 2)
    w1, b1 = lin(fk[0], d_model, d_ff)
    w2, b2 = lin(fk[1], d_ff, d_model)
    return {
        'self': attn_p(ks[0]), 'ctx': attn_p(ks[1]), 'gnn': attn_p(ks[2]),
        'ln1_g': ln1_g, 'ln1_b': ln1_b,
        'ln2_g': ln2_g, 'ln2_b': ln2_b,
        'ln3_g': ln3_g, 'ln3_b': ln3_b,
        'ffn': dict(ln_g=lnf_g, ln_b=lnf_b, w1=w1, b1=b1, w2=w2, b2=b2),
    }


def prepare_params(params, heads, d_k, d_v):
    """One-time packing: head-major (H, d_model, d) weights, 1/sqrt(d_k) folded
    into Wq/bq, fused Q|K|V (self) / K|V (cross) weights, bf16 matmul weights."""
    scale = 1.0 / float(np.sqrt(d_k))

    def heads_w(W, d):                 # (d_model, H*d) -> (H, d_model, d)
        return jnp.transpose(W.reshape(W.shape[0], heads, d), (1, 0, 2))

    def heads_b(b, d):                 # (1, H*d) -> (H, 1, d)
        return jnp.transpose(b.reshape(1, heads, d), (1, 0, 2))

    def prep_self(p):
        wqkv = jnp.concatenate([heads_w(p['Wq'] * scale, d_k),
                                heads_w(p['Wk'], d_k),
                                heads_w(p['Wv'], d_v)], axis=2)
        bqkv = jnp.concatenate([heads_b(p['bq'] * scale, d_k),
                                heads_b(p['bk'], d_k),
                                heads_b(p['bv'], d_v)], axis=2)
        return dict(wqkv=wqkv.astype(jnp.bfloat16), bqkv=bqkv,
                    wo=p['Wo'].reshape(heads, d_v, -1).astype(jnp.bfloat16),
                    bo=p['bo'])

    def prep_cross(p):
        wkv = jnp.concatenate([heads_w(p['Wk'], d_k),
                               heads_w(p['Wv'], d_v)], axis=2)
        bkv = jnp.concatenate([heads_b(p['bk'], d_k),
                               heads_b(p['bv'], d_v)], axis=2)
        return dict(wq=heads_w(p['Wq'] * scale, d_k).astype(jnp.bfloat16),
                    bq=heads_b(p['bq'] * scale, d_k),
                    wkv=wkv.astype(jnp.bfloat16), bkv=bkv,
                    wo=p['Wo'].reshape(heads, d_v, -1).astype(jnp.bfloat16),
                    bo=p['bo'])

    f = params['ffn']
    return dict(
        self=prep_self(params['self']),
        gnn=prep_cross(params['gnn']),
        ctx=prep_cross(params['ctx']),
        ln1_g=params['ln1_g'], ln1_b=params['ln1_b'],
        ln2_g=params['ln2_g'], ln2_b=params['ln2_b'],
        ln3_g=params['ln3_g'], ln3_b=params['ln3_b'],
        ffn=dict(ln_g=f['ln_g'], ln_b=f['ln_b'],
                 w1=f['w1'].astype(jnp.bfloat16), b1=f['b1'],
                 w2=f['w2'].astype(jnp.bfloat16), b2=f['b2']))


# --------------------------- pure-JAX reference (f32) ------------------------

def _ref_ln(y, g, b):
    mu = jnp.mean(y, axis=-1, keepdims=True)
    var = jnp.mean((y - mu) ** 2, axis=-1, keepdims=True)
    return (y - mu) * lax.rsqrt(var + EPS) * g + b


def _ref_mha(p, key_in, value_in, query_in, mask, heads, d_k, d_v):
    B, Lk, dm = key_in.shape
    Lq = query_in.shape[1]
    k = (key_in @ p['Wk'] + p['bk']).reshape(B, Lk, heads, d_k).transpose(0, 2, 1, 3)
    v = (value_in @ p['Wv'] + p['bv']).reshape(B, Lk, heads, d_v).transpose(0, 2, 1, 3)
    q = (query_in @ p['Wq'] + p['bq']).reshape(B, Lq, heads, d_k).transpose(0, 2, 1, 3)
    scores = jnp.einsum('bhqd,bhkd->bhqk', q / np.sqrt(d_k), k)
    scores = jnp.where(mask[:, None] > 0.5, NEG, scores)
    pr = jax.nn.softmax(scores, axis=-1)
    ctx = jnp.einsum('bhqk,bhkd->bhqd', pr, v)
    ctx = ctx.transpose(0, 2, 1, 3).reshape(B, Lq, heads * d_v)
    return ctx @ p['Wo'] + p['bo'], pr[:, 0]


def ref_decoder_layer(params, inputs, memory_bank, src_pad_mask, tgt_pad_mask,
                      gnn, node_pad_mask, heads, d_k, d_v):
    B, Lq, dm = inputs.shape
    future = jnp.triu(jnp.ones((Lq, Lq), jnp.float32), 1)[None]
    dec_mask = ((tgt_pad_mask.astype(jnp.float32) + future) > 0).astype(jnp.float32)
    query, _ = _ref_mha(params['self'], inputs, inputs, inputs, dec_mask,
                        heads, d_k, d_v)
    qn = _ref_ln(query + inputs, params['ln1_g'], params['ln1_b'])
    Ln = gnn.shape[1]
    node_mask = jnp.broadcast_to(node_pad_mask.astype(jnp.float32), (B, Lq, Ln))
    gnn_out, a_gnn = _ref_mha(params['gnn'], gnn, gnn, qn, node_mask,
                              heads, d_k, d_v)
    qn = _ref_ln(gnn_out + qn, params['ln3_g'], params['ln3_b'])
    Ls = memory_bank.shape[1]
    src_mask = jnp.broadcast_to(src_pad_mask.astype(jnp.float32), (B, Lq, Ls))
    mid, a_ctx = _ref_mha(params['ctx'], memory_bank, memory_bank, qn, src_mask,
                          heads, d_k, d_v)
    qn = _ref_ln(mid + qn, params['ln2_g'], params['ln2_b'])
    f = params['ffn']
    xn = _ref_ln(qn, f['ln_g'], f['ln_b'])
    h = jnp.maximum(xn @ f['w1'] + f['b1'], 0.0)
    out = h @ f['w2'] + f['b2'] + qn
    return out, a_ctx, None, a_gnn


# --------------------------- main ---------------------------------------------

if __name__ == "__main__":
    B, Lq, Ls, Ln = 2, 8, 8, 8
    d_model, heads, d_k, d_v, d_ff = 32, 4, 8, 8, 64

    key = jax.random.PRNGKey(0)
    k_in, k_mem, k_gnn, k_par = jax.random.split(key, 4)
    inputs = jax.random.normal(k_in, (B, Lq, d_model), jnp.float32)
    memory_bank = jax.random.normal(k_mem, (B, Ls, d_model), jnp.float32)
    gnn = jax.random.normal(k_gnn, (B, Ln, d_model), jnp.float32)

    src_pad_mask = jnp.array([[[0, 0, 0, 0, 0, 0, 1, 1]],
                              [[0, 0, 0, 0, 0, 1, 1, 1]]], jnp.int32)   # (B,1,Ls)
    tgt_pad_mask = jnp.array([[[0, 0, 0, 0, 0, 0, 0, 0]],
                              [[0, 0, 0, 0, 0, 0, 1, 1]]], jnp.int32)   # (B,1,Lq)
    node_pad_mask = jnp.array([[[0, 0, 0, 0, 1, 1, 1, 1]],
                               [[0, 0, 0, 0, 0, 0, 0, 0]]], jnp.int32)  # (B,1,Ln)

    params = init_params(k_par, d_model, heads, d_k, d_v, d_ff)
    prep = prepare_params(params, heads, d_k, d_v)

    layer_fn = jax.jit(functools.partial(transformer_decoder_layer,
                                         heads=heads, d_k=d_k, d_v=d_v))
    out, attn, coverage, attn_gnn = layer_fn(prep, inputs, memory_bank,
                                             src_pad_mask, tgt_pad_mask,
                                             gnn, node_pad_mask)
    jax.block_until_ready((out, attn, attn_gnn))

    # correctness check against pure-JAX f32 reference (kernel uses bf16 matmuls)
    ro, ra, _, rg = ref_decoder_layer(params, inputs, memory_bank, src_pad_mask,
                                      tgt_pad_mask, gnn, node_pad_mask,
                                      heads, d_k, d_v)
    np.testing.assert_allclose(np.asarray(out), np.asarray(ro),
                               atol=2e-2, rtol=2e-2)
    np.testing.assert_allclose(np.asarray(attn), np.asarray(ra),
                               atol=2e-2, rtol=2e-2)
    np.testing.assert_allclose(np.asarray(attn_gnn), np.asarray(rg),
                               atol=2e-2, rtol=2e-2)

    assert out.shape == (B, Lq, d_model)
    assert attn.shape == (B, Lq, Ls)
    assert attn_gnn.shape == (B, Lq, Ln)
    assert coverage is None
    print("KERNEL_OK")
</pallas_src>

<mosaic_0001>
module attributes {stable_mosaic.version = 11 : i64} {
  func.func @_decoder_layer_kernel(%arg0: i32, %arg1: memref<1x8x32xf32, #tpu.memory_space<vmem>>, %arg2: memref<1x8x32xf32, #tpu.memory_space<vmem>>, %arg3: memref<1x8x32xf32, #tpu.memory_space<vmem>>, %arg4: memref<1x1x8xf32, #tpu.memory_space<vmem>>, %arg5: memref<1x1x8xf32, #tpu.memory_space<vmem>>, %arg6: memref<1x1x8xf32, #tpu.memory_space<vmem>>, %arg7: memref<4x32x24xbf16, #tpu.memory_space<vmem>>, %arg8: memref<4x1x24xf32, #tpu.memory_space<vmem>>, %arg9: memref<4x8x32xbf16, #tpu.memory_space<vmem>>, %arg10: memref<1x32xf32, #tpu.memory_space<vmem>>, %arg11: memref<1x32xf32, #tpu.memory_space<vmem>>, %arg12: memref<1x32xf32, #tpu.memory_space<vmem>>, %arg13: memref<4x32x8xbf16, #tpu.memory_space<vmem>>, %arg14: memref<4x1x8xf32, #tpu.memory_space<vmem>>, %arg15: memref<4x32x16xbf16, #tpu.memory_space<vmem>>, %arg16: memref<4x1x16xf32, #tpu.memory_space<vmem>>, %arg17: memref<4x8x32xbf16, #tpu.memory_space<vmem>>, %arg18: memref<1x32xf32, #tpu.memory_space<vmem>>, %arg19: memref<1x32xf32, #tpu.memory_space<vmem>>, %arg20: memref<1x32xf32, #tpu.memory_space<vmem>>, %arg21: memref<4x32x8xbf16, #tpu.memory_space<vmem>>, %arg22: memref<4x1x8xf32, #tpu.memory_space<vmem>>, %arg23: memref<4x32x16xbf16, #tpu.memory_space<vmem>>, %arg24: memref<4x1x16xf32, #tpu.memory_space<vmem>>, %arg25: memref<4x8x32xbf16, #tpu.memory_space<vmem>>, %arg26: memref<1x32xf32, #tpu.memory_space<vmem>>, %arg27: memref<1x32xf32, #tpu.memory_space<vmem>>, %arg28: memref<1x32xf32, #tpu.memory_space<vmem>>, %arg29: memref<1x32xf32, #tpu.memory_space<vmem>>, %arg30: memref<1x32xf32, #tpu.memory_space<vmem>>, %arg31: memref<32x64xbf16, #tpu.memory_space<vmem>>, %arg32: memref<1x64xf32, #tpu.memory_space<vmem>>, %arg33: memref<64x32xbf16, #tpu.memory_space<vmem>>, %arg34: memref<1x32xf32, #tpu.memory_space<vmem>>, %arg35: memref<1x8x32xf32, #tpu.memory_space<vmem>>, %arg36: memref<1x8x8xf32, #tpu.memory_space<vmem>>, %arg37: memref<1x8x8xf32, #tpu.memory_space<vmem>>) attributes {dimension_semantics = [#tpu.dimension_semantics<parallel>], iteration_bounds = array<i64: 2>, scalar_prefetch = 0 : i64, scratch_operands = 0 : i64, tpu.core_type = #tpu.core_type<tc>, window_params = [{transform_indices = @transform_0, window_bounds = array<i64: 1, 8, 32>}, {transform_indices = @transform_1, window_bounds = array<i64: 1, 8, 32>}, {transform_indices = @transform_2, window_bounds = array<i64: 1, 8, 32>}, {transform_indices = @transform_3, window_bounds = array<i64: 1, 1, 8>}, {transform_indices = @transform_4, window_bounds = array<i64: 1, 1, 8>}, {transform_indices = @transform_5, window_bounds = array<i64: 1, 1, 8>}, {pipeline_mode = #tpu.pipeline_mode<synchronous>, transform_indices = @transform_6, window_bounds = array<i64: 4, 32, 24>}, {pipeline_mode = #tpu.pipeline_mode<synchronous>, transform_indices = @transform_7, window_bounds = array<i64: 4, 1, 24>}, {pipeline_mode = #tpu.pipeline_mode<synchronous>, transform_indices = @transform_8, window_bounds = array<i64: 4, 8, 32>}, {pipeline_mode = #tpu.pipeline_mode<synchronous>, transform_indices = @transform_9, window_bounds = array<i64: 1, 32>}, {pipeline_mode = #tpu.pipeline_mode<synchronous>, transform_indices = @transform_10, window_bounds = array<i64: 1, 32>}, {pipeline_mode = #tpu.pipeline_mode<synchronous>, transform_indices = @transform_11, window_bounds = array<i64: 1, 32>}, {pipeline_mode = #tpu.pipeline_mode<synchronous>, transform_indices = @transform_12, window_bounds = array<i64: 4, 32, 8>}, {pipeline_mode = #tpu.pipeline_mode<synchronous>, transform_indices = @transform_13, window_bounds = array<i64: 4, 1, 8>}, {pipeline_mode = #tpu.pipeline_mode<synchronous>, transform_indices = @transform_14, window_bounds = array<i64: 4, 32, 16>}, {pipeline_mode = #tpu.pipeline_mode<synchronous>, transform_indices = @transform_15, window_bounds = array<i64: 4, 1, 16>}, {pipeline_mode = #tpu.pipeline_mode<synchronous>, transform_indices = @transform_16, window_bounds = array<i64: 4, 8, 32>}, {pipeline_mode = #tpu.pipeline_mode<synchronous>, transform_indices = @transform_17, window_bounds = array<i64: 1, 32>}, {pipeline_mode = #tpu.pipeline_mode<synchronous>, transform_indices = @transform_18, window_bounds = array<i64: 1, 32>}, {pipeline_mode = #tpu.pipeline_mode<synchronous>, transform_indices = @transform_19, window_bounds = array<i64: 1, 32>}, {pipeline_mode = #tpu.pipeline_mode<synchronous>, transform_indices = @transform_20, window_bounds = array<i64: 4, 32, 8>}, {pipeline_mode = #tpu.pipeline_mode<synchronous>, transform_indices = @transform_21, window_bounds = array<i64: 4, 1, 8>}, {pipeline_mode = #tpu.pipeline_mode<synchronous>, transform_indices = @transform_22, window_bounds = array<i64: 4, 32, 16>}, {pipeline_mode = #tpu.pipeline_mode<synchronous>, transform_indices = @transform_23, window_bounds = array<i64: 4, 1, 16>}, {pipeline_mode = #tpu.pipeline_mode<synchronous>, transform_indices = @transform_24, window_bounds = array<i64: 4, 8, 32>}, {pipeline_mode = #tpu.pipeline_mode<synchronous>, transform_indices = @transform_25, window_bounds = array<i64: 1, 32>}, {pipeline_mode = #tpu.pipeline_mode<synchronous>, transform_indices = @transform_26, window_bounds = array<i64: 1, 32>}, {pipeline_mode = #tpu.pipeline_mode<synchronous>, transform_indices = @transform_27, window_bounds = array<i64: 1, 32>}, {pipeline_mode = #tpu.pipeline_mode<synchronous>, transform_indices = @transform_28, window_bounds = array<i64: 1, 32>}, {pipeline_mode = #tpu.pipeline_mode<synchronous>, transform_indices = @transform_29, window_bounds = array<i64: 1, 32>}, {pipeline_mode = #tpu.pipeline_mode<synchronous>, transform_indices = @transform_30, window_bounds = array<i64: 32, 64>}, {pipeline_mode = #tpu.pipeline_mode<synchronous>, transform_indices = @transform_31, window_bounds = array<i64: 1, 64>}, {pipeline_mode = #tpu.pipeline_mode<synchronous>, transform_indices = @transform_32, window_bounds = array<i64: 64, 32>}, {pipeline_mode = #tpu.pipeline_mode<synchronous>, transform_indices = @transform_33, window_bounds = array<i64: 1, 32>}, {transform_indices = @transform_34, window_bounds = array<i64: 1, 8, 32>}, {transform_indices = @transform_35, window_bounds = array<i64: 1, 8, 8>}, {transform_indices = @transform_36, window_bounds = array<i64: 1, 8, 8>}]} {
    %c0 = arith.constant 0 : index
    %c0_0 = arith.constant 0 : index
    %c0_1 = arith.constant 0 : index
    %0 = vector.load %arg1[%c0, %c0_0, %c0_1] : memref<1x8x32xf32, #tpu.memory_space<vmem>>, vector<1x8x32xf32>
    %1 = vector.shape_cast %0 : vector<1x8x32xf32> to vector<8x32xf32>
    %2 = arith.truncf %1 : vector<8x32xf32> to vector<8x32xbf16>
    %3 = vector.shape_cast %2 : vector<8x32xbf16> to vector<1x8x32xbf16>
    %4 = vector.shape_cast %3 : vector<1x8x32xbf16> to vector<1x8x32xbf16>
    %5 = vector.broadcast %4 : vector<1x8x32xbf16> to vector<4x8x32xbf16>
    %c0_2 = arith.constant 0 : index
    %c0_3 = arith.constant 0 : index
    %c0_4 = arith.constant 0 : index
    %6 = vector.load %arg7[%c0_2, %c0_3, %c0_4] : memref<4x32x24xbf16, #tpu.memory_space<vmem>>, vector<4x32x24xbf16>
    "tpu.trace_start"() <{level = 10 : i32, message = "hlm,hmd->hld"}> : () -> ()
    %cst = arith.constant dense<0.000000e+00> : vector<4x8x24xf32>
    %7 = tpu.matmul %5, %6, %cst {dimension_numbers = #tpu.dot_dimension_numbers<[2], [1], [1], [2], [0, 0, 0, 1, 1, 2], [0], [0]>} : vector<4x8x32xbf16>, vector<4x32x24xbf16>, vector<4x8x24xf32> -> vector<4x8x24xf32>
    "tpu.trace_stop"() : () -> ()
    %c0_5 = arith.constant 0 : index
    %c0_6 = arith.constant 0 : index
    %c0_7 = arith.constant 0 : index
    %8 = vector.load %arg8[%c0_5, %c0_6, %c0_7] : memref<4x1x24xf32, #tpu.memory_space<vmem>>, vector<4x1x24xf32>
    %9 = vector.broadcast %8 : vector<4x1x24xf32> to vector<4x8x24xf32>
    %10 = arith.addf %7, %9 : vector<4x8x24xf32>
    %11 = tpu.iota {dimensions = array<i32: 0>} : vector<8x8xi32>
    %12 = tpu.iota {dimensions = array<i32: 1>} : vector<8x8xi32>
    %13 = arith.cmpi sgt, %12, %11 : vector<8x8xi32>
    %c0_8 = arith.constant 0 : index
    %c0_9 = arith.constant 0 : index
    %c0_10 = arith.constant 0 : index
    %14 = vector.load %arg4[%c0_8, %c0_9, %c0_10] : memref<1x1x8xf32, #tpu.memory_space<vmem>>, vector<1x1x8xf32>
    %15 = vector.shape_cast %14 : vector<1x1x8xf32> to vector<1x8xf32>
    %16 = vector.shape_cast %15 : vector<1x8xf32> to vector<1x8xf32>
    %17 = vector.broadcast %16 : vector<1x8xf32> to vector<8x8xf32>
    %cst_11 = arith.constant -9.99999984E+17 : f32
    %18 = vector.broadcast %cst_11 : f32 to vector<8x8xf32>
    %19 = arith.select %13, %18, %17 : vector<8x8xi1>, vector<8x8xf32>
    %20 = vector.extract_strided_slice %10 {offsets = [0, 0, 0], sizes = [4, 8, 8], strides = [1, 1, 1]} : vector<4x8x24xf32> to vector<4x8x8xf32>
    %21 = vector.extract_strided_slice %10 {offsets = [0, 0, 8], sizes = [4, 8, 8], strides = [1, 1, 1]} : vector<4x8x24xf32> to vector<4x8x8xf32>
    %22 = vector.extract_strided_slice %10 {offsets = [0, 0, 16], sizes = [4, 8, 8], strides = [1, 1, 1]} : vector<4x8x24xf32> to vector<4x8x8xf32>
    %23 = arith.truncf %20 : vector<4x8x8xf32> to vector<4x8x8xbf16>
    %24 = arith.truncf %21 : vector<4x8x8xf32> to vector<4x8x8xbf16>
    "tpu.trace_start"() <{level = 10 : i32, message = "hqd,hkd->hqk"}> : () -> ()
    %cst_12 = arith.constant dense<0.000000e+00> : vector<4x8x8xf32>
    %25 = tpu.matmul %23, %24, %cst_12 {dimension_numbers = #tpu.dot_dimension_numbers<[2], [2], [1], [1], [0, 0, 0, 1, 1, 1], [0], [0]>} : vector<4x8x8xbf16>, vector<4x8x8xbf16>, vector<4x8x8xf32> -> vector<4x8x8xf32>
    "tpu.trace_stop"() : () -> ()
    %26 = vector.shape_cast %19 : vector<8x8xf32> to vector<1x8x8xf32>
    %27 = vector.broadcast %26 : vector<1x8x8xf32> to vector<4x8x8xf32>
    %28 = arith.addf %25, %27 : vector<4x8x8xf32>
    %cst_13 = arith.constant dense<0xFF800000> : vector<4x8xf32>
    %29 = vector.multi_reduction <maximumf>, %28, %cst_13 [2] : vector<4x8x8xf32> to vector<4x8xf32>
    %30 = vector.shape_cast %29 : vector<4x8xf32> to vector<4x8x1xf32>
    %31 = vector.broadcast %30 : vector<4x8x1xf32> to vector<4x8x8xf32>
    %32 = arith.subf %28, %31 : vector<4x8x8xf32>
    %33 = math.exp %32 : vector<4x8x8xf32>
    %cst_14 = arith.constant dense<0.000000e+00> : vector<4x8xf32>
    %34 = vector.multi_reduction <add>, %33, %cst_14 [2] : vector<4x8x8xf32> to vector<4x8xf32>
    %35 = vector.shape_cast %34 : vector<4x8xf32> to vector<4x8x1xf32>
    %36 = tpu.reciprocal %35 : vector<4x8x1xf32> -> vector<4x8x1xf32>
    %37 = vector.broadcast %36 : vector<4x8x1xf32> to vector<4x8x8xf32>
    %38 = arith.mulf %33, %37 : vector<4x8x8xf32>
    %39 = arith.truncf %38 : vector<4x8x8xf32> to vector<4x8x8xbf16>
    %40 = arith.truncf %22 : vector<4x8x8xf32> to vector<4x8x8xbf16>
    "tpu.trace_start"() <{level = 10 : i32, message = "hqk,hkd->hqd"}> : () -> ()
    %cst_15 = arith.constant dense<0.000000e+00> : vector<4x8x8xf32>
    %41 = tpu.matmul %39, %40, %cst_15 {dimension_numbers = #tpu.dot_dimension_numbers<[2], [1], [1], [2], [0, 0, 0, 1, 1, 2], [0], [0]>} : vector<4x8x8xbf16>, vector<4x8x8xbf16>, vector<4x8x8xf32> -> vector<4x8x8xf32>
    "tpu.trace_stop"() : () -> ()
    %42 = arith.truncf %41 : vector<4x8x8xf32> to vector<4x8x8xbf16>
    %c0_16 = arith.constant 0 : index
    %c0_17 = arith.constant 0 : index
    %c0_18 = arith.constant 0 : index
    %43 = vector.load %arg9[%c0_16, %c0_17, %c0_18] : memref<4x8x32xbf16, #tpu.memory_space<vmem>>, vector<4x8x32xbf16>
    "tpu.trace_start"() <{level = 10 : i32, message = "hqv,hvm->hqm"}> : () -> ()
    %cst_19 = arith.constant dense<0.000000e+00> : vector<4x8x32xf32>
    %44 = tpu.matmul %42, %43, %cst_19 {dimension_numbers = #tpu.dot_dimension_numbers<[2], [1], [1], [2], [0, 0, 0, 1, 1, 2], [0], [0]>} : vector<4x8x8xbf16>, vector<4x8x32xbf16>, vector<4x8x32xf32> -> vector<4x8x32xf32>
    "tpu.trace_stop"() : () -> ()
    %cst_20 = arith.constant dense<0.000000e+00> : vector<8x32xf32>
    %45 = vector.multi_reduction <add>, %44, %cst_20 [0] : vector<4x8x32xf32> to vector<8x32xf32>
    %c0_21 = arith.constant 0 : index
    %c0_22 = arith.constant 0 : index
    %46 = vector.load %arg10[%c0_21, %c0_22] : memref<1x32xf32, #tpu.memory_space<vmem>>, vector<1x32xf32>
    %47 = vector.broadcast %46 : vector<1x32xf32> to vector<8x32xf32>
    %48 = arith.addf %45, %47 : vector<8x32xf32>
    %49 = arith.addf %48, %1 : vector<8x32xf32>
    %c0_23 = arith.constant 0 : index
    %c0_24 = arith.constant 0 : index
    %50 = vector.load %arg11[%c0_23, %c0_24] : memref<1x32xf32, #tpu.memory_space<vmem>>, vector<1x32xf32>
    %c0_25 = arith.constant 0 : index
    %c0_26 = arith.constant 0 : index
    %51 = vector.load %arg12[%c0_25, %c0_26] : memref<1x32xf32, #tpu.memory_space<vmem>>, vector<1x32xf32>
    %cst_27 = arith.constant dense<0.000000e+00> : vector<8xf32>
    %52 = vector.multi_reduction <add>, %49, %cst_27 [1] : vector<8x32xf32> to vector<8xf32>
    %53 = vector.shape_cast %52 : vector<8xf32> to vector<8x1xf32>
    %cst_28 = arith.constant 3.200000e+01 : f32
    %54 = vector.broadcast %cst_28 : f32 to vector<8x1xf32>
    %55 = arith.divf %53, %54 : vector<8x1xf32>
    %56 = vector.broadcast %55 : vector<8x1xf32> to vector<8x32xf32>
    %57 = arith.subf %49, %56 : vector<8x32xf32>
    %58 = arith.mulf %57, %57 : vector<8x32xf32>
    %cst_29 = arith.constant dense<0.000000e+00> : vector<8xf32>
    %59 = vector.multi_reduction <add>, %58, %cst_29 [1] : vector<8x32xf32> to vector<8xf32>
    %60 = vector.shape_cast %59 : vector<8xf32> to vector<8x1xf32>
    %cst_30 = arith.constant 3.200000e+01 : f32
    %61 = vector.broadcast %cst_30 : f32 to vector<8x1xf32>
    %62 = arith.divf %60, %61 : vector<8x1xf32>
    %63 = vector.broadcast %55 : vector<8x1xf32> to vector<8x32xf32>
    %64 = arith.subf %49, %63 : vector<8x32xf32>
    %cst_31 = arith.constant 9.99999997E-7 : f32
    %65 = vector.broadcast %cst_31 : f32 to vector<8x1xf32>
    %66 = arith.addf %62, %65 : vector<8x1xf32>
    %67 = math.rsqrt %66 : vector<8x1xf32>
    %68 = vector.broadcast %67 : vector<8x1xf32> to vector<8x32xf32>
    %69 = arith.mulf %64, %68 : vector<8x32xf32>
    %70 = vector.broadcast %50 : vector<1x32xf32> to vector<8x32xf32>
    %71 = arith.mulf %69, %70 : vector<8x32xf32>
    %72 = vector.broadcast %51 : vector<1x32xf32> to vector<8x32xf32>
    %73 = arith.addf %71, %72 : vector<8x32xf32>
    %c0_32 = arith.constant 0 : index
    %c0_33 = arith.constant 0 : index
    %c0_34 = arith.constant 0 : index
    %74 = vector.load %arg3[%c0_32, %c0_33, %c0_34] : memref<1x8x32xf32, #tpu.memory_space<vmem>>, vector<1x8x32xf32>
    %75 = vector.shape_cast %74 : vector<1x8x32xf32> to vector<8x32xf32>
    %76 = arith.truncf %75 : vector<8x32xf32> to vector<8x32xbf16>
    %77 = vector.shape_cast %76 : vector<8x32xbf16> to vector<1x8x32xbf16>
    %78 = vector.shape_cast %77 : vector<1x8x32xbf16> to vector<1x8x32xbf16>
    %79 = vector.broadcast %78 : vector<1x8x32xbf16> to vector<4x8x32xbf16>
    %c0_35 = arith.constant 0 : index
    %c0_36 = arith.constant 0 : index
    %c0_37 = arith.constant 0 : index
    %80 = vector.load %arg15[%c0_35, %c0_36, %c0_37] : memref<4x32x16xbf16, #tpu.memory_space<vmem>>, vector<4x32x16xbf16>
    "tpu.trace_start"() <{level = 10 : i32, message = "hlm,hmd->hld"}> : () -> ()
    %cst_38 = arith.constant dense<0.000000e+00> : vector<4x8x16xf32>
    %81 = tpu.matmul %79, %80, %cst_38 {dimension_numbers = #tpu.dot_dimension_numbers<[2], [1], [1], [2], [0, 0, 0, 1, 1, 2], [0], [0]>} : vector<4x8x32xbf16>, vector<4x32x16xbf16>, vector<4x8x16xf32> -> vector<4x8x16xf32>
    "tpu.trace_stop"() : () -> ()
    %c0_39 = arith.constant 0 : index
    %c0_40 = arith.constant 0 : index
    %c0_41 = arith.constant 0 : index
    %82 = vector.load %arg16[%c0_39, %c0_40, %c0_41] : memref<4x1x16xf32, #tpu.memory_space<vmem>>, vector<4x1x16xf32>
    %83 = vector.broadcast %82 : vector<4x1x16xf32> to vector<4x8x16xf32>
    %84 = arith.addf %81, %83 : vector<4x8x16xf32>
    %85 = arith.truncf %73 : vector<8x32xf32> to vector<8x32xbf16>
    %86 = vector.shape_cast %85 : vector<8x32xbf16> to vector<1x8x32xbf16>
    %87 = vector.shape_cast %86 : vector<1x8x32xbf16> to vector<1x8x32xbf16>
    %88 = vector.broadcast %87 : vector<1x8x32xbf16> to vector<4x8x32xbf16>
    %c0_42 = arith.constant 0 : index
    %c0_43 = arith.constant 0 : index
    %c0_44 = arith.constant 0 : index
    %89 = vector.load %arg13[%c0_42, %c0_43, %c0_44] : memref<4x32x8xbf16, #tpu.memory_space<vmem>>, vector<4x32x8xbf16>
    "tpu.trace_start"() <{level = 10 : i32, message = "hlm,hmd->hld"}> : () -> ()
    %cst_45 = arith.constant dense<0.000000e+00> : vector<4x8x8xf32>
    %90 = tpu.matmul %88, %89, %cst_45 {dimension_numbers = #tpu.dot_dimension_numbers<[2], [1], [1], [2], [0, 0, 0, 1, 1, 2], [0], [0]>} : vector<4x8x32xbf16>, vector<4x32x8xbf16>, vector<4x8x8xf32> -> vector<4x8x8xf32>
    "tpu.trace_stop"() : () -> ()
    %c0_46 = arith.constant 0 : index
    %c0_47 = arith.constant 0 : index
    %c0_48 = arith.constant 0 : index
    %91 = vector.load %arg14[%c0_46, %c0_47, %c0_48] : memref<4x1x8xf32, #tpu.memory_space<vmem>>, vector<4x1x8xf32>
    %92 = vector.broadcast %91 : vector<4x1x8xf32> to vector<4x8x8xf32>
    %93 = arith.addf %90, %92 : vector<4x8x8xf32>
    %94 = vector.extract_strided_slice %84 {offsets = [0, 0, 0], sizes = [4, 8, 8], strides = [1, 1, 1]} : vector<4x8x16xf32> to vector<4x8x8xf32>
    %95 = vector.extract_strided_slice %84 {offsets = [0, 0, 8], sizes = [4, 8, 8], strides = [1, 1, 1]} : vector<4x8x16xf32> to vector<4x8x8xf32>
    %c0_49 = arith.constant 0 : index
    %c0_50 = arith.constant 0 : index
    %c0_51 = arith.constant 0 : index
    %96 = vector.load %arg6[%c0_49, %c0_50, %c0_51] : memref<1x1x8xf32, #tpu.memory_space<vmem>>, vector<1x1x8xf32>
    %97 = vector.shape_cast %96 : vector<1x1x8xf32> to vector<1x8xf32>
    %98 = vector.shape_cast %97 : vector<1x8xf32> to vector<1x8xf32>
    %99 = vector.broadcast %98 : vector<1x8xf32> to vector<8x8xf32>
    %100 = arith.truncf %93 : vector<4x8x8xf32> to vector<4x8x8xbf16>
    %101 = arith.truncf %94 : vector<4x8x8xf32> to vector<4x8x8xbf16>
    "tpu.trace_start"() <{level = 10 : i32, message = "hqd,hkd->hqk"}> : () -> ()
    %cst_52 = arith.constant dense<0.000000e+00> : vector<4x8x8xf32>
    %102 = tpu.matmul %100, %101, %cst_52 {dimension_numbers = #tpu.dot_dimension_numbers<[2], [2], [1], [1], [0, 0, 0, 1, 1, 1], [0], [0]>} : vector<4x8x8xbf16>, vector<4x8x8xbf16>, vector<4x8x8xf32> -> vector<4x8x8xf32>
    "tpu.trace_stop"() : () -> ()
    %103 = vector.shape_cast %99 : vector<8x8xf32> to vector<1x8x8xf32>
    %104 = vector.broadcast %103 : vector<1x8x8xf32> to vector<4x8x8xf32>
    %105 = arith.addf %102, %104 : vector<4x8x8xf32>
    %cst_53 = arith.constant dense<0xFF800000> : vector<4x8xf32>
    %106 = vector.multi_reduction <maximumf>, %105, %cst_53 [2] : vector<4x8x8xf32> to vector<4x8xf32>
    %107 = vector.shape_cast %106 : vector<4x8xf32> to vector<4x8x1xf32>
    %108 = vector.broadcast %107 : vector<4x8x1xf32> to vector<4x8x8xf32>
    %109 = arith.subf %105, %108 : vector<4x8x8xf32>
    %110 = math.exp %109 : vector<4x8x8xf32>
    %cst_54 = arith.constant dense<0.000000e+00> : vector<4x8xf32>
    %111 = vector.multi_reduction <add>, %110, %cst_54 [2] : vector<4x8x8xf32> to vector<4x8xf32>
    %112 = vector.shape_cast %111 : vector<4x8xf32> to vector<4x8x1xf32>
    %113 = tpu.reciprocal %112 : vector<4x8x1xf32> -> vector<4x8x1xf32>
    %114 = vector.broadcast %113 : vector<4x8x1xf32> to vector<4x8x8xf32>
    %115 = arith.mulf %110, %114 : vector<4x8x8xf32>
    %116 = arith.truncf %115 : vector<4x8x8xf32> to vector<4x8x8xbf16>
    %117 = arith.truncf %95 : vector<4x8x8xf32> to vector<4x8x8xbf16>
    "tpu.trace_start"() <{level = 10 : i32, message = "hqk,hkd->hqd"}> : () -> ()
    %cst_55 = arith.constant dense<0.000000e+00> : vector<4x8x8xf32>
    %118 = tpu.matmul %116, %117, %cst_55 {dimension_numbers = #tpu.dot_dimension_numbers<[2], [1], [1], [2], [0, 0, 0, 1, 1, 2], [0], [0]>} : vector<4x8x8xbf16>, vector<4x8x8xbf16>, vector<4x8x8xf32> -> vector<4x8x8xf32>
    "tpu.trace_stop"() : () -> ()
    %119 = arith.truncf %118 : vector<4x8x8xf32> to vector<4x8x8xbf16>
    %c0_56 = arith.constant 0 : index
    %c0_57 = arith.constant 0 : index
    %c0_58 = arith.constant 0 : index
    %120 = vector.load %arg17[%c0_56, %c0_57, %c0_58] : memref<4x8x32xbf16, #tpu.memory_space<vmem>>, vector<4x8x32xbf16>
    "tpu.trace_start"() <{level = 10 : i32, message = "hqv,hvm->hqm"}> : () -> ()
    %cst_59 = arith.constant dense<0.000000e+00> : vector<4x8x32xf32>
    %121 = tpu.matmul %119, %120, %cst_59 {dimension_numbers = #tpu.dot_dimension_numbers<[2], [1], [1], [2], [0, 0, 0, 1, 1, 2], [0], [0]>} : vector<4x8x8xbf16>, vector<4x8x32xbf16>, vector<4x8x32xf32> -> vector<4x8x32xf32>
    "tpu.trace_stop"() : () -> ()
    %cst_60 = arith.constant dense<0.000000e+00> : vector<8x32xf32>
    %122 = vector.multi_reduction <add>, %121, %cst_60 [0] : vector<4x8x32xf32> to vector<8x32xf32>
    %c0_61 = arith.constant 0 : index
    %c0_62 = arith.constant 0 : index
    %123 = vector.load %arg18[%c0_61, %c0_62] : memref<1x32xf32, #tpu.memory_space<vmem>>, vector<1x32xf32>
    %124 = vector.broadcast %123 : vector<1x32xf32> to vector<8x32xf32>
    %125 = arith.addf %122, %124 : vector<8x32xf32>
    %126 = vector.extract_strided_slice %115 {offsets = [0, 0, 0], sizes = [1, 8, 8], strides = [1, 1, 1]} : vector<4x8x8xf32> to vector<1x8x8xf32>
    %127 = vector.shape_cast %126 : vector<1x8x8xf32> to vector<8x8xf32>
    %c0_63 = arith.constant 0 : index
    %c0_64 = arith.constant 0 : index
    %c0_65 = arith.constant 0 : index
    %128 = vector.load %arg37[%c0_63, %c0_64, %c0_65] : memref<1x8x8xf32, #tpu.memory_space<vmem>>, vector<1x8x8xf32>
    %129 = vector.shape_cast %128 : vector<1x8x8xf32> to vector<8x8xf32>
    %130 = vector.shape_cast %127 : vector<8x8xf32> to vector<1x8x8xf32>
    tpu.vector_store %arg37[%c0_63, %c0_64, %c0_65], %130 {strides = array<i32>} : memref<1x8x8xf32, #tpu.memory_space<vmem>>, vector<1x8x8xf32>,
    %131 = arith.addf %125, %73 : vector<8x32xf32>
    %c0_66 = arith.constant 0 : index
    %c0_67 = arith.constant 0 : index
    %132 = vector.load %arg19[%c0_66, %c0_67] : memref<1x32xf32, #tpu.memory_space<vmem>>, vector<1x32xf32>
    %c0_68 = arith.constant 0 : index
    %c0_69 = arith.constant 0 : index
    %133 = vector.load %arg20[%c0_68, %c0_69] : memref<1x32xf32, #tpu.memory_space<vmem>>, vector<1x32xf32>
    %cst_70 = arith.constant dense<0.000000e+00> : vector<8xf32>
    %134 = vector.multi_reduction <add>, %131, %cst_70 [1] : vector<8x32xf32> to vector<8xf32>
    %135 = vector.shape_cast %134 : vector<8xf32> to vector<8x1xf32>
    %cst_71 = arith.constant 3.200000e+01 : f32
    %136 = vector.broadcast %cst_71 : f32 to vector<8x1xf32>
    %137 = arith.divf %135, %136 : vector<8x1xf32>
    %138 = vector.broadcast %137 : vector<8x1xf32> to vector<8x32xf32>
    %139 = arith.subf %131, %138 : vector<8x32xf32>
    %140 = arith.mulf %139, %139 : vector<8x32xf32>
    %cst_72 = arith.constant dense<0.000000e+00> : vector<8xf32>
    %141 = vector.multi_reduction <add>, %140, %cst_72 [1] : vector<8x32xf32> to vector<8xf32>
    %142 = vector.shape_cast %141 : vector<8xf32> to vector<8x1xf32>
    %cst_73 = arith.constant 3.200000e+01 : f32
    %143 = vector.broadcast %cst_73 : f32 to vector<8x1xf32>
    %144 = arith.divf %142, %143 : vector<8x1xf32>
    %145 = vector.broadcast %137 : vector<8x1xf32> to vector<8x32xf32>
    %146 = arith.subf %131, %145 : vector<8x32xf32>
    %cst_74 = arith.constant 9.99999997E-7 : f32
    %147 = vector.broadcast %cst_74 : f32 to vector<8x1xf32>
    %148 = arith.addf %144, %147 : vector<8x1xf32>
    %149 = math.rsqrt %148 : vector<8x1xf32>
    %150 = vector.broadcast %149 : vector<8x1xf32> to vector<8x32xf32>
    %151 = arith.mulf %146, %150 : vector<8x32xf32>
    %152 = vector.broadcast %132 : vector<1x32xf32> to vector<8x32xf32>
    %153 = arith.mulf %151, %152 : vector<8x32xf32>
    %154 = vector.broadcast %133 : vector<1x32xf32> to vector<8x32xf32>
    %155 = arith.addf %153, %154 : vector<8x32xf32>
    %c0_75 = arith.constant 0 : index
    %c0_76 = arith.constant 0 : index
    %c0_77 = arith.constant 0 : index
    %156 = vector.load %arg2[%c0_75, %c0_76, %c0_77] : memref<1x8x32xf32, #tpu.memory_space<vmem>>, vector<1x8x32xf32>
    %157 = vector.shape_cast %156 : vector<1x8x32xf32> to vector<8x32xf32>
    %158 = arith.truncf %157 : vector<8x32xf32> to vector<8x32xbf16>
    %159 = vector.shape_cast %158 : vector<8x32xbf16> to vector<1x8x32xbf16>
    %160 = vector.shape_cast %159 : vector<1x8x32xbf16> to vector<1x8x32xbf16>
    %161 = vector.broadcast %160 : vector<1x8x32xbf16> to vector<4x8x32xbf16>
    %c0_78 = arith.constant 0 : index
    %c0_79 = arith.constant 0 : index
    %c0_80 = arith.constant 0 : index
    %162 = vector.load %arg23[%c0_78, %c0_79, %c0_80] : memref<4x32x16xbf16, #tpu.memory_space<vmem>>, vector<4x32x16xbf16>
    "tpu.trace_start"() <{level = 10 : i32, message = "hlm,hmd->hld"}> : () -> ()
    %cst_81 = arith.constant dense<0.000000e+00> : vector<4x8x16xf32>
    %163 = tpu.matmul %161, %162, %cst_81 {dimension_numbers = #tpu.dot_dimension_numbers<[2], [1], [1], [2], [0, 0, 0, 1, 1, 2], [0], [0]>} : vector<4x8x32xbf16>, vector<4x32x16xbf16>, vector<4x8x16xf32> -> vector<4x8x16xf32>
    "tpu.trace_stop"() : () -> ()
    %c0_82 = arith.constant 0 : index
    %c0_83 = arith.constant 0 : index
    %c0_84 = arith.constant 0 : index
    %164 = vector.load %arg24[%c0_82, %c0_83, %c0_84] : memref<4x1x16xf32, #tpu.memory_space<vmem>>, vector<4x1x16xf32>
    %165 = vector.broadcast %164 : vector<4x1x16xf32> to vector<4x8x16xf32>
    %166 = arith.addf %163, %165 : vector<4x8x16xf32>
    %167 = arith.truncf %155 : vector<8x32xf32> to vector<8x32xbf16>
    %168 = vector.shape_cast %167 : vector<8x32xbf16> to vector<1x8x32xbf16>
    %169 = vector.shape_cast %168 : vector<1x8x32xbf16> to vector<1x8x32xbf16>
    %170 = vector.broadcast %169 : vector<1x8x32xbf16> to vector<4x8x32xbf16>
    %c0_85 = arith.constant 0 : index
    %c0_86 = arith.constant 0 : index
    %c0_87 = arith.constant 0 : index
    %171 = vector.load %arg21[%c0_85, %c0_86, %c0_87] : memref<4x32x8xbf16, #tpu.memory_space<vmem>>, vector<4x32x8xbf16>
    "tpu.trace_start"() <{level = 10 : i32, message = "hlm,hmd->hld"}> : () -> ()
    %cst_88 = arith.constant dense<0.000000e+00> : vector<4x8x8xf32>
    %172 = tpu.matmul %170, %171, %cst_88 {dimension_numbers = #tpu.dot_dimension_numbers<[2], [1], [1], [2], [0, 0, 0, 1, 1, 2], [0], [0]>} : vector<4x8x32xbf16>, vector<4x32x8xbf16>, vector<4x8x8xf32> -> vector<4x8x8xf32>
    "tpu.trace_stop"() : () -> ()
    %c0_89 = arith.constant 0 : index
    %c0_90 = arith.constant 0 : index
    %c0_91 = arith.constant 0 : index
    %173 = vector.load %arg22[%c0_89, %c0_90, %c0_91] : memref<4x1x8xf32, #tpu.memory_space<vmem>>, vector<4x1x8xf32>
    %174 = vector.broadcast %173 : vector<4x1x8xf32> to vector<4x8x8xf32>
    %175 = arith.addf %172, %174 : vector<4x8x8xf32>
    %176 = vector.extract_strided_slice %166 {offsets = [0, 0, 0], sizes = [4, 8, 8], strides = [1, 1, 1]} : vector<4x8x16xf32> to vector<4x8x8xf32>
    %177 = vector.extract_strided_slice %166 {offsets = [0, 0, 8], sizes = [4, 8, 8], strides = [1, 1, 1]} : vector<4x8x16xf32> to vector<4x8x8xf32>
    %c0_92 = arith.constant 0 : index
    %c0_93 = arith.constant 0 : index
    %c0_94 = arith.constant 0 : index
    %178 = vector.load %arg5[%c0_92, %c0_93, %c0_94] : memref<1x1x8xf32, #tpu.memory_space<vmem>>, vector<1x1x8xf32>
    %179 = vector.shape_cast %178 : vector<1x1x8xf32> to vector<1x8xf32>
    %180 = vector.shape_cast %179 : vector<1x8xf32> to vector<1x8xf32>
    %181 = vector.broadcast %180 : vector<1x8xf32> to vector<8x8xf32>
    %182 = arith.truncf %175 : vector<4x8x8xf32> to vector<4x8x8xbf16>
    %183 = arith.truncf %176 : vector<4x8x8xf32> to vector<4x8x8xbf16>
    "tpu.trace_start"() <{level = 10 : i32, message = "hqd,hkd->hqk"}> : () -> ()
    %cst_95 = arith.constant dense<0.000000e+00> : vector<4x8x8xf32>
    %184 = tpu.matmul %182, %183, %cst_95 {dimension_numbers = #tpu.dot_dimension_numbers<[2], [2], [1], [1], [0, 0, 0, 1, 1, 1], [0], [0]>} : vector<4x8x8xbf16>, vector<4x8x8xbf16>, vector<4x8x8xf32> -> vector<4x8x8xf32>
    "tpu.trace_stop"() : () -> ()
    %185 = vector.shape_cast %181 : vector<8x8xf32> to vector<1x8x8xf32>
    %186 = vector.broadcast %185 : vector<1x8x8xf32> to vector<4x8x8xf32>
    %187 = arith.addf %184, %186 : vector<4x8x8xf32>
    %cst_96 = arith.constant dense<0xFF800000> : vector<4x8xf32>
    %188 = vector.multi_reduction <maximumf>, %187, %cst_96 [2] : vector<4x8x8xf32> to vector<4x8xf32>
    %189 = vector.shape_cast %188 : vector<4x8xf32> to vector<4x8x1xf32>
    %190 = vector.broadcast %189 : vector<4x8x1xf32> to vector<4x8x8xf32>
    %191 = arith.subf %187, %190 : vector<4x8x8xf32>
    %192 = math.exp %191 : vector<4x8x8xf32>
    %cst_97 = arith.constant dense<0.000000e+00> : vector<4x8xf32>
    %193 = vector.multi_reduction <add>, %192, %cst_97 [2] : vector<4x8x8xf32> to vector<4x8xf32>
    %194 = vector.shape_cast %193 : vector<4x8xf32> to vector<4x8x1xf32>
    %195 = tpu.reciprocal %194 : vector<4x8x1xf32> -> vector<4x8x1xf32>
    %196 = vector.broadcast %195 : vector<4x8x1xf32> to vector<4x8x8xf32>
    %197 = arith.mulf %192, %196 : vector<4x8x8xf32>
    %198 = arith.truncf %197 : vector<4x8x8xf32> to vector<4x8x8xbf16>
    %199 = arith.truncf %177 : vector<4x8x8xf32> to vector<4x8x8xbf16>
    "tpu.trace_start"() <{level = 10 : i32, message = "hqk,hkd->hqd"}> : () -> ()
    %cst_98 = arith.constant dense<0.000000e+00> : vector<4x8x8xf32>
    %200 = tpu.matmul %198, %199, %cst_98 {dimension_numbers = #tpu.dot_dimension_numbers<[2], [1], [1], [2], [0, 0, 0, 1, 1, 2], [0], [0]>} : vector<4x8x8xbf16>, vector<4x8x8xbf16>, vector<4x8x8xf32> -> vector<4x8x8xf32>
    "tpu.trace_stop"() : () -> ()
    %201 = arith.truncf %200 : vector<4x8x8xf32> to vector<4x8x8xbf16>
    %c0_99 = arith.constant 0 : index
    %c0_100 = arith.constant 0 : index
    %c0_101 = arith.constant 0 : index
    %202 = vector.load %arg25[%c0_99, %c0_100, %c0_101] : memref<4x8x32xbf16, #tpu.memory_space<vmem>>, vector<4x8x32xbf16>
    "tpu.trace_start"() <{level = 10 : i32, message = "hqv,hvm->hqm"}> : () -> ()
    %cst_102 = arith.constant dense<0.000000e+00> : vector<4x8x32xf32>
    %203 = tpu.matmul %201, %202, %cst_102 {dimension_numbers = #tpu.dot_dimension_numbers<[2], [1], [1], [2], [0, 0, 0, 1, 1, 2], [0], [0]>} : vector<4x8x8xbf16>, vector<4x8x32xbf16>, vector<4x8x32xf32> -> vector<4x8x32xf32>
    "tpu.trace_stop"() : () -> ()
    %cst_103 = arith.constant dense<0.000000e+00> : vector<8x32xf32>
    %204 = vector.multi_reduction <add>, %203, %cst_103 [0] : vector<4x8x32xf32> to vector<8x32xf32>
    %c0_104 = arith.constant 0 : index
    %c0_105 = arith.constant 0 : index
    %205 = vector.load %arg26[%c0_104, %c0_105] : memref<1x32xf32, #tpu.memory_space<vmem>>, vector<1x32xf32>
    %206 = vector.broadcast %205 : vector<1x32xf32> to vector<8x32xf32>
    %207 = arith.addf %204, %206 : vector<8x32xf32>
    %208 = vector.extract_strided_slice %197 {offsets = [0, 0, 0], sizes = [1, 8, 8], strides = [1, 1, 1]} : vector<4x8x8xf32> to vector<1x8x8xf32>
    %209 = vector.shape_cast %208 : vector<1x8x8xf32> to vector<8x8xf32>
    %c0_106 = arith.constant 0 : index
    %c0_107 = arith.constant 0 : index
    %c0_108 = arith.constant 0 : index
    %210 = vector.load %arg36[%c0_106, %c0_107, %c0_108] : memref<1x8x8xf32, #tpu.memory_space<vmem>>, vector<1x8x8xf32>
    %211 = vector.shape_cast %210 : vector<1x8x8xf32> to vector<8x8xf32>
    %212 = vector.shape_cast %209 : vector<8x8xf32> to vector<1x8x8xf32>
    tpu.vector_store %arg36[%c0_106, %c0_107, %c0_108], %212 {strides = array<i32>} : memref<1x8x8xf32, #tpu.memory_space<vmem>>, vector<1x8x8xf32>,
    %213 = arith.addf %207, %155 : vector<8x32xf32>
    %c0_109 = arith.constant 0 : index
    %c0_110 = arith.constant 0 : index
    %214 = vector.load %arg27[%c0_109, %c0_110] : memref<1x32xf32, #tpu.memory_space<vmem>>, vector<1x32xf32>
    %c0_111 = arith.constant 0 : index
    %c0_112 = arith.constant 0 : index
    %215 = vector.load %arg28[%c0_111, %c0_112] : memref<1x32xf32, #tpu.memory_space<vmem>>, vector<1x32xf32>
    %cst_113 = arith.constant dense<0.000000e+00> : vector<8xf32>
    %216 = vector.multi_reduction <add>, %213, %cst_113 [1] : vector<8x32xf32> to vector<8xf32>
    %217 = vector.shape_cast %216 : vector<8xf32> to vector<8x1xf32>
    %cst_114 = arith.constant 3.200000e+01 : f32
    %218 = vector.broadcast %cst_114 : f32 to vector<8x1xf32>
    %219 = arith.divf %217, %218 : vector<8x1xf32>
    %220 = vector.broadcast %219 : vector<8x1xf32> to vector<8x32xf32>
    %221 = arith.subf %213, %220 : vector<8x32xf32>
    %222 = arith.mulf %221, %221 : vector<8x32xf32>
    %cst_115 = arith.constant dense<0.000000e+00> : vector<8xf32>
    %223 = vector.multi_reduction <add>, %222, %cst_115 [1] : vector<8x32xf32> to vector<8xf32>
    %224 = vector.shape_cast %223 : vector<8xf32> to vector<8x1xf32>
    %cst_116 = arith.constant 3.200000e+01 : f32
    %225 = vector.broadcast %cst_116 : f32 to vector<8x1xf32>
    %226 = arith.divf %224, %225 : vector<8x1xf32>
    %227 = vector.broadcast %219 : vector<8x1xf32> to vector<8x32xf32>
    %228 = arith.subf %213, %227 : vector<8x32xf32>
    %cst_117 = arith.constant 9.99999997E-7 : f32
    %229 = vector.broadcast %cst_117 : f32 to vector<8x1xf32>
    %230 = arith.addf %226, %229 : vector<8x1xf32>
    %231 = math.rsqrt %230 : vector<8x1xf32>
    %232 = vector.broadcast %231 : vector<8x1xf32> to vector<8x32xf32>
    %233 = arith.mulf %228, %232 : vector<8x32xf32>
    %234 = vector.broadcast %214 : vector<1x32xf32> to vector<8x32xf32>
    %235 = arith.mulf %233, %234 : vector<8x32xf32>
    %236 = vector.broadcast %215 : vector<1x32xf32> to vector<8x32xf32>
    %237 = arith.addf %235, %236 : vector<8x32xf32>
    %c0_118 = arith.constant 0 : index
    %c0_119 = arith.constant 0 : index
    %238 = vector.load %arg29[%c0_118, %c0_119] : memref<1x32xf32, #tpu.memory_space<vmem>>, vector<1x32xf32>
    %c0_120 = arith.constant 0 : index
    %c0_121 = arith.constant 0 : index
    %239 = vector.load %arg30[%c0_120, %c0_121] : memref<1x32xf32, #tpu.memory_space<vmem>>, vector<1x32xf32>
    %cst_122 = arith.constant dense<0.000000e+00> : vector<8xf32>
    %240 = vector.multi_reduction <add>, %237, %cst_122 [1] : vector<8x32xf32> to vector<8xf32>
    %241 = vector.shape_cast %240 : vector<8xf32> to vector<8x1xf32>
    %cst_123 = arith.constant 3.200000e+01 : f32
    %242 = vector.broadcast %cst_123 : f32 to vector<8x1xf32>
    %243 = arith.divf %241, %242 : vector<8x1xf32>
    %244 = vector.broadcast %243 : vector<8x1xf32> to vector<8x32xf32>
    %245 = arith.subf %237, %244 : vector<8x32xf32>
    %246 = arith.mulf %245, %245 : vector<8x32xf32>
    %cst_124 = arith.constant dense<0.000000e+00> : vector<8xf32>
    %247 = vector.multi_reduction <add>, %246, %cst_124 [1] : vector<8x32xf32> to vector<8xf32>
    %248 = vector.shape_cast %247 : vector<8xf32> to vector<8x1xf32>
    %cst_125 = arith.constant 3.200000e+01 : f32
    %249 = vector.broadcast %cst_125 : f32 to vector<8x1xf32>
    %250 = arith.divf %248, %249 : vector<8x1xf32>
    %251 = vector.broadcast %243 : vector<8x1xf32> to vector<8x32xf32>
    %252 = arith.subf %237, %251 : vector<8x32xf32>
    %cst_126 = arith.constant 9.99999997E-7 : f32
    %253 = vector.broadcast %cst_126 : f32 to vector<8x1xf32>
    %254 = arith.addf %250, %253 : vector<8x1xf32>
    %255 = math.rsqrt %254 : vector<8x1xf32>
    %256 = vector.broadcast %255 : vector<8x1xf32> to vector<8x32xf32>
    %257 = arith.mulf %252, %256 : vector<8x32xf32>
    %258 = vector.broadcast %238 : vector<1x32xf32> to vector<8x32xf32>
    %259 = arith.mulf %257, %258 : vector<8x32xf32>
    %260 = vector.broadcast %239 : vector<1x32xf32> to vector<8x32xf32>
    %261 = arith.addf %259, %260 : vector<8x32xf32>
    %262 = arith.truncf %261 : vector<8x32xf32> to vector<8x32xbf16>
    %c0_127 = arith.constant 0 : index
    %c0_128 = arith.constant 0 : index
    %263 = vector.load %arg31[%c0_127, %c0_128] : memref<32x64xbf16, #tpu.memory_space<vmem>>, vector<32x64xbf16>
    %cst_129 = arith.constant dense<0.000000e+00> : vector<8x64xf32>
    %264 = tpu.matmul %262, %263, %cst_129 {dimension_numbers = #tpu.dot_dimension_numbers<[1], [0], [0], [1], [0, 0, 1, 1], [], []>} : vector<8x32xbf16>, vector<32x64xbf16>, vector<8x64xf32> -> vector<8x64xf32>
    %c0_130 = arith.constant 0 : index
    %c0_131 = arith.constant 0 : index
    %265 = vector.load %arg32[%c0_130, %c0_131] : memref<1x64xf32, #tpu.memory_space<vmem>>, vector<1x64xf32>
    %266 = vector.broadcast %265 : vector<1x64xf32> to vector<8x64xf32>
    %267 = arith.addf %264, %266 : vector<8x64xf32>
    %cst_132 = arith.constant 0.000000e+00 : f32
    %268 = vector.broadcast %cst_132 : f32 to vector<8x64xf32>
    %269 = arith.maximumf %267, %268 : vector<8x64xf32>
    %270 = arith.truncf %269 : vector<8x64xf32> to vector<8x64xbf16>
    %c0_133 = arith.constant 0 : index
    %c0_134 = arith.constant 0 : index
    %271 = vector.load %arg33[%c0_133, %c0_134] : memref<64x32xbf16, #tpu.memory_space<vmem>>, vector<64x32xbf16>
    %cst_135 = arith.constant dense<0.000000e+00> : vector<8x32xf32>
    %272 = tpu.matmul %270, %271, %cst_135 {dimension_numbers = #tpu.dot_dimension_numbers<[1], [0], [0], [1], [0, 0, 1, 1], [], []>} : vector<8x64xbf16>, vector<64x32xbf16>, vector<8x32xf32> -> vector<8x32xf32>
    %c0_136 = arith.constant 0 : index
    %c0_137 = arith.constant 0 : index
    %273 = vector.load %arg34[%c0_136, %c0_137] : memref<1x32xf32, #tpu.memory_space<vmem>>, vector<1x32xf32>
    %274 = vector.broadcast %273 : vector<1x32xf32> to vector<8x32xf32>
    %275 = arith.addf %272, %274 : vector<8x32xf32>
    %276 = arith.addf %275, %237 : vector<8x32xf32>
    %c0_138 = arith.constant 0 : index
    %c0_139 = arith.constant 0 : index
    %c0_140 = arith.constant 0 : index
    %277 = vector.load %arg35[%c0_138, %c0_139, %c0_140] : memref<1x8x32xf32, #tpu.memory_space<vmem>>, vector<1x8x32xf32>
    %278 = vector.shape_cast %277 : vector<1x8x32xf32> to vector<8x32xf32>
    %279 = vector.shape_cast %276 : vector<8x32xf32> to vector<1x8x32xf32>
    tpu.vector_store %arg35[%c0_138, %c0_139, %c0_140], %279 {strides = array<i32>} : memref<1x8x32xf32, #tpu.memory_space<vmem>>, vector<1x8x32xf32>,
    return
  }
  func.func @transform_0(%arg0: i32) -> (i32, i32, i32) {
    %c0_i32 = arith.constant 0 : i32
    %c0_i32_0 = arith.constant 0 : i32
    %c0_i32_1 = arith.constant 0 : i32
    return %arg0, %c0_i32, %c0_i32_0 : i32, i32, i32
  }
  func.func @transform_1(%arg0: i32) -> (i32, i32, i32) {
    %c0_i32 = arith.constant 0 : i32
    %c0_i32_0 = arith.constant 0 : i32
    %c0_i32_1 = arith.constant 0 : i32
    return %arg0, %c0_i32, %c0_i32_0 : i32, i32, i32
  }
  func.func @transform_2(%arg0: i32) -> (i32, i32, i32) {
    %c0_i32 = arith.constant 0 : i32
    %c0_i32_0 = arith.constant 0 : i32
    %c0_i32_1 = arith.constant 0 : i32
    return %arg0, %c0_i32, %c0_i32_0 : i32, i32, i32
  }
  func.func @transform_3(%arg0: i32) -> (i32, i32, i32) {
    %c0_i32 = arith.constant 0 : i32
    %c0_i32_0 = arith.constant 0 : i32
    %c0_i32_1 = arith.constant 0 : i32
    return %arg0, %c0_i32, %c0_i32_0 : i32, i32, i32
  }
  func.func @transform_4(%arg0: i32) -> (i32, i32, i32) {
    %c0_i32 = arith.constant 0 : i32
    %c0_i32_0 = arith.constant 0 : i32
    %c0_i32_1 = arith.constant 0 : i32
    return %arg0, %c0_i32, %c0_i32_0 : i32, i32, i32
  }
  func.func @transform_5(%arg0: i32) -> (i32, i32, i32) {
    %c0_i32 = arith.constant 0 : i32
    %c0_i32_0 = arith.constant 0 : i32
    %c0_i32_1 = arith.constant 0 : i32
    return %arg0, %c0_i32, %c0_i32_0 : i32, i32, i32
  }
  func.func @transform_6(%arg0: i32) -> (i32, i32, i32) {
    %c0_i32 = arith.constant 0 : i32
    %c0_i32_0 = arith.constant 0 : i32
    %c0_i32_1 = arith.constant 0 : i32
    %c0_i32_2 = arith.constant 0 : i32
    return %c0_i32, %c0_i32_0, %c0_i32_1 : i32, i32, i32
  }
  func.func @transform_7(%arg0: i32) -> (i32, i32, i32) {
    %c0_i32 = arith.constant 0 : i32
    %c0_i32_0 = arith.constant 0 : i32
    %c0_i32_1 = arith.constant 0 : i32
    %c0_i32_2 = arith.constant 0 : i32
    return %c0_i32, %c0_i32_0, %c0_i32_1 : i32, i32, i32
  }
  func.func @transform_8(%arg0: i32) -> (i32, i32, i32) {
    %c0_i32 = arith.constant 0 : i32
    %c0_i32_0 = arith.constant 0 : i32
    %c0_i32_1 = arith.constant 0 : i32
    %c0_i32_2 = arith.constant 0 : i32
    return %c0_i32, %c0_i32_0, %c0_i32_1 : i32, i32, i32
  }
  func.func @transform_9(%arg0: i32) -> (i32, i32) {
    %c0_i32 = arith.constant 0 : i32
    %c0_i32_0 = arith.constant 0 : i32
    %c0_i32_1 = arith.constant 0 : i32
    return %c0_i32, %c0_i32_0 : i32, i32
  }
  func.func @transform_10(%arg0: i32) -> (i32, i32) {
    %c0_i32 = arith.constant 0 : i32
    %c0_i32_0 = arith.constant 0 : i32
    %c0_i32_1 = arith.constant 0 : i32
    return %c0_i32, %c0_i32_0 : i32, i32
  }
  func.func @transform_11(%arg0: i32) -> (i32, i32) {
    %c0_i32 = arith.constant 0 : i32
    %c0_i32_0 = arith.constant 0 : i32
    %c0_i32_1 = arith.constant 0 : i32
    return %c0_i32, %c0_i32_0 : i32, i32
  }
  func.func @transform_12(%arg0: i32) -> (i32, i32, i32) {
    %c0_i32 = arith.constant 0 : i32
    %c0_i32_0 = arith.constant 0 : i32
    %c0_i32_1 = arith.constant 0 : i32
    %c0_i32_2 = arith.constant 0 : i32
    return %c0_i32, %c0_i32_0, %c0_i32_1 : i32, i32, i32
  }
  func.func @transform_13(%arg0: i32) -> (i32, i32, i32) {
    %c0_i32 = arith.constant 0 : i32
    %c0_i32_0 = arith.constant 0 : i32
    %c0_i32_1 = arith.constant 0 : i32
    %c0_i32_2 = arith.constant 0 : i32
    return %c0_i32, %c0_i32_0, %c0_i32_1 : i32, i32, i32
  }
  func.func @transform_14(%arg0: i32) -> (i32, i32, i32) {
    %c0_i32 = arith.constant 0 : i32
    %c0_i32_0 = arith.constant 0 : i32
    %c0_i32_1 = arith.constant 0 : i32
    %c0_i32_2 = arith.constant 0 : i32
    return %c0_i32, %c0_i32_0, %c0_i32_1 : i32, i32, i32
  }
  func.func @transform_15(%arg0: i32) -> (i32, i32, i32) {
    %c0_i32 = arith.constant 0 : i32
    %c0_i32_0 = arith.constant 0 : i32
    %c0_i32_1 = arith.constant 0 : i32
    %c0_i32_2 = arith.constant 0 : i32
    return %c0_i32, %c0_i32_0, %c0_i32_1 : i32, i32, i32
  }
  func.func @transform_16(%arg0: i32) -> (i32, i32, i32) {
    %c0_i32 = arith.constant 0 : i32
    %c0_i32_0 = arith.constant 0 : i32
    %c0_i32_1 = arith.constant 0 : i32
    %c0_i32_2 = arith.constant 0 : i32
    return %c0_i32, %c0_i32_0, %c0_i32_1 : i32, i32, i32
  }
  func.func @transform_17(%arg0: i32) -> (i32, i32) {
    %c0_i32 = arith.constant 0 : i32
    %c0_i32_0 = arith.constant 0 : i32
    %c0_i32_1 = arith.constant 0 : i32
    return %c0_i32, %c0_i32_0 : i32, i32
  }
  func.func @transform_18(%arg0: i32) -> (i32, i32) {
    %c0_i32 = arith.constant 0 : i32
    %c0_i32_0 = arith.constant 0 : i32
    %c0_i32_1 = arith.constant 0 : i32
    return %c0_i32, %c0_i32_0 : i32, i32
  }
  func.func @transform_19(%arg0: i32) -> (i32, i32) {
    %c0_i32 = arith.constant 0 : i32
    %c0_i32_0 = arith.constant 0 : i32
    %c0_i32_1 = arith.constant 0 : i32
    return %c0_i32, %c0_i32_0 : i32, i32
  }
  func.func @transform_20(%arg0: i32) -> (i32, i32, i32) {
    %c0_i32 = arith.constant 0 : i32
    %c0_i32_0 = arith.constant 0 : i32
    %c0_i32_1 = arith.constant 0 : i32
    %c0_i32_2 = arith.constant 0 : i32
    return %c0_i32, %c0_i32_0, %c0_i32_1 : i32, i32, i32
  }
  func.func @transform_21(%arg0: i32) -> (i32, i32, i32) {
    %c0_i32 = arith.constant 0 : i32
    %c0_i32_0 = arith.constant 0 : i32
    %c0_i32_1 = arith.constant 0 : i32
    %c0_i32_2 = arith.constant 0 : i32
    return %c0_i32, %c0_i32_0, %c0_i32_1 : i32, i32, i32
  }
  func.func @transform_22(%arg0: i32) -> (i32, i32, i32) {
    %c0_i32 = arith.constant 0 : i32
    %c0_i32_0 = arith.constant 0 : i32
    %c0_i32_1 = arith.constant 0 : i32
    %c0_i32_2 = arith.constant 0 : i32
    return %c0_i32, %c0_i32_0, %c0_i32_1 : i32, i32, i32
  }
  func.func @transform_23(%arg0: i32) -> (i32, i32, i32) {
    %c0_i32 = arith.constant 0 : i32
    %c0_i32_0 = arith.constant 0 : i32
    %c0_i32_1 = arith.constant 0 : i32
    %c0_i32_2 = arith.constant 0 : i32
    return %c0_i32, %c0_i32_0, %c0_i32_1 : i32, i32, i32
  }
  func.func @transform_24(%arg0: i32) -> (i32, i32, i32) {
    %c0_i32 = arith.constant 0 : i32
    %c0_i32_0 = arith.constant 0 : i32
    %c0_i32_1 = arith.constant 0 : i32
    %c0_i32_2 = arith.constant 0 : i32
    return %c0_i32, %c0_i32_0, %c0_i32_1 : i32, i32, i32
  }
  func.func @transform_25(%arg0: i32) -> (i32, i32) {
    %c0_i32 = arith.constant 0 : i32
    %c0_i32_0 = arith.constant 0 : i32
    %c0_i32_1 = arith.constant 0 : i32
    return %c0_i32, %c0_i32_0 : i32, i32
  }
  func.func @transform_26(%arg0: i32) -> (i32, i32) {
    %c0_i32 = arith.constant 0 : i32
    %c0_i32_0 = arith.constant 0 : i32
    %c0_i32_1 = arith.constant 0 : i32
    return %c0_i32, %c0_i32_0 : i32, i32
  }
  func.func @transform_27(%arg0: i32) -> (i32, i32) {
    %c0_i32 = arith.constant 0 : i32
    %c0_i32_0 = arith.constant 0 : i32
    %c0_i32_1 = arith.constant 0 : i32
    return %c0_i32, %c0_i32_0 : i32, i32
  }
  func.func @transform_28(%arg0: i32) -> (i32, i32) {
    %c0_i32 = arith.constant 0 : i32
    %c0_i32_0 = arith.constant 0 : i32
    %c0_i32_1 = arith.constant 0 : i32
    return %c0_i32, %c0_i32_0 : i32, i32
  }
  func.func @transform_29(%arg0: i32) -> (i32, i32) {
    %c0_i32 = arith.constant 0 : i32
    %c0_i32_0 = arith.constant 0 : i32
    %c0_i32_1 = arith.constant 0 : i32
    return %c0_i32, %c0_i32_0 : i32, i32
  }
  func.func @transform_30(%arg0: i32) -> (i32, i32) {
    %c0_i32 = arith.constant 0 : i32
    %c0_i32_0 = arith.constant 0 : i32
    %c0_i32_1 = arith.constant 0 : i32
    return %c0_i32, %c0_i32_0 : i32, i32
  }
  func.func @transform_31(%arg0: i32) -> (i32, i32) {
    %c0_i32 = arith.constant 0 : i32
    %c0_i32_0 = arith.constant 0 : i32
    %c0_i32_1 = arith.constant 0 : i32
    return %c0_i32, %c0_i32_0 : i32, i32
  }
  func.func @transform_32(%arg0: i32) -> (i32, i32) {
    %c0_i32 = arith.constant 0 : i32
    %c0_i32_0 = arith.constant 0 : i32
    %c0_i32_1 = arith.constant 0 : i32
    return %c0_i32, %c0_i32_0 : i32, i32
  }
  func.func @transform_33(%arg0: i32) -> (i32, i32) {
    %c0_i32 = arith.constant 0 : i32
    %c0_i32_0 = arith.constant 0 : i32
    %c0_i32_1 = arith.constant 0 : i32
    return %c0_i32, %c0_i32_0 : i32, i32
  }
  func.func @transform_34(%arg0: i32) -> (i32, i32, i32) {
    %c0_i32 = arith.constant 0 : i32
    %c0_i32_0 = arith.constant 0 : i32
    %c0_i32_1 = arith.constant 0 : i32
    return %arg0, %c0_i32, %c0_i32_0 : i32, i32, i32
  }
  func.func @transform_35(%arg0: i32) -> (i32, i32, i32) {
    %c0_i32 = arith.constant 0 : i32
    %c0_i32_0 = arith.constant 0 : i32
    %c0_i32_1 = arith.constant 0 : i32
    return %arg0, %c0_i32, %c0_i32_0 : i32, i32, i32
  }
  func.func @transform_36(%arg0: i32) -> (i32, i32, i32) {
    %c0_i32 = arith.constant 0 : i32
    %c0_i32_0 = arith.constant 0 : i32
    %c0_i32_1 = arith.constant 0 : i32
    return %arg0, %c0_i32, %c0_i32_0 : i32, i32, i32
  }
}

</mosaic_0001>

<bundles_post_ra>
// kernel: transformer_decoder_layer.1
= control target key start
LH: loop header
LB: loop body
LE: loop exit
PB: predicated region body
PF: predicated region fallthrough
CT: control target
= control target key end

     0   :  { %s4134_s6 = smov 1   ;;  %s4135_s10 = smov 2   ;;  %s4870_s0 = inlined_call_operand.smem [shape: u32[37], index: -1, kind: input, shape index: {}] }
   0x1   :  { %s4181_s5 = sld [smem:[%s4870_s0]]   ;;  %s4136_s14 = smov 3  }
   0x2   :  { %s4186_s9 = sld [smem:[%s4870_s0 + %s4134_s6]]   ;;  %s4137_s18 = smov 4  }
   0x3   :  { %s4191_s13 = sld [smem:[%s4870_s0 + %s4135_s10]]   ;;  %s4138_s22 = smov 5  }
   0x4   :  { %s4196_s17 = sld [smem:[%s4870_s0 + %s4136_s14]]   ;;  %s4139_s26 = smov 6  }
   0x5   :  { %s4201_s21 = sld [smem:[%s4870_s0 + %s4137_s18]]   ;;  %s4140_s30 = smov 7  }
   0x6   :  { %s4206_s25 = sld [smem:[%s4870_s0 + %s4138_s22]]   ;;  %s4141_s4 = smov 8  }
   0x7   :  { %4898 = sst [smem:[#allocation9_spill]] %s4181_s5  ;;  %s4142_s10 = smov 9  }
   0x8   :  { %4899 = sst [smem:[#allocation10_spill]] %s4186_s9  ;;  %s4143_s15 = smov 10  }
   0x9   :  { %4900 = sst [smem:[#allocation11_spill]] %s4191_s13  ;;  %s4144_s20 = smov 11  }
   0xa   :  { %4901 = sst [smem:[#allocation12_spill]] %s4196_s17  ;;  %s4146_s1 = smov 13  }
   0xb   :  { %4902 = sst [smem:[#allocation13_spill]] %s4201_s21  ;;  %s4147_s7 = smov 14  }
   0xc   :  { %s4211_s29 = sld [smem:[%s4870_s0 + %s4139_s26]]   ;;  %s4145_s26 = smov 12  }
   0xd   :  { %s4216_s3 = sld [smem:[%s4870_s0 + %s4140_s30]]   ;;  %s4149_s22 = smov 16  }
   0xe   :  { %s4221_s8 = sld [smem:[%s4870_s0 + %s4141_s4]]   ;;  %s4150_s28 = smov 17  }
   0xf   :  { %s4226_s14 = sld [smem:[%s4870_s0 + %s4142_s10]]  }
  0x10   :  { %s4231_s19 = sld [smem:[%s4870_s0 + %s4143_s15]]   ;;  %s4148_s15 = smov 15  }
  0x11   :  { %s4236_s24 = sld [smem:[%s4870_s0 + %s4144_s20]]  }
  0x12   :  { %s4241_s30 = sld [smem:[%s4870_s0 + %s4145_s26]]  }
  0x13   :  { %4903 = sst [smem:[#allocation14_spill]] %s4216_s3 }
  0x14   :  { %4904 = sst [smem:[#allocation15_spill]] %s4221_s8 }
  0x15   :  { %4905 = sst [smem:[#allocation16_spill]] %s4226_s14 }
  0x16   :  { %s4246_s6 = sld [smem:[%s4870_s0 + %s4146_s1]]  }
  0x17   :  { %s4251_s12 = sld [smem:[%s4870_s0 + %s4147_s7]]   ;;  %s4151_s7 = smov 18  }
  0x18   :  { %s4256_s20 = sld [smem:[%s4870_s0 + %s4148_s15]]   ;;  %s4152_s15 = smov 19  }
  0x19   :  { %s4261_s27 = sld [smem:[%s4870_s0 + %s4149_s22]]   ;;  %s4153_s22 = smov 20  }
  0x1a   :  { %s4266_s4 = sld [smem:[%s4870_s0 + %s4150_s28]]   ;;  %s4154_s28 = smov 21  }
  0x1b   :  { %s4271_s21 = sld [smem:[%s4870_s0 + %s4151_s7]]   ;;  %s4155_s7 = smov 22  }
  0x1c   :  { %4906 = sst [smem:[#allocation17_spill]] %s4246_s6 }
  0x1d   :  { %4907 = sst [smem:[#allocation18_spill]] %s4251_s12 }
  0x1e   :  { %s4276_s9 = sld [smem:[%s4870_s0 + %s4152_s15]]   ;;  %s4156_s15 = smov 23  }
  0x1f   :  { %4908 = sst [smem:[#allocation19_spill]] %s4261_s27 }
  0x20   :  { %4909 = sst [smem:[#allocation20_spill]] %s4266_s4 }
  0x21   :  { %4910 = sst [smem:[#allocation21_spill]] %s4271_s21 }
  0x22   :  { %s4281_s27 = sld [smem:[%s4870_s0 + %s4153_s22]]   ;;  %s4157_s22 = smov 24  }
  0x23   :  { %s4286_s4 = sld [smem:[%s4870_s0 + %s4154_s28]]   ;;  %s4158_s28 = smov 25  }
  0x24   :  { %4911 = sst [smem:[#allocation22_spill]] %s4276_s9 }
  0x25   :  { %s4291_s21 = sld [smem:[%s4870_s0 + %s4155_s7]]   ;;  %s4159_s7 = smov 26  }
  0x26   :  { %s4296_s9 = sld [smem:[%s4870_s0 + %s4156_s15]]   ;;  %s4160_s15 = smov 27  }
  0x28   :  { %4912 = sst [smem:[#allocation23_spill]] %s4281_s27 }
  0x29   :  { %4913 = sst [smem:[#allocation24_spill]] %s4286_s4 }
  0x2a   :  { %s4301_s27 = sld [smem:[%s4870_s0 + %s4157_s22]]   ;;  %s4161_s22 = smov 28  }
  0x2b   :  { %4914 = sst [smem:[#allocation25_spill]] %s4291_s21 }
  0x2c   :  { %4915 = sst [smem:[#allocation26_spill]] %s4296_s9 }
  0x2d   :  { %s4306_s4 = sld [smem:[%s4870_s0 + %s4158_s28]]   ;;  %s4162_s28 = smov 29  }
  0x2e   :  { %s4311_s21 = sld [smem:[%s4870_s0 + %s4159_s7]]   ;;  %s4163_s7 = smov 30  }
  0x2f   :  { %s4316_s9 = sld [smem:[%s4870_s0 + %s4160_s15]]   ;;  %s4164_s15 = smov 31  }
  0x30   :  { %4916 = sst [smem:[#allocation27_spill]] %s4301_s27 }
  0x31   :  { %s4321_s27 = sld [smem:[%s4870_s0 + %s4161_s22]]   ;;  %s4165_s22 = smov 32  }
  0x33   :  { %4917 = sst [smem:[#allocation28_spill]] %s4306_s4 }
  0x34   :  { %4918 = sst [smem:[#allocation29_spill]] %s4311_s21 }
  0x35   :  { %4919 = sst [smem:[#allocation30_spill]] %s4316_s9 }
  0x36   :  { %s4326_s4 = sld [smem:[%s4870_s0 + %s4162_s28]]   ;;  %s4166_s28 = smov 33  }
  0x37   :  { %4920 = sst [smem:[#allocation31_spill]] %s4321_s27 }
  0x38   :  { %s4331_s21 = sld [smem:[%s4870_s0 + %s4163_s7]]   ;;  %s4167_s7 = smov 34  }
  0x39   :  { %s4336_s9 = sld [smem:[%s4870_s0 + %s4164_s15]]   ;;  %s4168_s15 = smov 35  }
  0x3a   :  { %s4341_s27 = sld [smem:[%s4870_s0 + %s4165_s22]]   ;;  %s4169_s22 = smov 36  }
  0x3c   :  { %4921 = sst [smem:[#allocation32_spill]] %s4326_s4 }
  0x3d   :  { %s4346_s4 = sld [smem:[%s4870_s0 + %s4166_s28]]  }
  0x3e   :  { %4922 = sst [smem:[#allocation33_spill]] %s4331_s21 }
  0x3f   :  { %4923 = sst [smem:[#allocation34_spill]] %s4336_s9 }
  0x40   :  { %4924 = sst [smem:[#allocation35_spill]] %s4341_s27 }
  0x41   :  { %s4351_s21 = sld [smem:[%s4870_s0 + %s4167_s7]]  }
  0x42   :  { %s4356_s9 = sld [smem:[%s4870_s0 + %s4168_s15]]  }
  0x43   :  { %s4361_s27 = sld [smem:[%s4870_s0 + %s4169_s22]]  }
  0x44   :  { %79 = vsyncpa [#allocation3], 0 }
  0x45   :  { %81 = vsyncpa [#allocation3 + $0x1], 0 }
  0x46   :  { %82 = vsyncpa [#allocation5], 0 }
  0x47   :  { %84 = vsyncpa [#allocation5 + $0x1], 0  ;;  %s4363_s28 = smov 0   ;;  %s4365_s1 = smov 0  }
  0x48   :  { %s4367_s2 = smov 0   ;;  %s4369_s7 = smov 0  }
  0x49 LB: > { %s4925_s12 = sld [smem:[#allocation18_spill]]  ;;  %s4384_s0 = sadd.s32 4294967295, %s4132_s7   ;;  %s4132_s7 = sphi %s4369_s7, %s4962_s7   ;;  %s4128_s2 = sphi %s4367_s2, %s4961_s2   ;;  %s4124_s1 = sphi %s4365_s1, %s4960_s1   ;;  %s4120_s28 = sphi %s4363_s28, %s4959_s28  }
  0x4a   : > { %s4926_s8 = sld [smem:[#allocation15_spill]]  ;;  %s4880_s10 = sadd.s32 4294967294, %s4132_s7  }
  0x4b   : > { %s4927_s6 = sld [smem:[#allocation17_spill]]  ;;  %s4388_s11 = sadd.s32 1, %s4132_s7  }
  0x4c   : > { %s4928_s3 = sld [smem:[#allocation14_spill]]  ;;  %s841_s15 = sadd.s32 1, %s4128_s2 }
  0x4d   : > { %s838_s16 = ssub.s32 %s4132_s7, %s4388_s11  ;;  %p851_p0 = scmp.ne.s32.totalorder %s4128_s2, %s4124_s1 }
  0x4e   : > { %p839_p1 = scmp.eq.s32.totalorder %s838_s16, 0  ;;  %p852_p2 = scmp.eq.s32.totalorder %s4384_s0, 1 }
  0x4f   : > { %p857_p3 = scmp.ne.s32.totalorder %s4124_s1, %s4120_s28  ;;  %p858_p4 = scmp.eq.s32.totalorder %s4880_s10, 1 }
  0x50   : > { %s4401_s18 = scalar_select %p839_p1, %s4128_s2, %s841_s15  }
  0x51   : > { %p4403_p5 = por %p852_p2, %p851_p0  ;;  %p4407_p6 = por %p858_p4, %p857_p3 }
  0x52   : > { %p3525_p7 = scmp.ge.s32.totalorder %s4132_s7, 1  ;;  %p1051_p8 = scmp.lt.s32.totalorder %s4132_s7, 3 }
  0x54   : > { %p1052_p9 = pnand %p3525_p7, %p1051_p8 }
  0x55   : > { %s4931_s5 = sld [smem:[#allocation9_spill]] (!%p1052_p9)  ;;  %p1167_p10 = scmp.lt.s32.totalorder (!%p1052_p9), %s4384_s0, 1 }
  0x56   : > { %1055 = sbr.rel (%p1052_p9) target bundleno = 4047 (0xfcf), region = 156  ;;  %s4932_s17 = sld [smem:[#allocation12_spill]] (!%p1052_p9) }
  0x57   : > { %s4933_s14 = sld [smem:[#allocation16_spill]] (!%p1052_p9) }
  0x58   : > { %s4934_s13 = sld [smem:[#allocation11_spill]] (!%p1052_p9) }
  0x5b   : > { %v3783_v0 = vld [vmem:[%s4211_s29 + $0x8] sm:$0xff]  ;;  %v3785_v1 = vld [vmem:[%s4211_s29 + $0x18] sm:$0xff]  ;;  %v3782_v3 = vld [vmem:[%s4211_s29] sm:$0xff]  ;;  %s4421_s26 = scalar_select %p1167_p10, %s4384_s0, 1  ;;  %vm1235_vm0 = vcmask 261120   ;;  %vm1346_vm1 = vcmask 64512   ;;  %v1327_v46 = vlaneseq }
  0x5c   : > { %v3787_v2 = vld [vmem:[%s4211_s29 + $0x28] sm:$0xff]  ;;  %1245 = vmatpush.bf16.msra.mxu0 %v3783_v0  ;;  %1270 = vmatpush.bf16.msra.mxu1 %v3785_v1  ;;  %v3784_v4 = vld [vmem:[%s4211_s29 + $0x10] sm:$0xff]  ;;  %v3789_v5 = vld [vmem:[%s4211_s29 + $0x38] sm:$0xff]  ;;  %vm1543_vm3 = vcmask 1043456  }
  0x5d   : > { %1295 = vmatpush.bf16.msra.mxu2 %v3787_v2  ;;  %v3786_v6 = vld [vmem:[%s4211_s29 + $0x20] sm:$0xff]  ;;  %1320 = vmatpush.bf16.msra.mxu3 %v3789_v5  ;;  %s4425_s15 = sshll.u32 %s4421_s26, 3  ;;  %v3788_v7 = vld [vmem:[%s4211_s29 + $0x30] sm:$0xff]  ;;  %s1181_s10 = scalar_lea.vmem %s4932_s17, %s4421_s26  ;;  %v1328_v47 = vshrl.u32 %v1327_v46, 7  ;;  %v1330_v48 = vand.u32 127, %v1327_v46 }
  0x5e   : > { %s1170_s16 = scalar_lea.vmem %s4931_s5, %s4425_s15  ;;  %v3916_v10 = vld [vmem:[%s4928_s3] ss:$0 sm:$0xff]  ;;  %v3917_v11 = vld [vmem:[%s4928_s3 + $0x1] ss:$0 sm:$0xff]  ;;  %v3918_v17 = vld [vmem:[%s4928_s3 + $0x2] ss:$0 sm:$0xff] }
  0x5f   : > { %v4430_v8 = vld [vmem:[%s1170_s16] sm:$0xff]  ;;  %s4882_s16 = smov 120   ;;  %vm1331_vm2 = vcmp.gt.s32.totalorder %v1330_v48, %v1328_v47  ;;  %s4937_s5 = sld [smem:[#allocation25_spill]] }
  0x60   : > { %1246 = vmatpush.bf16.msra.mxu0 %v3782_v3  ;;  %1271 = vmatpush.bf16.msra.mxu1 %v3784_v4  ;;  %v1190_v9 = vpack.c.bf16 %v4430_v8, %v4430_v8  ;;  %v3919_v20 = vld [vmem:[%s4928_s3 + $0x3] ss:$0 sm:$0xff]  ;;  %v3920_v49 = vld [vmem:[%s1181_s10] ss:$0 sm:$0xff]  ;;  %s4171_s10 = smov 112   ;;  %s4030_s17 = scalar_lea.hbm %s4356_s9, 16 }
  0x61   : > { %1296 = vmatpush.bf16.msra.mxu2 %v3786_v6  ;;  %1321 = vmatpush.bf16.msra.mxu3 %v3788_v7  ;;  %v1336_v50 = vsel %vm1331_vm2, -1e+18, %v3920_v49 }
  0x63   : > { %3540 = vmatmul.msk.bf16.vlgmr.msra.gmra.mxu0 %vm1235_vm0, %v1190_v9  ;;  %3549 = vmatmul.msk.bf16.vlgmr.msra.gmra.mxu1 %vm1235_vm0, %v1190_v9 }
  0x64   : > { %3558 = vmatmul.msk.bf16.vlgmr.msra.gmra.mxu2 %vm1235_vm0, %v1190_v9  ;;  %3567 = vmatmul.msk.bf16.vlgmr.msra.gmra.mxu3 %vm1235_vm0, %v1190_v9 }
  0xe0   : > { %v1248_v12 = vpop.f32.mrf.mxu0  ;;  %v1273_v13 = vpop.f32.mrf.mxu1 }
  0xe1   : > { %v1249_v14 = vadd.f32 %v3916_v10, %v1248_v12  ;;  %v1274_v15 = vadd.f32 %v3917_v11, %v1273_v13 }
  0xe3   : > { %v1337_v16 = vpack.c.bf16 %v1249_v14, %v1249_v14  ;;  %v1338_v18 = vpack.c.bf16 %v1274_v15, %v1274_v15 }
  0xe5   : > { %v1342_v19 = vunpack.c.l.b16 %v1337_v16  ;;  %v1367_v26 = vunpack.c.l.b16 %v1338_v18 }
  0xe7   : > { %v1298_v21 = vpop.f32.mrf.mxu2  ;;  %v4442_v22 = vpack.c.b16 %v1342_v19, %v1342_v19  ;;  %v1323_v27 = vpop.f32.mrf.mxu3  ;;  %v4446_v32 = vpack.c.b16 %v1367_v26, %v1367_v26 }
  0xe8   : > { %v1299_v23 = vadd.f32 %v3918_v17, %v1298_v21  ;;  %v1250_v24 = vpop.f32.mrf.mxu0  ;;  %v1275_v25 = vpop.f32.mrf.mxu1  ;;  %v1324_v29 = vadd.f32 %v3919_v20, %v1323_v27 }
  0xe9   : > { %1344 = vrot.lane.b32.xlu1 %v4442_v22, %s4882_s16 }
  0xea   : > { %v1339_v28 = vpack.c.bf16 %v1299_v23, %v1299_v23  ;;  %v1340_v30 = vpack.c.bf16 %v1324_v29, %v1324_v29 }
  0xec   : > { %v1391_v31 = vunpack.c.l.b16 %v1339_v28  ;;  %v1415_v35 = vunpack.c.l.b16 %v1340_v30 }
  0xee   : > { %v1392_v33 = vpack.c.b16 %v1391_v31, %v1391_v31  ;;  %v1416_v37 = vpack.c.b16 %v1415_v35, %v1415_v35 }
  0xef   : > { %v1300_v34 = vpop.f32.mrf.mxu2  ;;  %v1325_v36 = vpop.f32.mrf.mxu3 }
  0xf0   : > { %1393 = vrot.lane.b32.xlu0 %v1392_v33, %s4882_s16 }
  0xf1   : > { %1369 = vrot.lane.b32.xlu1 %v4446_v32, %s4882_s16 }
  0xf8   : > { %1417 = vrot.lane.b32.xlu0 %v1416_v37, %s4882_s16 }
 0x15b   : > { %v1345_v38 = vpop.permute.xlu1 %1344 }
 0x15c   : > { %v1351_v39 = vsel %vm1346_vm1, %v1345_v38, 0 }
 0x15d   : > { %1360 = vmatpush.bf16.xpose.msrb.mxu0 %v1351_v39 }
 0x162   : > { %v1394_v40 = vpop.permute.xlu0 %1393 }
 0x163   : > { %v1399_v41 = vsel %vm1346_vm1, %v1394_v40, 0  ;;  %v1370_v42 = vpop.permute.xlu1 %1369 }
 0x164   : > { %1408 = vmatpush.bf16.xpose.msrb.mxu2 %v1399_v41  ;;  %3568 = vmatmul.msk.bf16.vlgmr.msrb.gmra.mxu0 %vm1346_vm1, %v1337_v16  ;;  %v1375_v43 = vsel %vm1346_vm1, %v1370_v42, 0 }
 0x165   : > { %1384 = vmatpush.bf16.xpose.msrb.mxu1 %v1375_v43 }
 0x16a   : > { %v1418_v44 = vpop.permute.xlu0 %1417 }
 0x16b   : > { %3570 = vmatmul.msk.bf16.vlgmr.msrb.gmra.mxu2 %vm1346_vm1, %v1339_v28  ;;  %v1423_v45 = vsel %vm1346_vm1, %v1418_v44, 0 }
 0x16c   : > { %1432 = vmatpush.bf16.xpose.msrb.mxu3 %v1423_v45  ;;  %3569 = vmatmul.msk.bf16.vlgmr.msrb.gmra.mxu1 %vm1346_vm1, %v1338_v18 }
 0x173   : > { %3571 = vmatmul.msk.bf16.vlgmr.msrb.gmra.mxu3 %vm1346_vm1, %v1340_v30 }
 0x1e1   : > { %v1362_v51 = vpop.f32.mrf.mxu0 }
 0x1e2   : > { %v1363_v52 = vadd.f32 %v1362_v51, %v1336_v50 }
 0x1e4   : > { %v1438_v53 = vsel %vm1346_vm1, %v1363_v52, -inf }
 0x1e5   : > { %1439 = vmax.xlane.f32.xlu0 %v1438_v53 }
 0x1e9   : > { %v1364_v54 = vpop.f32.mrf.mxu0  ;;  %v1386_v55 = vpop.f32.mrf.mxu1 }
 0x1ea   : > { %v1387_v56 = vadd.f32 %v1386_v55, %v1336_v50 }
 0x1ec   : > { %v1441_v57 = vsel %vm1346_vm1, %v1387_v56, -inf }
 0x1ed   : > { %1442 = vmax.xlane.f32.xlu1 %v1441_v57 }
 0x1ee   : > { %v1410_v58 = vpop.f32.mrf.mxu2 }
 0x1ef   : > { %v1411_v59 = vadd.f32 %v1410_v58, %v1336_v50 }
 0x1f1   : > { %v1444_v60 = vsel %vm1346_vm1, %v1411_v59, -inf  ;;  %v1388_v61 = vpop.f32.mrf.mxu1 }
 0x1f2   : > { %1445 = vmax.xlane.f32.xlu2 %v1444_v60 }
 0x1f6   : > { %v1412_v62 = vpop.f32.mrf.mxu2  ;;  %v1434_v63 = vpop.f32.mrf.mxu3 }
 0x1f7   : > { %v1435_v0 = vadd.f32 %v1434_v63, %v1336_v50 }
 0x1f9   : > { %v1447_v1 = vsel %vm1346_vm1, %v1435_v0, -inf  ;;  %1602 = vrot.lane.b32.xlu0 %v1416_v37, %s4171_s10 }
 0x1fa   : > { %1448 = vmax.xlane.f32.xlu2 %v1447_v1 }
 0x1fe   : > { %v1436_v2 = vpop.f32.mrf.mxu3 }
 0x206   : > { %1538 = vrot.lane.b32.xlu1 %v4442_v22, %s4171_s10 }
 0x212   : > { %1581 = vrot.lane.b32.xlu2 %v1392_v33, %s4171_s10 }
 0x258   : > { %v1440_v3 = vpop.xlane.xlu0 %1439 }
 0x259   : > { %v1450_v4 = vsub.f32 %v1363_v52, %v1440_v3 }
 0x25b   : > { %v1454_v5 = vmul.f32 1.442695, %v1450_v4 }
 0x25d   : > { %3952 = vpow2.f32 %v1454_v5 }
 0x260   : > { %v1443_v6 = vpop.xlane.xlu1 %1442 }
 0x261   : > { %v1451_v7 = vsub.f32 %v1387_v56, %v1443_v6 }
 0x263   : > { %v3953_v9 = vpop.eup %3952  ;;  %v1456_v10 = vmul.f32 1.442695, %v1451_v7 }
 0x264   : > { %v1462_v11 = vsel %vm1346_vm1, %v3953_v9, 0.0 }
 0x265   : > { %3954 = vpow2.f32 %v1456_v10  ;;  %v1446_v12 = vpop.xlane.xlu2 %1445  ;;  %1463 = vadd.xlane.f32.xlu2 %v1462_v11 }
 0x266   : > { %v1452_v13 = vsub.f32 %v1411_v59, %v1446_v12 }
 0x268   : > { %v1458_v14 = vmul.f32 1.442695, %v1452_v13 }
 0x26a   : > { %3956 = vpow2.f32 %v1458_v14 }
 0x26b   : > { %v4471_v15 = vpop.eup %3954  ;;  %v1603_v16 = vpop.permute.xlu0 %1602 }
 0x26c   : > { %v1608_v17 = vsel %vm1543_vm3, %v1603_v16, 0  ;;  %v1465_v18 = vsel %vm1346_vm1, %v4471_v15, 0.0 }
 0x26d   : > { %v1449_v19 = vpop.xlane.xlu2 %1448  ;;  %1617 = vmatpush.bf16.msra.mxu3 %v1608_v17  ;;  %1466 = vadd.xlane.f32.xlu2 %v1465_v18 }
 0x26e   : > { %v1453_v20 = vsub.f32 %v1435_v0, %v1449_v19 }
 0x270   : > { %v1460_v21 = vmul.f32 1.442695, %v1453_v20  ;;  %v4476_v22 = vpop.eup %3956 }
 0x271   : > { %v1468_v23 = vsel %vm1346_vm1, %v4476_v22, 0.0 }
 0x272   : > { %3958 = vpow2.f32 %v1460_v21  ;;  %v1627_v21 = vld [vmem:[%s4926_s8] sm:$0xf] }
 0x275   : > { %v1582_v24 = vpop.permute.xlu2 %1581  ;;  %1469 = vadd.xlane.f32.xlu2 %v1468_v23  ;;  %v1628_v23 = vld [vmem:[%s4926_s8 + $0x4] sm:$0xf] }
 0x276   : > { %v1587_v25 = vsel %vm1543_vm3, %v1582_v24, 0  ;;  %v1654_v24 = vsel %vm1543_vm3, %v1628_v23, 0  ;;  %v3800_v23 = vld [vmem:[%s4241_s30 + $0x10] sm:$0xff] }
 0x277   : > { %1596 = vmatpush.bf16.msra.mxu2 %v1587_v25  ;;  %v1629_v25 = vld [vmem:[%s4926_s8 + $0x8] sm:$0xf] }
 0x278   : > { %v1539_v26 = vpop.permute.xlu1 %1538  ;;  %v4481_v27 = vpop.eup %3958 }
 0x279   : > { %v1545_v28 = vsel %vm1543_vm3, %v1539_v26, 0  ;;  %v1471_v29 = vsel %vm1346_vm1, %v4481_v27, 0.0  ;;  %v1673_v26 = vsel %vm1543_vm3, %v1629_v25, 0  ;;  %v3804_v25 = vld [vmem:[%s4241_s30 + $0x30] sm:$0xff] }
 0x27a   : > { %1554 = vmatpush.bf16.msra.mxu0 %v1545_v28  ;;  %v1630_v28 = vld [vmem:[%s4926_s8 + $0xc] sm:$0xf]  ;;  %s4939_s8 = sld [smem:[#allocation23_spill]] }
 0x27b   : > { %1682 = vmatpush.bf16.msrb.mxu2 %v1673_v26 }
 0x27d   : > { %1472 = vadd.xlane.f32.xlu2 %v1471_v29  ;;  %v1692_v29 = vsel %vm1543_vm3, %v1630_v28, 0 }
 0x27e   : > { %1701 = vmatpush.bf16.msrb.mxu3 %v1692_v29 }
 0x295   : > { %1560 = vrot.lane.b32.xlu2 %v4446_v32, %s4171_s10  ;;  %s1178_s10 = scalar_lea.vmem %s4934_s13, %s4425_s15 }
 0x2d8   : > { %v1464_v30 = vpop.xlane.xlu2 %1463 }
 0x2d9   : > { %3960 = vrcp.f32 %v1464_v30  ;;  %v1485_v36 = vand.u32 2147483648, %v1464_v30  ;;  %v1483_v38 = vand.u32 2147483647, %v1464_v30  ;;  %vm1479_vm5 = vweird.f32 %v1464_v30 }
 0x2db   : > { %v1486_v41 = vor.u32 1.1754944e-38, %v1485_v36  ;;  %vm1484_vm7 = vcmp.eq.f32.partialorder %v1483_v38, 8.507059e+37 }
 0x2df   : > { %v3961_v31 = vpop.eup %3960 }
 0x2e0   : > { %v1475_v33 = vmul.f32 %v3961_v31, %v1464_v30  ;;  %v1467_v34 = vpop.xlane.xlu2 %1466  ;;  %vm1480_vm4 = vweird.f32 %v3961_v31 }
 0x2e1   : > { %3962 = vrcp.f32 %v1467_v34  ;;  %vm1481_vm6 = vmor %vm1479_vm5, %vm1480_vm4  ;;  %v1499_v50 = vand.u32 2147483648, %v1467_v34  ;;  %vm1493_vm9 = vweird.f32 %v1467_v34  ;;  %v1497_v52 = vand.u32 2147483647, %v1467_v34 }
 0x2e2   : > { %v1476_v35 = vsub.f32 1.0, %v1475_v33 }
 0x2e3   : > { %v1500_v56 = vor.u32 1.1754944e-38, %v1499_v50  ;;  %vm1498_vm11 = vcmp.eq.f32.partialorder %v1497_v52, 8.507059e+37 }
 0x2e4   : > { %v1477_v37 = vmul.f32 %v3961_v31, %v1476_v35 }
 0x2e6   : > { %v1478_v39 = vadd.f32 %v3961_v31, %v1477_v37 }
 0x2e7   : > { %v3963_v40 = vpop.eup %3962 }
 0x2e8   : > { %v1482_v42 = vsel %vm1481_vm6, %v3961_v31, %v1478_v39  ;;  %v1489_v43 = vmul.f32 %v3963_v40, %v1467_v34  ;;  %v1470_v32 = vpop.xlane.xlu2 %1469  ;;  %vm1494_vm8 = vweird.f32 %v3963_v40 }
 0x2e9   : > { %v1487_v44 = vsel %vm1484_vm7, %v1486_v41, %v1482_v42  ;;  %3964 = vrcp.f32 %v1470_v32  ;;  %vm1495_vm10 = vmor %vm1493_vm9, %vm1494_vm8  ;;  %v1513_v58 = vand.u32 2147483648, %v1470_v32  ;;  %v1511_v61 = vand.u32 2147483647, %v1470_v32 }
 0x2ea   : > { %v1530_v45 = vmul.f32 %v3953_v9, %v1487_v44  ;;  %v1490_v46 = vsub.f32 1.0, %v1489_v43  ;;  %vm1507_vm13 = vweird.f32 %v1470_v32 }
 0x2eb   : > { %v1514_v1 = vor.u32 1.1754944e-38, %v1513_v58  ;;  %vm1512_vm15 = vcmp.eq.f32.partialorder %v1511_v61, 8.507059e+37 }
 0x2ec   : > { %v1491_v47 = vmul.f32 %v3963_v40, %v1490_v46  ;;  %v1534_v48 = vpack.c.bf16 %v1530_v45, %v1530_v45 }
 0x2ee   : > { %v1492_v49 = vadd.f32 %v3963_v40, %v1491_v47  ;;  %3572 = vmatmul.msk.bf16.vlgmr.msra.gmra.mxu0 %vm1346_vm1, %v1534_v48 }
 0x2ef   : > { %v3965_v51 = vpop.eup %3964 }
 0x2f0   : > { %v1503_v53 = vmul.f32 %v3965_v51, %v1470_v32  ;;  %v1473_v54 = vpop.xlane.xlu2 %1472  ;;  %v1496_v55 = vsel %vm1495_vm10, %v3963_v40, %v1492_v49  ;;  %vm1508_vm12 = vweird.f32 %v3965_v51 }
 0x2f1   : > { %3966 = vrcp.f32 %v1473_v54  ;;  %v1501_v59 = vsel %vm1498_vm11, %v1500_v56, %v1496_v55  ;;  %vm1509_vm14 = vmor %vm1507_vm13, %vm1508_vm12  ;;  %v1527_v10 = vand.u32 2147483648, %v1473_v54  ;;  %v1525_v13 = vand.u32 2147483647, %v1473_v54 }
 0x2f2   : > { %v1504_v57 = vsub.f32 1.0, %v1503_v53  ;;  %v1531_v0 = vmul.f32 %v4471_v15, %v1501_v59  ;;  %vm1521_vm4 = vweird.f32 %v1473_v54  ;;  %v3921_v53 = vld [vmem:[%s4933_s14] ss:$0 sm:$0xff] }
 0x2f3   : > { %v1528_v16 = vor.u32 1.1754944e-38, %v1527_v10  ;;  %vm1526_vm6 = vcmp.eq.f32.partialorder %v1525_v13, 8.507059e+37  ;;  %v1759_v10 = vld [vmem:[%s1178_s10] sm:$0xff]  ;;  %v3793_v13 = vld [vmem:[%s4925_s12 + $0x18] sm:$0xff]  ;;  %s1187_s10 = scalar_lea.vmem %s4206_s25, %s4421_s26 }
 0x2f4   : > { %v1505_v60 = vmul.f32 %v3965_v51, %v1504_v57  ;;  %v1535_v11 = vpack.c.bf16 %v1531_v0, %v1531_v0 }
 0x2f6   : > { %v1506_v62 = vadd.f32 %v3965_v51, %v1505_v60  ;;  %v4172_v60 = vmov 32.0  }
 0x2f7   : > { %v3967_v63 = vpop.eup %3966  ;;  %3968 = vrcp.f32 %v4172_v60 }
 0x2f8   : > { %v1510_v2 = vsel %vm1509_vm14, %v3965_v51, %v1506_v62  ;;  %v1517_v3 = vmul.f32 %v3967_v63, %v1473_v54  ;;  %v1561_v4 = vpop.permute.xlu2 %1560  ;;  %vm1522_vm2 = vweird.f32 %v3967_v63 }
 0x2f9   : > { %v1515_v5 = vsel %vm1512_vm15, %v1514_v1, %v1510_v2  ;;  %v1566_v6 = vsel %vm1543_vm3, %v1561_v4, 0  ;;  %vm1523_vm5 = vmor %vm1521_vm4, %vm1522_vm2 }
 0x2fa   : > { %v1532_v7 = vmul.f32 %v4476_v22, %v1515_v5  ;;  %v1518_v9 = vsub.f32 1.0, %v1517_v3  ;;  %1575 = vmatpush.bf16.msra.mxu1 %v1566_v6  ;;  %v1635_v22 = vsel %vm1543_vm3, %v1627_v21, 0  ;;  %v3805_v21 = vld [vmem:[%s4241_s30 + $0x38] sm:$0xff] }
 0x2fb   : > { %1644 = vmatpush.bf16.msrb.mxu0 %v1635_v22  ;;  %v3798_v22 = vld [vmem:[%s4241_s30] sm:$0xff] }
 0x2fc   : > { %v1519_v12 = vmul.f32 %v3967_v63, %v1518_v9  ;;  %v1536_v14 = vpack.c.bf16 %v1532_v7, %v1532_v7  ;;  %v3795_v7 = vld [vmem:[%s4925_s12 + $0x28] sm:$0xff]  ;;  %v3794_v9 = vld [vmem:[%s4925_s12 + $0x20] sm:$0xff] }
 0x2fd   : > { %3573 = vmatmul.msk.bf16.vlgmr.msra.gmra.mxu1 %vm1346_vm1, %v1535_v11  ;;  %v3969_v61 = vpop.eup %3968  ;;  %v1760_v11 = vpack.c.bf16 %v1759_v10, %v1759_v10 }
 0x2fe   : > { %v1520_v15 = vadd.f32 %v3967_v63, %v1519_v12  ;;  %3574 = vmatmul.msk.bf16.vlgmr.msra.gmra.mxu2 %vm1346_vm1, %v1536_v14  ;;  %1663 = vmatpush.bf16.msrb.mxu1 %v1654_v24  ;;  %v1726_v62 = vmul.f32 32.0, %v3969_v61  ;;  %vm1730_vm7 = vweird.f32 %v3969_v61  ;;  %v3791_v12 = vld [vmem:[%s4925_s12 + $0x8] sm:$0xff]  ;;  %v3797_v14 = vld [vmem:[%s4925_s12 + $0x38] sm:$0xff]  ;;  %v3802_v24 = vld [vmem:[%s4241_s30 + $0x20] sm:$0xff] }
 0x2ff   : > { %1864 = vmatpush.bf16.msra.mxu2 %v3795_v7  ;;  %1814 = vmatpush.bf16.msra.mxu0 %v3791_v12  ;;  %v3931_v12 = vld [vmem:[%s4927_s6 + $0x3] ss:$0 sm:$0xff] }
 0x300   : > { %v1524_v17 = vsel %vm1523_vm5, %v3967_v63, %v1520_v15  ;;  %v1727_v63 = vsub.f32 1.0, %v1726_v62  ;;  %v3790_v15 = vld [vmem:[%s4925_s12] sm:$0xff] }
 0x301   : > { %v1529_v18 = vsel %vm1526_vm6, %v1528_v16, %v1524_v17  ;;  %v3792_v16 = vld [vmem:[%s4925_s12 + $0x10] sm:$0xff] }
 0x302   : > { %v1533_v19 = vmul.f32 %v4481_v27, %v1529_v18  ;;  %v1728_v0 = vmul.f32 %v3969_v61, %v1727_v63  ;;  %1839 = vmatpush.bf16.msra.mxu1 %v3793_v13  ;;  %v3796_v17 = vld [vmem:[%s4925_s12 + $0x30] sm:$0xff]  ;;  %v3799_v18 = vld [vmem:[%s4241_s30 + $0x8] sm:$0xff]  ;;  %s3264_s12 = sand.u32 1, %s4384_s0  }
 0x303   : > { %1865 = vmatpush.bf16.msra.mxu2 %v3794_v9  ;;  %1815 = vmatpush.bf16.msra.mxu0 %v3790_v15 }
 0x304   : > { %v1537_v20 = vpack.c.bf16 %v1533_v19, %v1533_v19  ;;  %v1729_v1 = vadd.f32 %v3969_v61, %v1728_v0  ;;  %v3801_v19 = vld [vmem:[%s4241_s30 + $0x18] sm:$0xff] }
 0x306   : > { %3575 = vmatmul.msk.bf16.vlgmr.msra.gmra.mxu3 %vm1346_vm1, %v1537_v20  ;;  %v4515_v2 = vsel %vm1730_vm7, %v3969_v61, %v1729_v1  ;;  %1840 = vmatpush.bf16.msra.mxu1 %v3792_v16  ;;  %v3803_v20 = vld [vmem:[%s4241_s30 + $0x28] sm:$0xff] }
 0x307   : > { %1889 = vmatpush.bf16.msra.mxu3 %v3797_v14 }
 0x30b   : > { %1890 = vmatpush.bf16.msra.mxu3 %v3796_v17 }
 0x36b   : > { %v1556_v27 = vpop.f32.mrf.mxu0 }
 0x36c   : > { %v1623_v30 = vpack.c.bf16 %v1556_v27, %v1556_v27 }
 0x36e   : > { %3576 = vmatmul.msk.bf16.vlgmr.msrb.gmra.mxu0 %vm1346_vm1, %v1623_v30 }
 0x36f   : > { %1950 = vmatpush.bf16.msrb.mxu0 %v3799_v18 }
 0x373   : > { %v1558_v31 = vpop.f32.mrf.mxu0  ;;  %1951 = vmatpush.bf16.msrb.mxu0 %v3798_v22 }
 0x37a   : > { %v1577_v33 = vpop.f32.mrf.mxu1 }
 0x37b   : > { %v1624_v34 = vpack.c.bf16 %v1577_v33, %v1577_v33 }
 0x37d   : > { %3577 = vmatmul.msk.bf16.vlgmr.msrb.gmra.mxu1 %vm1346_vm1, %v1624_v34 }
 0x37e   : > { %3588 = vmatmul.msk.bf16.vlgmr.msra.gmra.mxu0 %vm1235_vm0, %v1760_v11  ;;  %1975 = vmatpush.bf16.msrb.mxu1 %v3801_v19 }
 0x381   : > { %v1598_v35 = vpop.f32.mrf.mxu2 }
 0x382   : > { %v1625_v36 = vpack.c.bf16 %v1598_v35, %v1598_v35  ;;  %v1579_v37 = vpop.f32.mrf.mxu1  ;;  %1976 = vmatpush.bf16.msrb.mxu1 %v3800_v23  ;;  %v3932_v23 = vld [vmem:[%s1187_s10] ss:$0 sm:$0xff]  ;;  %s4884_s10 = sand.u32 1, %s4124_s1  }
 0x383   : > { %s4614_s3 = sshll.u32 %s4884_s10, 3  ;;  %s4935_s10 = sld [smem:[#allocation19_spill]] }
 0x384   : > { %3578 = vmatmul.msk.bf16.vlgmr.msrb.gmra.mxu2 %vm1346_vm1, %v1625_v36  ;;  %v3922_v36 = vld [vmem:[%s4231_s19] ss:$0 sm:$0xff]  ;;  %s4955_s13 = scalar_lea.vmem [#allocation4], %s4614_s3 }
 0x385   : > { %2000 = vmatpush.bf16.msrb.mxu2 %v3803_v20  ;;  %s3296_s14 = sshll.u32 %s4955_s13, 4  ;;  %s3297_s14 = int_to_ptr.vmem [resolvable:$true] %s3296_s14 }
 0x389   : > { %v1600_v38 = vpop.f32.mrf.mxu2  ;;  %v1619_v39 = vpop.f32.mrf.mxu3  ;;  %2001 = vmatpush.bf16.msrb.mxu2 %v3802_v24 }
 0x38a   : > { %v1626_v40 = vpack.c.bf16 %v1619_v39, %v1619_v39  ;;  %v3923_v38 = vld [vmem:[%s4236_s24] ss:$0 sm:$0xff] }
 0x38c   : > { %3579 = vmatmul.msk.bf16.vlgmr.msrb.gmra.mxu3 %vm1346_vm1, %v1626_v40 }
 0x38d   : > { %3597 = vmatmul.msk.bf16.vlgmr.msra.gmra.mxu1 %vm1235_vm0, %v1760_v11  ;;  %2025 = vmatpush.bf16.msrb.mxu3 %v3805_v21 }
 0x391   : > { %v1621_v41 = vpop.f32.mrf.mxu3  ;;  %2026 = vmatpush.bf16.msrb.mxu3 %v3804_v25 }
 0x394   : > { %3606 = vmatmul.msk.bf16.vlgmr.msra.gmra.mxu2 %vm1235_vm0, %v1760_v11 }
 0x39c   : > { %3615 = vmatmul.msk.bf16.vlgmr.msra.gmra.mxu3 %vm1235_vm0, %v1760_v11  ;;  %v3930_v11 = vld [vmem:[%s4927_s6 + $0x2] ss:$0 sm:$0xff] }
 0x3eb   : > { %v1646_v42 = vpop.f32.mrf.mxu0 }
 0x3ec   : > { %v1707_v47 = vsel %vm1235_vm0, %v1646_v42, 0.0 }
 0x3f3   : > { %v1648_v43 = vpop.f32.mrf.mxu0 }
 0x3f4   : > { %v3926_v43 = vld [vmem:[%s4256_s20 + $0x2] ss:$0 sm:$0xff] }
 0x3fa   : > { %v1665_v32 = vpop.f32.mrf.mxu1 }
 0x3fb   : > { %v1708_v46 = vsel %vm1235_vm0, %v1665_v32, 0.0  ;;  %v3924_v32 = vld [vmem:[%s4256_s20] ss:$0 sm:$0xff] }
 0x3fc   : > { %v1709_v49 = vadd.f32 %v1708_v46, %v1707_v47  ;;  %v1817_v47 = vpop.f32.mrf.mxu0 }
 0x402   : > { %v1667_v44 = vpop.f32.mrf.mxu1 }
 0x403   : > { %v3925_v44 = vld [vmem:[%s4256_s20 + $0x1] ss:$0 sm:$0xff] }
 0x404   : > { %v1819_v61 = vpop.f32.mrf.mxu0 }
 0x407   : > { %v1684_v45 = vpop.f32.mrf.mxu2 }
 0x408   : > { %v1710_v48 = vsel %vm1235_vm0, %v1684_v45, 0.0 }
 0x409   : > { %v1711_v50 = vadd.f32 %v1710_v48, %v1709_v49  ;;  %v1818_v49 = vadd.f32 %v3924_v32, %v1817_v47 }
 0x40a   : > { %v1842_v48 = vpop.f32.mrf.mxu1 }
 0x40f   : > { %v1686_v51 = vpop.f32.mrf.mxu2  ;;  %v1703_v52 = vpop.f32.mrf.mxu3 }
 0x410   : > { %v1712_v54 = vsel %vm1235_vm0, %v1703_v52, 0.0  ;;  %v4559_v52 = vpack.c.bf16 %v1818_v49, %v1818_v49 }
 0x411   : > { %v1713_v55 = vadd.f32 %v1712_v54, %v1711_v50  ;;  %v1843_v50 = vadd.f32 %v3925_v44, %v1842_v48 }
 0x412   : > { %v1844_v62 = vpop.f32.mrf.mxu1 }
 0x413   : > { %v1718_v56 = vadd.f32 %v3921_v53, %v1713_v55  ;;  %v4561_v53 = vpack.c.bf16 %v1843_v50, %v1843_v50  ;;  %v3927_v55 = vld [vmem:[%s4256_s20 + $0x3] ss:$0 sm:$0xff] }
 0x415   : > { %v1719_v57 = vadd.f32 %v1718_v56, %v4430_v8  ;;  %v2048_v56 = vsel %vm1346_vm1, %v4559_v52, 0 }
 0x416   : > { %2057 = vmatpush.bf16.xpose.msra.mxu0 %v2048_v56 }
 0x417   : > { %v1705_v58 = vpop.f32.mrf.mxu3  ;;  %v1722_v59 = vsel %vm1235_vm0, %v1719_v57, 0.0  ;;  %v1867_v45 = vpop.f32.mrf.mxu2 }
 0x418   : > { %1723 = vadd.xlane.f32.xlu0 %v1722_v59  ;;  %v1868_v46 = vadd.f32 %v3926_v43, %v1867_v45 }
 0x41a   : > { %v4557_v51 = vpack.c.bf16 %v1868_v46, %v1868_v46 }
 0x41c   : > { %v2086_v54 = vsel %vm1346_vm1, %v4557_v51, 0 }
 0x41d   : > { %2095 = vmatpush.bf16.xpose.msra.mxu2 %v2086_v54 }
 0x41f   : > { %v1869_v58 = vpop.f32.mrf.mxu2  ;;  %v1892_v59 = vpop.f32.mrf.mxu3 }
 0x420   : > { %v1893_v60 = vadd.f32 %v3927_v55, %v1892_v59 }
 0x422   : > { %v4570_v63 = vpack.c.bf16 %v1893_v60, %v1893_v60 }
 0x424   : > { %v2105_v0 = vsel %vm1346_vm1, %v4570_v63, 0 }
 0x425   : > { %2114 = vmatpush.bf16.xpose.msra.mxu3 %v2105_v0 }
 0x427   : > { %v1894_v1 = vpop.f32.mrf.mxu3 }
 0x428   : > { %v2293_v1 = vunpack.c.l.b16 %v4570_v63  ;;  %v2221_v63 = vunpack.c.l.b16 %v4559_v52 }
 0x48b   : > { %v1724_v8 = vpop.xlane.xlu0 %1723 }
 0x48c   : > { %v1732_v3 = vmul.f32 %v4515_v2, %v1724_v8  ;;  %v3928_v8 = vld [vmem:[%s4927_s6] ss:$0 sm:$0xff] }
 0x48e   : > { %v1733_v4 = vsub.f32 %v1719_v57, %v1732_v3  ;;  %v2067_v57 = vsel %vm1346_vm1, %v4561_v53, 0  ;;  %v3929_v3 = vld [vmem:[%s4927_s6 + $0x1] ss:$0 sm:$0xff]  ;;  %s4938_s6 = sld [smem:[#allocation10_spill]] }
 0x48f   : > { %2076 = vmatpush.bf16.xpose.msra.mxu1 %v2067_v57 }
 0x490   : > { %v1734_v5 = vmul.f32 %v1733_v4, %v1733_v4 }
 0x492   : > { %v1735_v6 = vsel %vm1235_vm0, %v1734_v5, 0.0 }
 0x493   : > { %1736 = vadd.xlane.f32.xlu2 %v1735_v6 }
 0x506   : > { %v1737_v26 = vpop.xlane.xlu2 %1736 }
 0x507   : > { %v1738_v28 = vmul.f32 %v1737_v26, %v4515_v2 }
 0x509   : > { %v1739_v29 = vadd.f32 1e-06, %v1738_v28 }
 0x50b   : > { %3970 = vrsqrt.f32 %v1739_v29  ;;  %vm1746_vm9 = vweird.f32 %v1739_v29 }
 0x511   : > { %v3971_v27 = vpop.eup %3970 }
 0x512   : > { %v1741_v30 = vmul.f32 %v3971_v27, %v1739_v29  ;;  %vm1747_vm8 = vweird.f32 %v3971_v27 }
 0x513   : > { %vm1748_vm10 = vmor %vm1746_vm9, %vm1747_vm8 }
 0x514   : > { %v1742_v31 = vmul.f32 %v3971_v27, %v1741_v30 }
 0x516   : > { %v1743_v33 = vmul.f32 0.5, %v1742_v31 }
 0x518   : > { %v1744_v34 = vsub.f32 1.5, %v1743_v33 }
 0x51a   : > { %v1745_v35 = vmul.f32 %v3971_v27, %v1744_v34 }
 0x51c   : > { %v1749_v37 = vsel %vm1748_vm10, %v3971_v27, %v1745_v35 }
 0x51d   : > { %v1750_v39 = vmul.f32 %v1749_v37, %v1733_v4 }
 0x51f   : > { %v1754_v40 = vmul.f32 %v3922_v36, %v1750_v39 }
 0x521   : > { %v4544_v41 = vadd.f32 %v3923_v38, %v1754_v40  ;;  %v2269_v40 = vunpack.c.l.b16 %v4557_v51 }
 0x523   : > { %v1896_v42 = vpack.c.bf16 %v4544_v41, %v4544_v41  ;;  %v2270_v43 = vpack.c.b16 %v2269_v40, %v2269_v40 }
 0x525   : > { %3624 = vmatmul.msk.bf16.vlgmr.msrb.gmra.mxu0 %vm1235_vm0, %v1896_v42  ;;  %3633 = vmatmul.msk.bf16.vlgmr.msrb.gmra.mxu1 %vm1235_vm0, %v1896_v42 }
 0x526   : > { %3642 = vmatmul.msk.bf16.vlgmr.msrb.gmra.mxu2 %vm1235_vm0, %v1896_v42  ;;  %3651 = vmatmul.msk.bf16.vlgmr.msrb.gmra.mxu3 %vm1235_vm0, %v1896_v42 }
 0x5a2   : > { %v1953_v4 = vpop.f32.mrf.mxu0  ;;  %v1978_v5 = vpop.f32.mrf.mxu1 }
 0x5a3   : > { %v1954_v6 = vadd.f32 %v3928_v8, %v1953_v4  ;;  %v1979_v7 = vadd.f32 %v3929_v3, %v1978_v5  ;;  %v2294_v3 = vpack.c.b16 %v2293_v1, %v2293_v1 }
 0x5a5   : > { %v2033_v9 = vpack.c.bf16 %v1954_v6, %v1954_v6  ;;  %v2034_v10 = vpack.c.bf16 %v1979_v7, %v1979_v7  ;;  %v2245_v6 = vunpack.c.l.b16 %v4561_v53 }
 0x5a7   : > { %3652 = vmatmul.msk.bf16.vlgmr.msra.gmra.mxu0 %vm1346_vm1, %v2033_v9  ;;  %3653 = vmatmul.msk.bf16.vlgmr.msra.gmra.mxu1 %vm1346_vm1, %v2034_v10  ;;  %v2246_v7 = vpack.c.b16 %v2245_v6, %v2245_v6  ;;  %v2222_v9 = vpack.c.b16 %v2221_v63, %v2221_v63 }
 0x5a9   : > { %v2003_v13 = vpop.f32.mrf.mxu2  ;;  %v2028_v14 = vpop.f32.mrf.mxu3 }
 0x5aa   : > { %v2004_v15 = vadd.f32 %v3930_v11, %v2003_v13  ;;  %v2029_v16 = vadd.f32 %v3931_v12, %v2028_v14  ;;  %v1955_v17 = vpop.f32.mrf.mxu0  ;;  %v1980_v18 = vpop.f32.mrf.mxu1 }
 0x5ac   : > { %v2035_v19 = vpack.c.bf16 %v2004_v15, %v2004_v15  ;;  %v2036_v20 = vpack.c.bf16 %v2029_v16, %v2029_v16 }
 0x5ae   : > { %3654 = vmatmul.msk.bf16.vlgmr.msra.gmra.mxu2 %vm1346_vm1, %v2035_v19  ;;  %3655 = vmatmul.msk.bf16.vlgmr.msra.gmra.mxu3 %vm1346_vm1, %v2036_v20 }
 0x5b1   : > { %v2005_v21 = vpop.f32.mrf.mxu2  ;;  %v2030_v22 = vpop.f32.mrf.mxu3 }
 0x624   : > { %v2059_v24 = vpop.f32.mrf.mxu0  ;;  %v2078_v25 = vpop.f32.mrf.mxu1 }
 0x625   : > { %v2060_v26 = vadd.f32 %v3932_v23, %v2059_v24  ;;  %v2079_v37 = vadd.f32 %v3932_v23, %v2078_v25 }
 0x627   : > { %v2120_v28 = vsel %vm1346_vm1, %v2060_v26, -inf  ;;  %v2123_v42 = vsel %vm1346_vm1, %v2079_v37, -inf }
 0x628   : > { %2121 = vmax.xlane.f32.xlu2 %v2120_v28 }
 0x62c   : > { %v2061_v29 = vpop.f32.mrf.mxu0  ;;  %v2080_v27 = vpop.f32.mrf.mxu1 }
 0x631   : > { %v2097_v30 = vpop.f32.mrf.mxu2  ;;  %v2116_v31 = vpop.f32.mrf.mxu3 }
 0x632   : > { %v2098_v33 = vadd.f32 %v3932_v23, %v2097_v30  ;;  %v2117_v34 = vadd.f32 %v3932_v23, %v2116_v31 }
 0x634   : > { %v2129_v35 = vsel %vm1346_vm1, %v2117_v34, -inf  ;;  %v2126_v36 = vsel %vm1346_vm1, %v2098_v33, -inf }
 0x635   : > { %2130 = vmax.xlane.f32.xlu0 %v2129_v35  ;;  %2127 = vmax.xlane.f32.xlu1 %v2126_v36 }
 0x639   : > { %v2099_v38 = vpop.f32.mrf.mxu2  ;;  %v2118_v39 = vpop.f32.mrf.mxu3 }
 0x63d   : > { %2124 = vmax.xlane.f32.xlu1 %v2123_v42 }
 0x640   : > { %2271 = vrot.lane.b32.xlu2 %v2270_v43, %s4882_s16 }
 0x69b   : > { %v2122_v32 = vpop.xlane.xlu2 %2121 }
 0x69c   : > { %v2132_v44 = vsub.f32 %v2060_v26, %v2122_v32 }
 0x69e   : > { %v2136_v45 = vmul.f32 1.442695, %v2132_v44 }
 0x6a0   : > { %3972 = vpow2.f32 %v2136_v45 }
 0x6a3   : > { %v2272_v46 = vpop.permute.xlu2 %2271 }
 0x6a4   : > { %v2277_v47 = vsel %vm1543_vm3, %v2272_v46, 0 }
 0x6a5   : > { %2286 = vmatpush.bf16.msrb.mxu2 %v2277_v47 }
 0x6a6   : > { %v3973_v48 = vpop.eup %3972 }
 0x6a7   : > { %v2144_v49 = vsel %vm1346_vm1, %v3973_v48, 0.0 }
 0x6a8   : > { %v2131_v50 = vpop.xlane.xlu0 %2130  ;;  %v2128_v54 = vpop.xlane.xlu1 %2127  ;;  %2145 = vadd.xlane.f32.xlu1 %v2144_v49 }
 0x6a9   : > { %v2135_v51 = vsub.f32 %v2117_v34, %v2131_v50  ;;  %v2134_v59 = vsub.f32 %v2098_v33, %v2128_v54 }
 0x6ab   : > { %v2142_v55 = vmul.f32 1.442695, %v2135_v51  ;;  %v2140_v62 = vmul.f32 1.442695, %v2134_v59 }
 0x6ad   : > { %3974 = vpow2.f32 %v2142_v55 }
 0x6b0   : > { %v2125_v56 = vpop.xlane.xlu1 %2124 }
 0x6b1   : > { %v2133_v57 = vsub.f32 %v2079_v37, %v2125_v56 }
 0x6b3   : > { %v4593_v58 = vpop.eup %3974  ;;  %v2138_v60 = vmul.f32 1.442695, %v2133_v57 }
 0x6b4   : > { %v2153_v61 = vsel %vm1346_vm1, %v4593_v58, 0.0 }
 0x6b5   : > { %3976 = vpow2.f32 %v2138_v60  ;;  %2154 = vadd.xlane.f32.xlu2 %v2153_v61 }
 0x6b6   : > { %3978 = vpow2.f32 %v2140_v62 }
 0x6bb   : > { %v4597_v0 = vpop.eup %3976 }
 0x6bc   : > { %v2147_v8 = vsel %vm1346_vm1, %v4597_v0, 0.0  ;;  %v4602_v4 = vpop.eup %3978 }
 0x6bd   : > { %2148 = vadd.xlane.f32.xlu0 %v2147_v8  ;;  %v2150_v5 = vsel %vm1346_vm1, %v4602_v4, 0.0 }
 0x6c1   : > { %2295 = vrot.lane.b32.xlu1 %v2294_v3, %s4882_s16 }
 0x6c5   : > { %2151 = vadd.xlane.f32.xlu0 %v2150_v5 }
 0x6cd   : > { %2247 = vrot.lane.b32.xlu2 %v2246_v7, %s4882_s16  ;;  %v2323_v7 = vld [vmem:[%s4935_s10 + $0xc] sm:$0xf] }
 0x6ce   : > { %v2385_v63 = vsel %vm1543_vm3, %v2323_v7, 0 }
 0x6d9   : > { %2223 = vrot.lane.b32.xlu0 %v2222_v9, %s4882_s16  ;;  %s4885_s16 = scalar_lea.vmem [#allocation6], %s4614_s3  ;;  %v2321_v9 = vld [vmem:[%s4935_s10 + $0x4] sm:$0xf] }
 0x71b   : > { %v2146_v10 = vpop.xlane.xlu1 %2145 }
 0x71c   : > { %3980 = vrcp.f32 %v2146_v10  ;;  %v2167_v14 = vand.u32 2147483648, %v2146_v10  ;;  %v2165_v16 = vand.u32 2147483647, %v2146_v10  ;;  %vm2161_vm12 = vweird.f32 %v2146_v10 }
 0x71e   : > { %v2168_v52 = vor.u32 1.1754944e-38, %v2167_v14  ;;  %vm2166_vm14 = vcmp.eq.f32.partialorder %v2165_v16, 8.507059e+37 }
 0x722   : > { %v3981_v11 = vpop.eup %3980 }
 0x723   : > { %v2157_v12 = vmul.f32 %v3981_v11, %v2146_v10  ;;  %vm2162_vm11 = vweird.f32 %v3981_v11  ;;  %v2320_v10 = vld [vmem:[%s4935_s10] sm:$0xf] }
 0x724   : > { %vm2163_vm13 = vmor %vm2161_vm12, %vm2162_vm11 }
 0x725   : > { %v2158_v13 = vsub.f32 1.0, %v2157_v12  ;;  %v2322_v12 = vld [vmem:[%s4935_s10 + $0x8] sm:$0xf]  ;;  %s4951_s10 = sld [smem:[#allocation35_spill]] }
 0x727   : > { %v2159_v15 = vmul.f32 %v3981_v11, %v2158_v13  ;;  %v2366_v13 = vsel %vm1543_vm3, %v2322_v12, 0 }
 0x728   : > { %v2155_v53 = vpop.xlane.xlu2 %2154  ;;  %2375 = vmatpush.bf16.msra.mxu2 %v2366_v13 }
 0x729   : > { %v2160_v17 = vadd.f32 %v3981_v11, %v2159_v15  ;;  %3982 = vrcp.f32 %v2155_v53  ;;  %v2209_v28 = vand.u32 2147483648, %v2155_v53  ;;  %v2207_v30 = vand.u32 2147483647, %v2155_v53 }
 0x72a   : > { %vm2203_vm2 = vweird.f32 %v2155_v53 }
 0x72b   : > { %v2164_v18 = vsel %vm2163_vm13, %v3981_v11, %v2160_v17  ;;  %v2210_v35 = vor.u32 1.1754944e-38, %v2209_v28  ;;  %vm2208_vm5 = vcmp.eq.f32.partialorder %v2207_v30, 8.507059e+37  ;;  %v2328_v11 = vsel %vm1543_vm3, %v2320_v10, 0 }
 0x72c   : > { %v2169_v19 = vsel %vm2166_vm14, %v2168_v52, %v2164_v18 }
 0x72d   : > { %v4616_v20 = vmul.f32 %v3973_v48, %v2169_v19 }
 0x72f   : > { %v3983_v21 = vpop.eup %3982  ;;  %2412 = vst.msk [vmem:[%s4885_s16] sm:$0xff] %vm1346_vm1, %v4616_v20  ;;  %v2216_v6 = vpack.c.bf16 %v4616_v20, %v4616_v20  ;;  %s4936_s16 = sld [smem:[#allocation20_spill]] }
 0x730   : > { %v2199_v22 = vmul.f32 %v3983_v21, %v2155_v53  ;;  %v2149_v23 = vpop.xlane.xlu0 %2148  ;;  %v2248_v24 = vpop.permute.xlu2 %2247  ;;  %vm2204_vm15 = vweird.f32 %v3983_v21 }
 0x731   : > { %3984 = vrcp.f32 %v2149_v23  ;;  %v2253_v26 = vsel %vm1543_vm3, %v2248_v24, 0  ;;  %vm2205_vm4 = vmor %vm2203_vm2, %vm2204_vm15  ;;  %v2181_v43 = vand.u32 2147483648, %v2149_v23  ;;  %v2179_v44 = vand.u32 2147483647, %v2149_v23 }
 0x732   : > { %v2200_v25 = vsub.f32 1.0, %v2199_v22  ;;  %2262 = vmatpush.bf16.msrb.mxu1 %v2253_v26  ;;  %vm2175_vm7 = vweird.f32 %v2149_v23 }
 0x733   : > { %v2296_v29 = vpop.permute.xlu1 %2295  ;;  %v2182_v48 = vor.u32 1.1754944e-38, %v2181_v43  ;;  %vm2180_vm9 = vcmp.eq.f32.partialorder %v2179_v44, 8.507059e+37 }
 0x734   : > { %v2201_v27 = vmul.f32 %v3983_v21, %v2200_v25  ;;  %v2301_v31 = vsel %vm1543_vm3, %v2296_v29, 0 }
 0x735   : > { %2310 = vmatpush.bf16.msrb.mxu3 %v2301_v31 }
 0x736   : > { %v2202_v33 = vadd.f32 %v3983_v21, %v2201_v27 }
 0x737   : > { %v3985_v34 = vpop.eup %3984 }
 0x738   : > { %v2206_v36 = vsel %vm2205_vm4, %v3983_v21, %v2202_v33  ;;  %v2171_v37 = vmul.f32 %v3985_v34, %v2149_v23  ;;  %v2152_v38 = vpop.xlane.xlu0 %2151  ;;  %vm2176_vm6 = vweird.f32 %v3985_v34 }
 0x739   : > { %v2211_v39 = vsel %vm2208_vm5, %v2210_v35, %v2206_v36  ;;  %3986 = vrcp.f32 %v2152_v38  ;;  %vm2177_vm8 = vmor %vm2175_vm7, %vm2176_vm6  ;;  %v2195_v56 = vand.u32 2147483648, %v2152_v38  ;;  %vm2189_vm11 = vweird.f32 %v2152_v38  ;;  %2394 = vmatpush.bf16.msra.mxu3 %v2385_v63 }
 0x73a   : > { %v2215_v40 = vmul.f32 %v4593_v58, %v2211_v39  ;;  %v2172_v42 = vsub.f32 1.0, %v2171_v37  ;;  %v2193_v58 = vand.u32 2147483647, %v2152_v38  ;;  %v3933_v37 = vld [vmem:[%s4936_s16] ss:$0 sm:$0xff]  ;;  %s1174_s16 = scalar_lea.vmem %s4938_s6, %s4425_s15  ;;  %s4940_s6 = sld [smem:[#allocation21_spill]] }
 0x73b   : > { %v2196_v61 = vor.u32 1.1754944e-38, %v2195_v56  ;;  %v3813_v56 = vld [vmem:[%s4937_s5 + $0x38] sm:$0xff]  ;;  %s4941_s15 = sld [smem:[#allocation22_spill]] }
 0x73c   : > { %v2173_v32 = vmul.f32 %v3985_v34, %v2172_v42  ;;  %v2219_v45 = vpack.c.bf16 %v2215_v40, %v2215_v40  ;;  %vm2194_vm13 = vcmp.eq.f32.partialorder %v2193_v58, 8.507059e+37  ;;  %v3808_v58 = vld [vmem:[%s4937_s5 + $0x10] sm:$0xff] }
 0x73e   : > { %v2174_v46 = vadd.f32 %v3985_v34, %v2173_v32  ;;  %3659 = vmatmul.msk.bf16.vlgmr.msrb.gmra.mxu3 %vm1346_vm1, %v2219_v45 }
 0x73f   : > { %v3987_v47 = vpop.eup %3986  ;;  %2576 = vmatpush.bf16.msrb.mxu3 %v3813_v56 }
 0x740   : > { %v2178_v49 = vsel %vm2177_vm8, %v3985_v34, %v2174_v46  ;;  %v2185_v50 = vmul.f32 %v3987_v47, %v2152_v38  ;;  %vm2190_vm10 = vweird.f32 %v3987_v47 }
 0x741   : > { %v2183_v54 = vsel %vm2180_vm9, %v2182_v48, %v2178_v49  ;;  %vm2191_vm12 = vmor %vm2189_vm11, %vm2190_vm10  ;;  %v3811_v49 = vld [vmem:[%s4937_s5 + $0x28] sm:$0xff] }
 0x742   : > { %v2213_v51 = vmul.f32 %v4597_v0, %v2183_v54  ;;  %v2186_v55 = vsub.f32 1.0, %v2185_v50  ;;  %v2446_v50 = vld [vmem:[%s1174_s16] sm:$0xff]  ;;  %s4942_s16 = sld [smem:[#allocation13_spill]] }
 0x743   : > { %v2447_v54 = vpack.c.bf16 %v2446_v50, %v2446_v50 }
 0x744   : > { %v2187_v57 = vmul.f32 %v3987_v47, %v2186_v55  ;;  %v2217_v59 = vpack.c.bf16 %v2213_v51, %v2213_v51  ;;  %v3807_v51 = vld [vmem:[%s4937_s5 + $0x8] sm:$0xff]  ;;  %v3809_v55 = vld [vmem:[%s4937_s5 + $0x18] sm:$0xff] }
 0x746   : > { %v2188_v60 = vadd.f32 %v3987_v47, %v2187_v57  ;;  %3657 = vmatmul.msk.bf16.vlgmr.msrb.gmra.mxu1 %vm1346_vm1, %v2217_v59  ;;  %v3806_v57 = vld [vmem:[%s4937_s5] sm:$0xff]  ;;  %v3812_v59 = vld [vmem:[%s4937_s5 + $0x30] sm:$0xff] }
 0x747   : > { %2577 = vmatpush.bf16.msrb.mxu3 %v3812_v59 }
 0x748   : > { %v2192_v62 = vsel %vm2191_vm12, %v3987_v47, %v2188_v60  ;;  %v3815_v60 = vld [vmem:[%s4939_s8 + $0x8] sm:$0xff] }
 0x749   : > { %v2197_v1 = vsel %vm2194_vm13, %v2196_v61, %v2192_v62  ;;  %v3817_v61 = vld [vmem:[%s4939_s8 + $0x18] sm:$0xff]  ;;  %v3819_v62 = vld [vmem:[%s4939_s8 + $0x28] sm:$0xff] }
 0x74a   : > { %v2214_v0 = vmul.f32 %v4602_v4, %v2197_v1  ;;  %v2347_v4 = vsel %vm1543_vm3, %v2321_v9, 0  ;;  %v3821_v1 = vld [vmem:[%s4939_s8 + $0x38] sm:$0xff] }
 0x74b   : > { %v2224_v8 = vpop.permute.xlu0 %2223  ;;  %2356 = vmatpush.bf16.msra.mxu1 %v2347_v4 }
 0x74c   : > { %v2229_v3 = vsel %vm1543_vm3, %v2224_v8, 0  ;;  %v2218_v5 = vpack.c.bf16 %v2214_v0, %v2214_v0  ;;  %v3814_v0 = vld [vmem:[%s4939_s8] sm:$0xff]  ;;  %v3816_v8 = vld [vmem:[%s4939_s8 + $0x10] sm:$0xff] }
 0x74d   : > { %2238 = vmatpush.bf16.msrb.mxu0 %v2229_v3  ;;  %v3818_v3 = vld [vmem:[%s4939_s8 + $0x20] sm:$0xff] }
 0x74e   : > { %3658 = vmatmul.msk.bf16.vlgmr.msrb.gmra.mxu2 %vm1346_vm1, %v2218_v5  ;;  %v3820_v5 = vld [vmem:[%s4939_s8 + $0x30] sm:$0xff]  ;;  %s4950_s8 = sld [smem:[#allocation33_spill]] }
 0x74f   : > { %2551 = vmatpush.bf16.msrb.mxu2 %v3811_v49  ;;  %2526 = vmatpush.bf16.msrb.mxu1 %v3809_v55 }
 0x750   : > { %3656 = vmatmul.msk.bf16.vlgmr.msrb.gmra.mxu0 %vm1346_vm1, %v2216_v6 }
 0x751   : > { %2337 = vmatpush.bf16.msra.mxu0 %v2328_v11 }
 0x753   : > { %2527 = vmatpush.bf16.msrb.mxu1 %v3808_v58 }
 0x755   : > { %2501 = vmatpush.bf16.msrb.mxu0 %v3807_v51 }
 0x759   : > { %2502 = vmatpush.bf16.msrb.mxu0 %v3806_v57 }
 0x7c1   : > { %v2312_v14 = vpop.f32.mrf.mxu3 }
 0x7c2   : > { %v2319_v15 = vpack.c.bf16 %v2312_v14, %v2312_v14  ;;  %v3934_v14 = vld [vmem:[%s4940_s6] ss:$0 sm:$0xff]  ;;  %s1184_s6 = scalar_lea.vmem %s4942_s16, %s4421_s26  ;;  %s4945_s26 = smov 120  }
 0x7c3   : > { %v2264_v16 = vpop.f32.mrf.mxu1 }
 0x7c4   : > { %v2317_v53 = vpack.c.bf16 %v2264_v16, %v2264_v16  ;;  %3663 = vmatmul.msk.bf16.vlgmr.msra.gmra.mxu3 %vm1346_vm1, %v2319_v15  ;;  %v3935_v16 = vld [vmem:[%s4941_s15] ss:$0 sm:$0xff]  ;;  %s4944_s15 = sld [smem:[#allocation24_spill]] }
 0x7c5   : > { %2712 = vmatpush.bf16.msra.mxu3 %v3821_v1 }
 0x7c6   : > { %3661 = vmatmul.msk.bf16.vlgmr.msra.gmra.mxu1 %vm1346_vm1, %v2317_v53 }
 0x7c7   : > { %2662 = vmatpush.bf16.msra.mxu1 %v3817_v61 }
 0x7c9   : > { %v2314_v17 = vpop.f32.mrf.mxu3  ;;  %2713 = vmatpush.bf16.msra.mxu3 %v3820_v5 }
 0x7ca   : > { %v3943_v51 = vld [vmem:[%s4944_s15 + $0x3] ss:$0 sm:$0xff] }
 0x7cb   : > { %v2266_v52 = vpop.f32.mrf.mxu1  ;;  %2663 = vmatpush.bf16.msra.mxu1 %v3816_v8  ;;  %v3944_v8 = vld [vmem:[%s1184_s6] ss:$0 sm:$0xff]  ;;  %s4889_s6 = scalar_lea.vmem [#allocation4], %s4614_s3 }
 0x7cd   : > { %v2240_v18 = vpop.f32.mrf.mxu0 }
 0x7ce   : > { %v2316_v19 = vpack.c.bf16 %v2240_v18, %v2240_v18 }
 0x7d0   : > { %3660 = vmatmul.msk.bf16.vlgmr.msra.gmra.mxu0 %vm1346_vm1, %v2316_v19 }
 0x7d1   : > { %v2288_v20 = vpop.f32.mrf.mxu2  ;;  %2637 = vmatpush.bf16.msra.mxu0 %v3815_v60 }
 0x7d2   : > { %v2318_v21 = vpack.c.bf16 %v2288_v20, %v2288_v20 }
 0x7d4   : > { %3662 = vmatmul.msk.bf16.vlgmr.msra.gmra.mxu2 %vm1346_vm1, %v2318_v21  ;;  %3699 = vmatmul.msk.bf16.vlgmr.msrb.gmra.mxu3 %vm1235_vm0, %v2447_v54 }
 0x7d5   : > { %v2242_v22 = vpop.f32.mrf.mxu0  ;;  %2638 = vmatpush.bf16.msra.mxu0 %v3814_v0 }
 0x7d6   : > { %3681 = vmatmul.msk.bf16.vlgmr.msrb.gmra.mxu1 %vm1235_vm0, %v2447_v54 }
 0x7d9   : > { %v2290_v23 = vpop.f32.mrf.mxu2 }
 0x7e0   : > { %3672 = vmatmul.msk.bf16.vlgmr.msrb.gmra.mxu0 %vm1235_vm0, %v2447_v54 }
 0x843   : > { %v2358_v24 = vpop.f32.mrf.mxu1 }
 0x844   : > { %v2401_v31 = vsel %vm1235_vm0, %v2358_v24, 0.0 }
 0x847   : > { %v2396_v25 = vpop.f32.mrf.mxu3 }
 0x848   : > { %v2405_v38 = vsel %vm1235_vm0, %v2396_v25, 0.0 }
 0x84b   : > { %v2360_v26 = vpop.f32.mrf.mxu1 }
 0x84d   : > { %v2339_v28 = vpop.f32.mrf.mxu0 }
 0x84e   : > { %v2400_v27 = vsel %vm1235_vm0, %v2339_v28, 0.0 }
 0x84f   : > { %v2398_v29 = vpop.f32.mrf.mxu3  ;;  %v2402_v33 = vadd.f32 %v2401_v31, %v2400_v27 }
 0x853   : > { %v2529_v25 = vpop.f32.mrf.mxu1 }
 0x855   : > { %v2341_v30 = vpop.f32.mrf.mxu0 }
 0x857   : > { %v2377_v34 = vpop.f32.mrf.mxu2 }
 0x858   : > { %v2403_v35 = vsel %vm1235_vm0, %v2377_v34, 0.0 }
 0x859   : > { %v2404_v36 = vadd.f32 %v2403_v35, %v2402_v33 }
 0x85b   : > { %v2406_v39 = vadd.f32 %v2405_v38, %v2404_v36 }
 0x85d   : > { %v2411_v40 = vadd.f32 %v3933_v37, %v2406_v39  ;;  %v2504_v24 = vpop.f32.mrf.mxu0  ;;  %v2579_v37 = vpop.f32.mrf.mxu3 }
 0x85f   : > { %v2379_v42 = vpop.f32.mrf.mxu2  ;;  %v2413_v43 = vadd.f32 %v2411_v40, %v4544_v41  ;;  %v3810_v41 = vld [vmem:[%s4937_s5 + $0x20] sm:$0xff]  ;;  %s4943_s5 = sld [smem:[#allocation26_spill]]  ;;  %v2531_v40 = vpop.f32.mrf.mxu1 }
 0x860   : > { %2552 = vmatpush.bf16.msrb.mxu2 %v3810_v41 }
 0x861   : > { %v2416_v32 = vsel %vm1235_vm0, %v2413_v43, 0.0 }
 0x862   : > { %2417 = vadd.xlane.f32.xlu0 %v2416_v32 }
 0x863   : > { %3690 = vmatmul.msk.bf16.vlgmr.msrb.gmra.mxu2 %vm1235_vm0, %v2447_v54  ;;  %v3942_v54 = vld [vmem:[%s4944_s15 + $0x2] ss:$0 sm:$0xff] }
 0x864   : > { %2687 = vmatpush.bf16.msra.mxu2 %v3819_v62 }
 0x865   : > { %v3938_v19 = vld [vmem:[%s4943_s5 + $0x2] ss:$0 sm:$0xff]  ;;  %v3936_v20 = vld [vmem:[%s4943_s5] ss:$0 sm:$0xff]  ;;  %v3937_v21 = vld [vmem:[%s4943_s5 + $0x1] ss:$0 sm:$0xff]  ;;  %v2506_v39 = vpop.f32.mrf.mxu0  ;;  %v2581_v32 = vpop.f32.mrf.mxu3 }
 0x866   : > { %v2505_v26 = vadd.f32 %v3936_v20, %v2504_v24  ;;  %v2530_v28 = vadd.f32 %v3937_v21, %v2529_v25  ;;  %v3939_v33 = vld [vmem:[%s4943_s5 + $0x3] ss:$0 sm:$0xff]  ;;  %s4948_s5 = sld [smem:[#allocation29_spill]] }
 0x867   : > { %v2580_v38 = vadd.f32 %v3939_v33, %v2579_v37 }
 0x868   : > { %2688 = vmatpush.bf16.msra.mxu2 %v3818_v3  ;;  %v4696_v27 = vpack.c.bf16 %v2505_v26, %v2505_v26  ;;  %v4698_v30 = vpack.c.bf16 %v2530_v28, %v2530_v28 }
 0x869   : > { %v4707_v42 = vpack.c.bf16 %v2580_v38, %v2580_v38 }
 0x86a   : > { %v2735_v34 = vsel %vm1346_vm1, %v4696_v27, 0  ;;  %v2754_v35 = vsel %vm1346_vm1, %v4698_v30, 0 }
 0x86b   : > { %2744 = vmatpush.bf16.xpose.msrb.mxu0 %v2735_v34  ;;  %2763 = vmatpush.bf16.xpose.msrb.mxu1 %v2754_v35 }
 0x8d5   : > { %v2418_v44 = vpop.xlane.xlu0 %2417 }
 0x8d6   : > { %v2419_v45 = vmul.f32 %v2418_v44, %v4515_v2  ;;  %v3940_v44 = vld [vmem:[%s4944_s15] ss:$0 sm:$0xff] }
 0x8d8   : > { %v2420_v46 = vsub.f32 %v2413_v43, %v2419_v45  ;;  %v2792_v43 = vsel %vm1346_vm1, %v4707_v42, 0  ;;  %v3941_v45 = vld [vmem:[%s4944_s15 + $0x1] ss:$0 sm:$0xff] }
 0x8d9   : > { %2801 = vmatpush.bf16.xpose.msrb.mxu3 %v2792_v43  ;;  %v2980_v43 = vunpack.c.l.b16 %v4707_v42  ;;  %v2908_v42 = vunpack.c.l.b16 %v4696_v27 }
 0x8da   : > { %v2421_v47 = vmul.f32 %v2420_v46, %v2420_v46 }
 0x8dc   : > { %v2422_v48 = vsel %vm1235_vm0, %v2421_v47, 0.0 }
 0x8dd   : > { %2423 = vadd.xlane.f32.xlu1 %v2422_v48 }
 0x8e6   : > { %v2554_v22 = vpop.f32.mrf.mxu2 }
 0x8e7   : > { %v2555_v23 = vadd.f32 %v3938_v19, %v2554_v22 }
 0x8e9   : > { %v4694_v29 = vpack.c.bf16 %v2555_v23, %v2555_v23 }
 0x8eb   : > { %v2773_v31 = vsel %vm1346_vm1, %v4694_v29, 0 }
 0x8ec   : > { %2782 = vmatpush.bf16.xpose.msrb.mxu2 %v2773_v31 }
 0x8ee   : > { %v2556_v36 = vpop.f32.mrf.mxu2 }
 0x950   : > { %v2424_v6 = vpop.xlane.xlu1 %2423 }
 0x951   : > { %v2425_v7 = vmul.f32 %v2424_v6, %v4515_v2 }
 0x953   : > { %v2426_v63 = vadd.f32 1e-06, %v2425_v7 }
 0x955   : > { %3988 = vrsqrt.f32 %v2426_v63  ;;  %vm2433_vm15 = vweird.f32 %v2426_v63 }
 0x95b   : > { %v3989_v9 = vpop.eup %3988 }
 0x95c   : > { %v2428_v4 = vmul.f32 %v3989_v9, %v2426_v63  ;;  %vm2434_vm14 = vweird.f32 %v3989_v9 }
 0x95d   : > { %vm2435_vm2 = vmor %vm2433_vm15, %vm2434_vm14 }
 0x95e   : > { %v2429_v10 = vmul.f32 %v3989_v9, %v2428_v4 }
 0x960   : > { %v2430_v11 = vmul.f32 0.5, %v2429_v10 }
 0x962   : > { %v2431_v12 = vsub.f32 1.5, %v2430_v11 }
 0x964   : > { %v2432_v13 = vmul.f32 %v3989_v9, %v2431_v12 }
 0x966   : > { %v2436_v15 = vsel %vm2435_vm2, %v3989_v9, %v2432_v13 }
 0x967   : > { %v2437_v53 = vmul.f32 %v2436_v15, %v2420_v46 }
 0x969   : > { %v2441_v17 = vmul.f32 %v3934_v14, %v2437_v53 }
 0x96b   : > { %v4681_v52 = vadd.f32 %v3935_v16, %v2441_v17  ;;  %v2956_v17 = vunpack.c.l.b16 %v4694_v29 }
 0x96d   : > { %v2583_v18 = vpack.c.bf16 %v4681_v52, %v4681_v52  ;;  %v2957_v19 = vpack.c.b16 %v2956_v17, %v2956_v17 }
 0x96f   : > { %3708 = vmatmul.msk.bf16.vlgmr.msra.gmra.mxu0 %vm1235_vm0, %v2583_v18  ;;  %3717 = vmatmul.msk.bf16.vlgmr.msra.gmra.mxu1 %vm1235_vm0, %v2583_v18 }
 0x970   : > { %3726 = vmatmul.msk.bf16.vlgmr.msra.gmra.mxu2 %vm1235_vm0, %v2583_v18  ;;  %3735 = vmatmul.msk.bf16.vlgmr.msra.gmra.mxu3 %vm1235_vm0, %v2583_v18 }
 0x9ec   : > { %v2640_v46 = vpop.f32.mrf.mxu0  ;;  %v2665_v47 = vpop.f32.mrf.mxu1 }
 0x9ed   : > { %v2641_v48 = vadd.f32 %v3940_v44, %v2640_v46  ;;  %v2666_v49 = vadd.f32 %v3941_v45, %v2665_v47  ;;  %v2981_v45 = vpack.c.b16 %v2980_v43, %v2980_v43 }
 0x9ef   : > { %v2720_v41 = vpack.c.bf16 %v2641_v48, %v2641_v48  ;;  %v2721_v50 = vpack.c.bf16 %v2666_v49, %v2666_v49  ;;  %v2932_v48 = vunpack.c.l.b16 %v4698_v30 }
 0x9f1   : > { %3736 = vmatmul.msk.bf16.vlgmr.msrb.gmra.mxu0 %vm1346_vm1, %v2720_v41  ;;  %3737 = vmatmul.msk.bf16.vlgmr.msrb.gmra.mxu1 %vm1346_vm1, %v2721_v50  ;;  %v2933_v49 = vpack.c.b16 %v2932_v48, %v2932_v48  ;;  %v2909_v41 = vpack.c.b16 %v2908_v42, %v2908_v42 }
 0x9f3   : > { %v2690_v55 = vpop.f32.mrf.mxu2  ;;  %v2715_v56 = vpop.f32.mrf.mxu3 }
 0x9f4   : > { %v2691_v57 = vadd.f32 %v3942_v54, %v2690_v55  ;;  %v2716_v58 = vadd.f32 %v3943_v51, %v2715_v56  ;;  %v2642_v59 = vpop.f32.mrf.mxu0  ;;  %v2667_v60 = vpop.f32.mrf.mxu1 }
 0x9f6   : > { %v2722_v61 = vpack.c.bf16 %v2691_v57, %v2691_v57  ;;  %v2723_v62 = vpack.c.bf16 %v2716_v58, %v2716_v58 }
 0x9f8   : > { %3738 = vmatmul.msk.bf16.vlgmr.msrb.gmra.mxu2 %vm1346_vm1, %v2722_v61  ;;  %3739 = vmatmul.msk.bf16.vlgmr.msrb.gmra.mxu3 %vm1346_vm1, %v2723_v62 }
 0x9fb   : > { %v2692_v1 = vpop.f32.mrf.mxu2  ;;  %v2717_v0 = vpop.f32.mrf.mxu3 }
 0xa6e   : > { %v2746_v3 = vpop.f32.mrf.mxu0  ;;  %v2765_v5 = vpop.f32.mrf.mxu1 }
 0xa6f   : > { %v2747_v6 = vadd.f32 %v3944_v8, %v2746_v3  ;;  %v2766_v15 = vadd.f32 %v3944_v8, %v2765_v5 }
 0xa71   : > { %v2807_v7 = vsel %vm1346_vm1, %v2747_v6, -inf  ;;  %v2810_v18 = vsel %vm1346_vm1, %v2766_v15, -inf }
 0xa72   : > { %2808 = vmax.xlane.f32.xlu1 %v2807_v7 }
 0xa76   : > { %v2748_v63 = vpop.f32.mrf.mxu0  ;;  %v2767_v9 = vpop.f32.mrf.mxu1 }
 0xa7b   : > { %v2784_v4 = vpop.f32.mrf.mxu2  ;;  %v2803_v10 = vpop.f32.mrf.mxu3 }
 0xa7c   : > { %v2785_v11 = vadd.f32 %v3944_v8, %v2784_v4  ;;  %v2804_v12 = vadd.f32 %v3944_v8, %v2803_v10 }
 0xa7e   : > { %v2816_v13 = vsel %vm1346_vm1, %v2804_v12, -inf  ;;  %v2813_v14 = vsel %vm1346_vm1, %v2785_v11, -inf }
 0xa7f   : > { %2817 = vmax.xlane.f32.xlu0 %v2816_v13  ;;  %2814 = vmax.xlane.f32.xlu2 %v2813_v14 }
 0xa83   : > { %v2786_v16 = vpop.f32.mrf.mxu2  ;;  %v2805_v53 = vpop.f32.mrf.mxu3 }
 0xa87   : > { %2811 = vmax.xlane.f32.xlu2 %v2810_v18 }
 0xa8b   : > { %2958 = vrot.lane.b32.xlu1 %v2957_v19, %s4945_s26 }
 0xae5   : > { %v2809_v20 = vpop.xlane.xlu1 %2808 }
 0xae6   : > { %v2819_v21 = vsub.f32 %v2747_v6, %v2809_v20 }
 0xae8   : > { %v2823_v22 = vmul.f32 1.442695, %v2819_v21 }
 0xaea   : > { %3990 = vpow2.f32 %v2823_v22 }
 0xaf0   : > { %v3991_v23 = vpop.eup %3990 }
 0xaf1   : > { %v2831_v24 = vsel %vm1346_vm1, %v3991_v23, 0.0 }
 0xaf2   : > { %v2818_v25 = vpop.xlane.xlu0 %2817  ;;  %v2815_v26 = vpop.xlane.xlu2 %2814  ;;  %2832 = vadd.xlane.f32.xlu2 %v2831_v24 }
 0xaf3   : > { %v2822_v28 = vsub.f32 %v2804_v12, %v2818_v25  ;;  %v2821_v35 = vsub.f32 %v2785_v11, %v2815_v26 }
 0xaf5   : > { %v2829_v31 = vmul.f32 1.442695, %v2822_v28  ;;  %v2827_v40 = vmul.f32 1.442695, %v2821_v35 }
 0xaf7   : > { %3992 = vpow2.f32 %v2829_v31 }
 0xafa   : > { %v2812_v29 = vpop.xlane.xlu2 %2811 }
 0xafb   : > { %v2820_v33 = vsub.f32 %v2766_v15, %v2812_v29 }
 0xafd   : > { %v4729_v34 = vpop.eup %3992  ;;  %v2825_v36 = vmul.f32 1.442695, %v2820_v33  ;;  %v2959_v37 = vpop.permute.xlu1 %2958 }
 0xafe   : > { %v2964_v38 = vsel %vm1543_vm3, %v2959_v37, 0  ;;  %v2840_v39 = vsel %vm1346_vm1, %v4729_v34, 0.0 }
 0xaff   : > { %3994 = vpow2.f32 %v2825_v36  ;;  %2841 = vadd.xlane.f32.xlu1 %v2840_v39  ;;  %2973 = vmatpush.bf16.msra.mxu2 %v2964_v38 }
 0xb00   : > { %3996 = vpow2.f32 %v2827_v40 }
 0xb05   : > { %v4735_v32 = vpop.eup %3994 }
 0xb06   : > { %v2834_v44 = vsel %vm1346_vm1, %v4735_v32, 0.0  ;;  %v4740_v46 = vpop.eup %3996 }
 0xb07   : > { %2835 = vadd.xlane.f32.xlu0 %v2834_v44  ;;  %v2837_v47 = vsel %vm1346_vm1, %v4740_v46, 0.0 }
 0xb0a   : > { %2982 = vrot.lane.b32.xlu2 %v2981_v45, %s4945_s26 }
 0xb0f   : > { %2838 = vadd.xlane.f32.xlu0 %v2837_v47 }
 0xb18   : > { %2934 = vrot.lane.b32.xlu1 %v2933_v49, %s4945_s26 }
 0xb23   : > { %2910 = vrot.lane.b32.xlu0 %v2909_v41, %s4945_s26  ;;  %s4946_s26 = sld [smem:[#allocation27_spill]] }
 0xb29   : > { %v3010_v49 = vld [vmem:[%s4946_s26 + $0xc] sm:$0xf]  ;;  %v3008_v41 = vld [vmem:[%s4946_s26 + $0x4] sm:$0xf] }
 0xb2a   : > { %v3072_v42 = vsel %vm1543_vm3, %v3010_v49, 0 }
 0xb65   : > { %v2833_v50 = vpop.xlane.xlu2 %2832 }
 0xb66   : > { %3998 = vrcp.f32 %v2833_v50  ;;  %v2854_v58 = vand.u32 2147483648, %v2833_v50  ;;  %v2852_v59 = vand.u32 2147483647, %v2833_v50  ;;  %vm2848_vm5 = vweird.f32 %v2833_v50 }
 0xb68   : > { %v2855_v61 = vor.u32 1.1754944e-38, %v2854_v58  ;;  %vm2853_vm7 = vcmp.eq.f32.partialorder %v2852_v59, 8.507059e+37 }
 0xb6c   : > { %v3999_v54 = vpop.eup %3998 }
 0xb6d   : > { %v2844_v51 = vmul.f32 %v3999_v54, %v2833_v50  ;;  %v2983_v55 = vpop.permute.xlu2 %2982  ;;  %vm2849_vm4 = vweird.f32 %v3999_v54  ;;  %v3007_v50 = vld [vmem:[%s4946_s26] sm:$0xf] }
 0xb6e   : > { %v2988_v56 = vsel %vm1543_vm3, %v2983_v55, 0  ;;  %vm2850_vm6 = vmor %vm2848_vm5, %vm2849_vm4 }
 0xb6f   : > { %v2845_v57 = vsub.f32 1.0, %v2844_v51  ;;  %2997 = vmatpush.bf16.msra.mxu3 %v2988_v56  ;;  %v3009_v51 = vld [vmem:[%s4946_s26 + $0x8] sm:$0xf] }
 0xb70   : > { %v3053_v55 = vsel %vm1543_vm3, %v3009_v51, 0 }
 0xb71   : > { %v2846_v30 = vmul.f32 %v3999_v54, %v2845_v57  ;;  %3062 = vmatpush.bf16.msrb.mxu2 %v3053_v55  ;;  %v3826_v55 = vld [vmem:[%s4951_s10 + $0x10] sm:$0xff] }
 0xb72   : > { %v2842_v60 = vpop.xlane.xlu1 %2841 }
 0xb73   : > { %v2847_v27 = vadd.f32 %v3999_v54, %v2846_v30  ;;  %4000 = vrcp.f32 %v2842_v60  ;;  %v2896_v7 = vand.u32 2147483648, %v2842_v60  ;;  %v2894_v9 = vand.u32 2147483647, %v2842_v60  ;;  %3081 = vmatpush.bf16.msrb.mxu3 %v3072_v42 }
 0xb74   : > { %vm2890_vm9 = vweird.f32 %v2842_v60 }
 0xb75   : > { %v2851_v62 = vsel %vm2850_vm6, %v3999_v54, %v2847_v27  ;;  %v2897_v11 = vor.u32 1.1754944e-38, %v2896_v7  ;;  %vm2895_vm11 = vcmp.eq.f32.partialorder %v2894_v9, 8.507059e+37  ;;  %v3015_v54 = vsel %vm1543_vm3, %v3007_v50, 0  ;;  %v3827_v50 = vld [vmem:[%s4951_s10 + $0x18] sm:$0xff] }
 0xb76   : > { %v2856_v1 = vsel %vm2853_vm7, %v2855_v61, %v2851_v62 }
 0xb77   : > { %v4749_v0 = vmul.f32 %v3991_v23, %v2856_v1 }
 0xb79   : > { %v4001_v8 = vpop.eup %4000  ;;  %3099 = vst.msk [vmem:[%s4889_s6] sm:$0xff] %vm1346_vm1, %v4749_v0  ;;  %v2903_v48 = vpack.c.bf16 %v4749_v0, %v4749_v0  ;;  %s4947_s6 = sld [smem:[#allocation28_spill]] }
 0xb7a   : > { %v2886_v3 = vmul.f32 %v4001_v8, %v2842_v60  ;;  %v2836_v5 = vpop.xlane.xlu0 %2835  ;;  %vm2891_vm8 = vweird.f32 %v4001_v8 }
 0xb7b   : > { %4002 = vrcp.f32 %v2836_v5  ;;  %vm2892_vm10 = vmor %vm2890_vm9, %vm2891_vm8  ;;  %v2868_v17 = vand.u32 2147483648, %v2836_v5  ;;  %v2866_v20 = vand.u32 2147483647, %v2836_v5  ;;  %vm2862_vm13 = vweird.f32 %v2836_v5 }
 0xb7c   : > { %v2887_v6 = vsub.f32 1.0, %v2886_v3 }
 0xb7d   : > { %v2869_v23 = vor.u32 1.1754944e-38, %v2868_v17  ;;  %vm2867_vm15 = vcmp.eq.f32.partialorder %v2866_v20, 8.507059e+37 }
 0xb7e   : > { %v2888_v63 = vmul.f32 %v4001_v8, %v2887_v6 }
 0xb80   : > { %v2889_v4 = vadd.f32 %v4001_v8, %v2888_v63 }
 0xb81   : > { %v4003_v10 = vpop.eup %4002 }
 0xb82   : > { %v2893_v12 = vsel %vm2892_vm10, %v4001_v8, %v2889_v4  ;;  %v2858_v13 = vmul.f32 %v4003_v10, %v2836_v5  ;;  %v2839_v14 = vpop.xlane.xlu0 %2838  ;;  %vm2863_vm12 = vweird.f32 %v4003_v10 }
 0xb83   : > { %v2898_v15 = vsel %vm2895_vm11, %v2897_v11, %v2893_v12  ;;  %4004 = vrcp.f32 %v2839_v14  ;;  %vm2864_vm14 = vmor %vm2862_vm13, %vm2863_vm12  ;;  %v2880_v37 = vand.u32 2147483647, %v2839_v14  ;;  %vm2876_vm4 = vweird.f32 %v2839_v14 }
 0xb84   : > { %v2902_v16 = vmul.f32 %v4729_v34, %v2898_v15  ;;  %v2859_v53 = vsub.f32 1.0, %v2858_v13  ;;  %v2882_v34 = vand.u32 2147483648, %v2839_v14  ;;  %v3945_v15 = vld [vmem:[%s4947_s6] ss:$0 sm:$0xff]  ;;  %s4949_s6 = sld [smem:[#allocation30_spill]]  ;;  %vm3240_vm11 = vcmask 523264  }
 0xb85   : > { %vm2881_vm6 = vcmp.eq.f32.partialorder %v2880_v37, 8.507059e+37  ;;  %v3946_v37 = vld [vmem:[%s4948_s5] ss:$0 sm:$0xff]  ;;  %s4952_s5 = sld [smem:[#allocation31_spill]] }
 0xb86   : > { %v2906_v18 = vpack.c.bf16 %v2902_v16, %v2902_v16  ;;  %v2860_v19 = vmul.f32 %v4003_v10, %v2859_v53  ;;  %v2883_v39 = vor.u32 1.1754944e-38, %v2882_v34 }
 0xb88   : > { %v2861_v21 = vadd.f32 %v4003_v10, %v2860_v19  ;;  %3743 = vmatmul.msk.bf16.vlgmr.msra.gmra.mxu3 %vm1346_vm1, %v2906_v18 }
 0xb89   : > { %v4005_v22 = vpop.eup %4004 }
 0xb8a   : > { %v2865_v24 = vsel %vm2864_vm14, %v4003_v10, %v2861_v21  ;;  %v2872_v25 = vmul.f32 %v4005_v22, %v2839_v14  ;;  %v2935_v26 = vpop.permute.xlu1 %2934  ;;  %vm2877_vm2 = vweird.f32 %v4005_v22 }
 0xb8b   : > { %v2870_v28 = vsel %vm2867_vm15, %v2869_v23, %v2865_v24  ;;  %v2940_v31 = vsel %vm1543_vm3, %v2935_v26, 0  ;;  %vm2878_vm5 = vmor %vm2876_vm4, %vm2877_vm2 }
 0xb8c   : > { %v2900_v29 = vmul.f32 %v4735_v32, %v2870_v28  ;;  %v2873_v33 = vsub.f32 1.0, %v2872_v25  ;;  %2949 = vmatpush.bf16.msra.mxu1 %v2940_v31 }
 0xb8e   : > { %v2904_v35 = vpack.c.bf16 %v2900_v29, %v2900_v29  ;;  %v2874_v36 = vmul.f32 %v4005_v22, %v2873_v33 }
 0xb90   : > { %v2875_v38 = vadd.f32 %v4005_v22, %v2874_v36  ;;  %3741 = vmatmul.msk.bf16.vlgmr.msra.gmra.mxu1 %vm1346_vm1, %v2904_v35 }
 0xb92   : > { %v2879_v40 = vsel %vm2878_vm5, %v4005_v22, %v2875_v38 }
 0xb93   : > { %v2884_v43 = vsel %vm2881_vm6, %v2883_v39, %v2879_v40  ;;  %v3947_v40 = vld [vmem:[%s4949_s6] ss:$0 sm:$0xff]  ;;  %s4953_s6 = sld [smem:[#allocation32_spill]] }
 0xb94   : > { %v2901_v32 = vmul.f32 %v4740_v46, %v2884_v43  ;;  %v3034_v46 = vsel %vm1543_vm3, %v3008_v41, 0  ;;  %v3823_v41 = vld [vmem:[%s4950_s8 + $0x8] sm:$0xff] }
 0xb95   : > { %v2911_v44 = vpop.permute.xlu0 %2910  ;;  %3043 = vmatpush.bf16.msrb.mxu1 %v3034_v46  ;;  %v3822_v46 = vld [vmem:[%s4950_s8] sm:$0xff]  ;;  %s4954_s8 = sld [smem:[#allocation34_spill]] }
 0xb96   : > { %v2905_v45 = vpack.c.bf16 %v2901_v32, %v2901_v32  ;;  %v2916_v47 = vsel %vm1543_vm3, %v2911_v44, 0 }
 0xb97   : > { %2925 = vmatpush.bf16.msra.mxu0 %v2916_v47 }
 0xb98   : > { %3742 = vmatmul.msk.bf16.vlgmr.msra.gmra.mxu2 %vm1346_vm1, %v2905_v45 }
 0xb99   : > { %3248 = vmatpush.bf16.msra.mxu1 %v3827_v50 }
 0xb9a   : > { %3740 = vmatmul.msk.bf16.vlgmr.msra.gmra.mxu0 %vm1346_vm1, %v2903_v48 }
 0xb9b   : > { %3024 = vmatpush.bf16.msrb.mxu0 %v3015_v54 }
 0xb9d   : > { %3249 = vmatpush.bf16.msra.mxu1 %v3826_v55 }
 0xb9f   : > { %3195 = vmatpush.bf16.msra.mxu0 %v3823_v41 }
 0xba3   : > { %3196 = vmatpush.bf16.msra.mxu0 %v3822_v46 }
 0xc0b   : > { %v2999_v56 = vpop.f32.mrf.mxu3 }
 0xc0c   : > { %v3006_v57 = vpack.c.bf16 %v2999_v56, %v2999_v56 }
 0xc0d   : > { %v2951_v58 = vpop.f32.mrf.mxu1 }
 0xc0e   : > { %v3004_v30 = vpack.c.bf16 %v2951_v58, %v2951_v58  ;;  %3747 = vmatmul.msk.bf16.vlgmr.msrb.gmra.mxu3 %vm1346_vm1, %v3006_v57 }
 0xc10   : > { %3745 = vmatmul.msk.bf16.vlgmr.msrb.gmra.mxu1 %vm1346_vm1, %v3004_v30 }
 0xc13   : > { %v3001_v59 = vpop.f32.mrf.mxu3 }
 0xc15   : > { %v2953_v60 = vpop.f32.mrf.mxu1 }
 0xc17   : > { %v2927_v27 = vpop.f32.mrf.mxu0 }
 0xc18   : > { %v3003_v61 = vpack.c.bf16 %v2927_v27, %v2927_v27 }
 0xc1a   : > { %3744 = vmatmul.msk.bf16.vlgmr.msrb.gmra.mxu0 %vm1346_vm1, %v3003_v61  ;;  %v3948_v61 = vld [vmem:[%s4952_s5] ss:$0 sm:$0xff]  ;;  %s4810_s5 = sshll.u32 %s4384_s0, 3 }
 0xc1b   : > { %v2975_v62 = vpop.f32.mrf.mxu2 }
 0xc1c   : > { %v3005_v1 = vpack.c.bf16 %v2975_v62, %v2975_v62  ;;  %v3949_v62 = vld [vmem:[%s4953_s6] ss:$0 sm:$0xff]  ;;  %s3294_s6 = scalar_lea.hbm %s4356_s9, %s4810_s5 }
 0xc1e   : > { %3746 = vmatmul.msk.bf16.vlgmr.msrb.gmra.mxu2 %vm1346_vm1, %v3005_v1 }
 0xc1f   : > { %v2929_v0 = vpop.f32.mrf.mxu0 }
 0xc23   : > { %v2977_v8 = vpop.f32.mrf.mxu2 }
 0xc8d   : > { %v3045_v3 = vpop.f32.mrf.mxu1 }
 0xc8e   : > { %v3088_v10 = vsel %vm1235_vm0, %v3045_v3, 0.0 }
 0xc91   : > { %v3083_v5 = vpop.f32.mrf.mxu3 }
 0xc92   : > { %v3092_v16 = vsel %vm1235_vm0, %v3083_v5, 0.0  ;;  %v3825_v5 = vld [vmem:[%s4951_s10 + $0x8] sm:$0xff] }
 0xc93   : > { %3250 = vmatpush.bf16.msra.mxu1 %v3825_v5 }
 0xc95   : > { %v3047_v6 = vpop.f32.mrf.mxu1 }
 0xc96   : > { %v3824_v6 = vld [vmem:[%s4951_s10] sm:$0xff]  ;;  %s3298_s10 = sshll.u32 %s3294_s6, 4  ;;  %s3299_s10 = int_to_ptr.hbm [resolvable:$true] %s3298_s10 }
 0xc97   : > { %v3026_v7 = vpop.f32.mrf.mxu0  ;;  %3251 = vmatpush.bf16.msra.mxu1 %v3824_v6  ;;  %s4024_s15 = sshra.s32 %s3299_s10, 4  ;;  %s4025_s15 = int_to_ptr.hbm [resolvable:$true] %s4024_s15 }
 0xc98   : > { %v3087_v9 = vsel %vm1235_vm0, %v3026_v7, 0.0  ;;  %v3950_v7 = vld [vmem:[%s4954_s8] ss:$0 sm:$0xff]  ;;  %s4817_s8 = scalar_lea.sflag [#allocation5], %s3264_s12  ;;  %s4026_s16 = scalar_lea.hbm %s4025_s15, 8 }
 0xc99   : > { %v3085_v63 = vpop.f32.mrf.mxu3  ;;  %v3089_v11 = vadd.f32 %v3088_v10, %v3087_v9  ;;  %p4027_p11 = scmp.ne.s32.totalorder %s4025_s15, %s4026_s16  ;;  %p4031_p0 = scmp.lt.s32.totalorder %s4025_s15, %s4356_s9 }
 0xc9a   : > { %p4032_p1 = scmp.lt.s32.totalorder %s4030_s17, %s4026_s16 }
 0xc9b   : > { %p4028_p12 = pnand %p4027_p11, %p4403_p5 }
 0xc9c   : > { %p4033_p2 = por %p4032_p1, %p4031_p0 }
 0xc9d   : > { %p4029_p13 = pneg %p4028_p12 }
 0xc9f   : > { %v3028_v4 = vpop.f32.mrf.mxu0  ;;  %p4034_p3 = pnand %p4033_p2, %p4029_p13 }
 0xca1   : > { %v3064_v12 = vpop.f32.mrf.mxu2 }
 0xca2   : > { %v3090_v13 = vsel %vm1235_vm0, %v3064_v12, 0.0 }
 0xca3   : > { %v3091_v14 = vadd.f32 %v3090_v13, %v3089_v11 }
 0xca5   : > { %v3093_v53 = vadd.f32 %v3092_v16, %v3091_v14 }
 0xca7   : > { %v3098_v17 = vadd.f32 %v3945_v15, %v3093_v53 }
 0xca9   : > { %v3066_v18 = vpop.f32.mrf.mxu2  ;;  %v3100_v19 = vadd.f32 %v3098_v17, %v4681_v52 }
 0xcab   : > { %v3103_v20 = vsel %vm1235_vm0, %v3100_v19, 0.0 }
 0xcac   : > { %3104 = vadd.xlane.f32.xlu0 %v3103_v20 }
 0xd1f   : > { %v3105_v21 = vpop.xlane.xlu0 %3104 }
 0xd20   : > { %v3106_v22 = vmul.f32 %v3105_v21, %v4515_v2 }
 0xd22   : > { %v3107_v23 = vsub.f32 %v3100_v19, %v3106_v22 }
 0xd24   : > { %v3108_v24 = vmul.f32 %v3107_v23, %v3107_v23 }
 0xd26   : > { %v3109_v25 = vsel %vm1235_vm0, %v3108_v24, 0.0 }
 0xd27   : > { %3110 = vadd.xlane.f32.xlu2 %v3109_v25 }
 0xd9a   : > { %v3111_v26 = vpop.xlane.xlu2 %3110 }
 0xd9b   : > { %v3112_v28 = vmul.f32 %v3111_v26, %v4515_v2 }
 0xd9d   : > { %v3113_v31 = vadd.f32 1e-06, %v3112_v28 }
 0xd9f   : > { %4006 = vrsqrt.f32 %v3113_v31  ;;  %vm3120_vm3 = vweird.f32 %v3113_v31 }
 0xda5   : > { %v4007_v29 = vpop.eup %4006 }
 0xda6   : > { %v3115_v52 = vmul.f32 %v4007_v29, %v3113_v31  ;;  %vm3121_vm1 = vweird.f32 %v4007_v29 }
 0xda7   : > { %vm3122_vm7 = vmor %vm3120_vm3, %vm3121_vm1 }
 0xda8   : > { %v3116_v33 = vmul.f32 %v4007_v29, %v3115_v52 }
 0xdaa   : > { %v3117_v34 = vmul.f32 0.5, %v3116_v33 }
 0xdac   : > { %v3118_v35 = vsub.f32 1.5, %v3117_v34 }
 0xdae   : > { %v3119_v36 = vmul.f32 %v4007_v29, %v3118_v35 }
 0xdb0   : > { %v3123_v38 = vsel %vm3122_vm7, %v4007_v29, %v3119_v36 }
 0xdb1   : > { %v3124_v39 = vmul.f32 %v3123_v38, %v3107_v23 }
 0xdb3   : > { %v3128_v43 = vmul.f32 %v3946_v37, %v3124_v39 }
 0xdb5   : > { %v4791_v32 = vadd.f32 %v3947_v40, %v3128_v43 }
 0xdb7   : > { %v3135_v44 = vsel %vm1235_vm0, %v4791_v32, 0.0 }
 0xdb8   : > { %3136 = vadd.xlane.f32.xlu1 %v3135_v44 }
 0xe2b   : > { %v3137_v45 = vpop.xlane.xlu1 %3136 }
 0xe2c   : > { %v3138_v47 = vmul.f32 %v3137_v45, %v4515_v2 }
 0xe2e   : > { %v3139_v48 = vsub.f32 %v4791_v32, %v3138_v47 }
 0xe30   : > { %v3140_v49 = vmul.f32 %v3139_v48, %v3139_v48 }
 0xe32   : > { %v3141_v42 = vsel %vm1235_vm0, %v3140_v49, 0.0 }
 0xe33   : > { %3142 = vadd.xlane.f32.xlu2 %v3141_v42 }
 0xea6   : > { %v3143_v54 = vpop.xlane.xlu2 %3142 }
 0xea7   : > { %v3144_v51 = vmul.f32 %v3143_v54, %v4515_v2 }
 0xea9   : > { %v3145_v56 = vadd.f32 1e-06, %v3144_v51 }
 0xeab   : > { %4008 = vrsqrt.f32 %v3145_v56  ;;  %vm3152_vm9 = vweird.f32 %v3145_v56 }
 0xeb1   : > { %v4009_v57 = vpop.eup %4008 }
 0xeb2   : > { %v3147_v58 = vmul.f32 %v4009_v57, %v3145_v56  ;;  %vm3153_vm8 = vweird.f32 %v4009_v57 }
 0xeb3   : > { %vm3154_vm10 = vmor %vm3152_vm9, %vm3153_vm8 }
 0xeb4   : > { %v3148_v30 = vmul.f32 %v4009_v57, %v3147_v58 }
 0xeb6   : > { %v3149_v59 = vmul.f32 0.5, %v3148_v30 }
 0xeb8   : > { %v3150_v60 = vsub.f32 1.5, %v3149_v59 }
 0xeba   : > { %v3151_v27 = vmul.f32 %v4009_v57, %v3150_v60 }
 0xebc   : > { %v3155_v2 = vsel %vm3154_vm10, %v4009_v57, %v3151_v27 }
 0xebd   : > { %v3156_v1 = vmul.f32 %v3155_v2, %v3139_v48 }
 0xebf   : > { %v3160_v0 = vmul.f32 %v3948_v61, %v3156_v1 }
 0xec1   : > { %v3164_v8 = vadd.f32 %v3949_v62, %v3160_v0 }
 0xec3   : > { %v3165_v3 = vpack.c.bf16 %v3164_v8, %v3164_v8 }
 0xec5   : > { %3756 = vmatmul.msk.bf16.vlgmr.msra.gmra.mxu0 %vm1235_vm0, %v3165_v3 }
 0xf42   : > { %v3198_v63 = vpop.f32.mrf.mxu0 }
 0xf43   : > { %v3199_v9 = vadd.f32 %v3950_v7, %v3198_v63 }
 0xf45   : > { %v3202_v4 = vmax.f32 %v3199_v9, 0.0 }
 0xf47   : > { %v3203_v10 = vpack.c.bf16 %v3202_v4, %v3202_v4 }
 0xf49   : > { %3773 = vmatmul.msk.bf16.vlgmr.msra.gmra.mxu1 %vm3240_vm11, %v3203_v10 }
 0xf4a   : > { %v3200_v11 = vpop.f32.mrf.mxu0 }
 0xf4b   : > { %4037 = shalt.err (!%p4034_p3)
}
 0xf4c   : > { %3829 = dma.vmem_to_hbm [thread:$0]  (%p4403_p5), %s3297_s14, 128, %s3299_s10, %s4817_s8  }
 0xf4d   : > { %s3308_s13 = scalar_lea.hbm %s4361_s27, %s4810_s5  ;;  %s4956_s12 = scalar_lea.vmem [#allocation6], %s4614_s3 }
 0xf4e   : > { %s3310_s0 = sshll.u32 %s4956_s12, 4  ;;  %s3312_s6 = sshll.u32 %s3308_s13, 4  ;;  %s3311_s0 = int_to_ptr.vmem [resolvable:$true] %s3310_s0  ;;  %s3313_s6 = int_to_ptr.hbm [resolvable:$true] %s3312_s6 }
 0xf4f   : > { %s4052_s17 = sshra.s32 %s3313_s6, 4  ;;  %s4058_s15 = scalar_lea.hbm %s4361_s27, 16  ;;  %s4053_s17 = int_to_ptr.hbm [resolvable:$true] %s4052_s17 }
 0xf50   : > { %s4054_s16 = scalar_lea.hbm %s4053_s17, 8  ;;  %p4059_p9 = scmp.lt.s32.totalorder %s4053_s17, %s4361_s27 }
 0xf51   : > { %p4055_p4 = scmp.ne.s32.totalorder %s4053_s17, %s4054_s16  ;;  %p4060_p10 = scmp.lt.s32.totalorder %s4058_s15, %s4054_s16 }
 0xf53   : > { %p4056_p7 = pnand %p4055_p4, %p4403_p5  ;;  %p4061_p11 = por %p4060_p10, %p4059_p9 }
 0xf55   : > { %p4057_p8 = pneg %p4056_p7 }
 0xf57   : > { %p4062_p12 = pnand %p4061_p11, %p4057_p8 }
 0xf59   : > { %4065 = shalt.err (!%p4062_p12)
}
 0xf5a   : > { %3830 = dma.vmem_to_hbm [thread:$0]  (%p4403_p5), %s3311_s0, 128, %s3313_s6, %s4817_s8   ;;  %v3951_v12 = vld [vmem:[%s4346_s4] ss:$0 sm:$0xff] }
 0xf5b   : > { %s3280_s14 = scalar_lea.hbm %s4351_s21, %s4810_s5  ;;  %s1152_s10 = scalar_lea.vmem [#allocation2], %s4614_s3 }
 0xf5c   : > { %s3282_s13 = sshll.u32 %s1152_s10, 4  ;;  %s3284_s12 = sshll.u32 %s3280_s14, 4  ;;  %s3283_s13 = int_to_ptr.vmem [resolvable:$true] %s3282_s13  ;;  %s3285_s12 = int_to_ptr.hbm [resolvable:$true] %s3284_s12 }
 0xf5d   : > { %s4957_s17 = sand.u32 1, %s4124_s1   ;;  %s4080_s15 = sshra.s32 %s3285_s12, 4  ;;  %s4081_s15 = int_to_ptr.hbm [resolvable:$true] %s4080_s15 }
 0xf5e   : > { %s3260_s16 = scalar_lea.sflag [#allocation3], %s4957_s17  ;;  %s4082_s8 = scalar_lea.hbm %s4081_s15, 8 }
 0xf5f   : > { %p4083_p13 = scmp.ne.s32.totalorder %s4081_s15, %s4082_s8  ;;  %s4086_s3 = scalar_lea.hbm %s4351_s21, 16 }
 0xf60   : > { %p4087_p2 = scmp.lt.s32.totalorder %s4081_s15, %s4351_s21  ;;  %p4088_p3 = scmp.lt.s32.totalorder %s4086_s3, %s4082_s8 }
 0xf61   : > { %p4084_p0 = pnand %p4083_p13, %p4403_p5 }
 0xf62   : > { %p4089_p4 = por %p4088_p3, %p4087_p2 }
 0xf63   : > { %p4085_p1 = pneg %p4084_p0 }
 0xf65   : > { %p4090_p7 = pnand %p4089_p4, %p4085_p1 }
 0xfc6   : > { %v3253_v13 = vpop.f32.mrf.mxu1 }
 0xfc7   : > { %v3254_v14 = vadd.f32 %v3951_v12, %v3253_v13 }
 0xfc9   : > { %v3257_v15 = vadd.f32 %v3254_v14, %v4791_v32 }
 0xfcb   : > { %3258 = vst.msk [vmem:[%s1152_s10] sm:$0xff] %vm1235_vm0, %v3257_v15 }
 0xfcc   : > { %4093 = shalt.err (!%p4090_p7)
}
 0xfcd   : > { %3828 = dma.vmem_to_hbm [thread:$0]  (%p4403_p5), %s3283_s13, 128, %s3285_s12, %s3260_s16  }
 0xfce   : > { %v3255_v16 = vpop.f32.mrf.mxu1 }
 0xfcf PF: > { %p3844_p8 = scmp.ge.s32.totalorder %s4132_s7, 2  ;;  %s3324_s5 = sand.u32 1, %s4120_s28  }
 0xfd0   : > { %s3325_s0 = scalar_lea.sflag [#allocation3], %s3324_s5 }
 0xfd1   : > { %p3835_p9 = pnand %p3844_p8, %p4407_p6 }
 0xfd3   : > { %p3836_p10 = pneg %p3835_p9 }
 0xfd5   : > { %4111 = dma.done.wait (%p3836_p10), %s3325_s0, 128  }
 0xfd6   : > { %4113 = vsyncadd (%p3836_p10), %s3325_s0, 4294967168  ;;  %s4958_s6 = sadd.s32 4294967294, %s4132_s7  }
 0xfd7   : > { %s3334_s14 = sand.u32 1, %s4958_s6  }
 0xfd8   : > { %s3335_s10 = scalar_lea.sflag [#allocation5], %s3334_s14 }
 0xfd9   : > { %4115 = dma.done.wait (%p3836_p10), %s3335_s10, 256  }
 0xfda   : > { %4117 = vsyncadd (%p3836_p10), %s3335_s10, 4294967040  ;;  %p87_p5 = scmp.ge.s32.totalorder %s4388_s11, 4   ;;  %s4959_s28 = smov %s4124_s1 }
 0xfdb   : > { %s4960_s1 = smov %s4128_s2  ;;  %s4961_s2 = smov %s4401_s18 }
 0xfdc   : > { %s4962_s7 = smov %s4388_s11  ;;  %89 = sbr.rel (!%p87_p5) target bundleno = 73 (0x49), region = 274 }
 0xfe1   :  { %3351 = vsyncpa [#allocation3], 1 }
 0xfe2   :  { %3353 = vsyncpa [#allocation3 + $0x1], 1 }
 0xfe3   :  { %3354 = vsyncpa [#allocation5], 1 }
 0xfe4   :  { %3356 = vsyncpa [#allocation5 + $0x1], 1 }

</bundles_post_ra>
